<compile_context>
chip_gen: v5e
topology: v5e:2x2
jax: 0.10.0
libtpu: 0.0.40
codegen_flags: <defaults>
</compile_context>

<pallas_src>
import functools

import jax
import jax.numpy as jnp
from jax import lax
from jax.experimental import pallas as pl
from jax.experimental.pallas import tpu as pltpu

EPS = 1e-5
EXPANSION = 4


# ------------------------------ tiling helpers ------------------------------


def _pick_row_tile(h, wsp, target_rows=8):
    """Row-tile height th dividing h with th*wsp a multiple of 8."""
    for th in range(min(target_rows, h), 0, -1):
        if h % th == 0 and (th * wsp) % 8 == 0:
            return th
    raise ValueError(
        f"no valid row tile for H={h}, W={wsp}; "
        "TODO(synk): support th*W not a multiple of 8 (e.g. 7x7 maps).")


def _vmem_limit_bytes(th, wsp, cin, width, cout, x_isize, c_isize, o_isize):
    m_halo = (th + 2) * wsp
    m_tile = th * wsp
    scratch = (2 * m_halo * cin * x_isize          # xbuf (double-buffered)
               + 3 * m_halo * width * c_isize      # h1c / h1l / h1r
               + m_tile * width * 4)               # f32 accumulator
    weights = ((cin * width + 9 * width * width + width * cout) * c_isize
               + (2 * width + cout) * 4)
    io = 2 * m_tile * cout * o_isize               # double-buffered output tile
    total = scratch + 2 * weights + io
    return int(min(max(2 * total + (4 << 20), 32 << 20), 128 << 20))


# --------------------------------- kernel ------------------------------------


def _fused_bottleneck_kernel(
    x_hbm,                       # (N, H, W, Cin) NHWC in HBM (manual halo DMA)
    w1_ref, b1_ref,              # (Cin, width) cdt, (1, width) f32
    w2_ref, b2_ref,              # (9, width, width) cdt, (1, width) f32
    w3_ref, b3_ref,              # (width, Cout) cdt, (1, Cout) f32
    o_ref,                       # (th*W, Cout) lane-dense 2D output tile
    xbuf,                        # (2, th+2, W, Cin) VMEM halo tile (dbl-buffered)
    h1c_ref, h1l_ref, h1r_ref,   # ((th+2)*W, width) VMEM conv1 output + W-shifts
    acc_ref,                     # (th*W, width) f32 VMEM accumulator
    sems,                        # (2, 3) DMA semaphores
    *, th, hsp, wsp, nrt):
    b = pl.program_id(0)
    r = pl.program_id(1)
    slot = lax.rem(r, 2)

    def halo_copies(row_tile, slot_):
        r0 = row_tile * th
        # Clamped at the image border; the garbage rows are zeroed post-conv1.
        top = jnp.maximum(r0 - 1, 0)
        bot = jnp.minimum(r0 + th, hsp - 1)
        return (
            pltpu.make_async_copy(x_hbm.at[b, pl.ds(r0, th)],
                                  xbuf.at[slot_, pl.ds(1, th)],
                                  sems.at[slot_, 0]),
            pltpu.make_async_copy(x_hbm.at[b, pl.ds(top, 1)],
                                  xbuf.at[slot_, pl.ds(0, 1)],
                                  sems.at[slot_, 1]),
            pltpu.make_async_copy(x_hbm.at[b, pl.ds(bot, 1)],
                                  xbuf.at[slot_, pl.ds(th + 1, 1)],
                                  sems.at[slot_, 2]),
        )

    @pl.when(r == 0)                      # prime the per-image DMA chain
    def _():
        for cp in halo_copies(0, 0):
            cp.start()

    @pl.when(r + 1 < nrt)                 # prefetch next row tile (other slot)
    def _():
        for cp in halo_copies(r + 1, lax.rem(r + 1, 2)):
            cp.start()

    for cp in halo_copies(r, slot):       # wait for this tile's halo
        cp.wait()

    cdt = w1_ref.dtype
    cin = xbuf.shape[-1]
    width = w1_ref.shape[-1]
    m_halo = (th + 2) * wsp

    x_all = xbuf[slot].reshape(m_halo, cin)

    # ---- conv1 (1x1) + folded BN bias + ReLU on all halo rows ----
    h1 = jnp.dot(x_all, w1_ref[...], preferred_element_type=jnp.float32)
    h1 = jnp.maximum(h1 + b1_ref[...], 0.0)

    # Zero the h1 halo rows that fall outside the image (3x3 zero padding in H).
    row = lax.broadcasted_iota(jnp.int32, (m_halo, 1), 0)
    kill = ((row < wsp) & (r == 0)) | ((row >= (th + 1) * wsp) & (r == nrt - 1))
    h1 = jnp.where(kill, 0.0, h1)

    # Pre-build the two W-shifted copies once per tile (3x3 zero padding in W);
    # the 9 tap matmuls below then use only 8-aligned row slices.
    col = row % wsp
    zrow = jnp.zeros((1, width), jnp.float32)
    h1l = jnp.where(col == 0, 0.0,
                    jnp.concatenate([zrow, h1[:-1, :]], axis=0))
    h1r = jnp.where(col == wsp - 1, 0.0,
                    jnp.concatenate([h1[1:, :], zrow], axis=0))
    h1c_ref[...] = h1.astype(cdt)
    h1l_ref[...] = h1l.astype(cdt)
    h1r_ref[...] = h1r.astype(cdt)

    # ---- conv2 (3x3, stride=1, pad=1, groups=1): 9 shifted-tap MXU GEMMs ----
    first = True
    for kh in range(3):
        lo = kh * wsp
        for kw, src in enumerate((h1l_ref, h1c_ref, h1r_ref)):
            contrib = jnp.dot(src[lo:lo + th * wsp, :], w2_ref[kh * 3 + kw],
                              preferred_element_type=jnp.float32)
            if first:
                acc_ref[...] = contrib
                first = False
            else:
                acc_ref[...] += contrib

    # ---- conv3 (1x1) + folded BN bias + residual + ReLU epilogue (f32) ----
    h2 = jnp.maximum(acc_ref[...] + b2_ref[...], 0.0)
    resid = x_all[wsp:(th + 1) * wsp, :].astype(jnp.float32)
    y = jnp.dot(h2.astype(cdt), w3_ref[...], preferred_element_type=jnp.float32)
    y = y + b3_ref[...] + resid
    o_ref[...] = jnp.maximum(y, 0.0).astype(o_ref.dtype)


# --------------------------- pallas wrappers ----------------------------------


def bottleneck_forward_nhwc(x_nhwc, params, *, target_rows=8):
    """Fused Bottleneck forward on an NHWC activation. Returns NHWC."""
    n, hsp, wsp, cin = x_nhwc.shape
    w1, b1 = params["w1"], params["b1"]
    w2, b2 = params["w2"], params["b2"]
    w3, b3 = params["w3"], params["b3"]
    width = w1.shape[1]
    cout = w3.shape[1]
    if cin != cout:
        raise NotImplementedError(
            "TODO(synk): downsample branch (Cin != Cout*expansion) not implemented")
    if wsp % 8 != 0:
        raise NotImplementedError("TODO(synk): spatial W must be a multiple of 8")

    th = _pick_row_tile(hsp, wsp, target_rows)
    nrt = hsp // th
    cdt = w1.dtype
    vmem = _vmem_limit_bytes(th, wsp, cin, width, cout,
                             x_nhwc.dtype.itemsize, jnp.dtype(cdt).itemsize,
                             x_nhwc.dtype.itemsize)

    kernel = functools.partial(_fused_bottleneck_kernel,
                               th=th, hsp=hsp, wsp=wsp, nrt=nrt)
    out2d = pl.pallas_call(
        kernel,
        out_shape=jax.ShapeDtypeStruct((n * hsp * wsp, cout), x_nhwc.dtype),
        grid=(n, nrt),
        in_specs=[
            pl.BlockSpec(memory_space=pl.ANY),                        # x (halo DMA)
            pl.BlockSpec((cin, width), lambda b, r: (0, 0)),          # w1
            pl.BlockSpec((1, width), lambda b, r: (0, 0)),            # b1
            pl.BlockSpec((9, width, width), lambda b, r: (0, 0, 0)),  # w2
            pl.BlockSpec((1, width), lambda b, r: (0, 0)),            # b2
            pl.BlockSpec((width, cout), lambda b, r: (0, 0)),         # w3
            pl.BlockSpec((1, cout), lambda b, r: (0, 0)),             # b3
        ],
        out_specs=pl.BlockSpec((th * wsp, cout),
                               lambda b, r: (b * nrt + r, 0)),
        scratch_shapes=[
            pltpu.VMEM((2, th + 2, wsp, cin), x_nhwc.dtype),     # xbuf
            pltpu.VMEM(((th + 2) * wsp, width), cdt),            # h1 center
            pltpu.VMEM(((th + 2) * wsp, width), cdt),            # h1 left-shift
            pltpu.VMEM(((th + 2) * wsp, width), cdt),            # h1 right-shift
            pltpu.VMEM((th * wsp, width), jnp.float32),          # f32 acc
            pltpu.SemaphoreType.DMA((2, 3)),
        ],
        compiler_params=pltpu.CompilerParams(
            dimension_semantics=("parallel", "arbitrary"),
            vmem_limit_bytes=vmem),
    )(x_nhwc, w1, b1, w2, b2, w3, b3)
    return out2d.reshape(n, hsp, wsp, cout)


@jax.jit
def bottleneck_forward(x_nchw, params):
    # TODO(synk): production callers should keep activations NHWC end-to-end;
    # these two full-activation transposes exist only for PyTorch NCHW parity.
    x = jnp.transpose(x_nchw, (0, 2, 3, 1))
    out = bottleneck_forward_nhwc(x, params)
    return jnp.transpose(out, (0, 3, 1, 2))


# --------------------------- params & reference -------------------------------


def init_raw_params(key, in_channel, out_channel, groups=1, width_per_group=64):
    width = int(out_channel * (width_per_group / 64.0)) * groups
    cout = out_channel * EXPANSION
    keys = jax.random.split(key, 15)
    w1_t = 0.1 * jax.random.normal(keys[0], (width, in_channel, 1, 1), jnp.float32)
    w2_t = 0.1 * jax.random.normal(keys[1], (width, width, 3, 3), jnp.float32)
    w3_t = 0.1 * jax.random.normal(keys[2], (cout, width, 1, 1), jnp.float32)

    def bn(kg, kb, km, kv, c):
        gamma = 1.0 + 0.1 * jax.random.normal(kg, (c,), jnp.float32)
        beta = 0.1 * jax.random.normal(kb, (c,), jnp.float32)
        mean = 0.1 * jax.random.normal(km, (c,), jnp.float32)
        var = jnp.abs(jax.random.normal(kv, (c,), jnp.float32)) + 0.5
        scale = gamma / jnp.sqrt(var + EPS)
        return scale, beta - mean * scale

    s1, b1 = bn(keys[3], keys[4], keys[5], keys[6], width)
    s2, b2 = bn(keys[7], keys[8], keys[9], keys[10], width)
    s3, b3 = bn(keys[11], keys[12], keys[13], keys[14], cout)
    return dict(w1_t=w1_t, w2_t=w2_t, w3_t=w3_t,
                s1=s1, b1=b1, s2=s2, b2=b2, s3=s3, b3=b3)


def fold_params(raw, dtype=jnp.float32):
    """Fold eval-mode BN into conv weights; cast MXU operands to `dtype`."""
    width = raw["w2_t"].shape[0]
    w1 = (jnp.transpose(raw["w1_t"][:, :, 0, 0]) * raw["s1"][None, :]).astype(dtype)
    w2 = (jnp.transpose(raw["w2_t"], (2, 3, 1, 0)).reshape(9, width, width)
          * raw["s2"][None, None, :]).astype(dtype)
    w3 = (jnp.transpose(raw["w3_t"][:, :, 0, 0]) * raw["s3"][None, :]).astype(dtype)
    return dict(
        w1=w1, b1=raw["b1"].reshape(1, -1).astype(jnp.float32),
        w2=w2, b2=raw["b2"].reshape(1, -1).astype(jnp.float32),
        w3=w3, b3=raw["b3"].reshape(1, -1).astype(jnp.float32))


def reference_forward(x_nchw, raw):
    def conv(x, w, pad=0):
        return lax.conv_general_dilated(
            x, w, (1, 1), [(pad, pad), (pad, pad)],
            dimension_numbers=("NCHW", "OIHW", "NCHW"))

    def bn(x, scale, bias):
        return x * scale.reshape(1, -1, 1, 1) + bias.reshape(1, -1, 1, 1)

    identity = x_nchw
    out = jnp.maximum(bn(conv(x_nchw, raw["w1_t"]), raw["s1"], raw["b1"]), 0.0)
    out = jnp.maximum(bn(conv(out, raw["w2_t"], pad=1), raw["s2"], raw["b2"]), 0.0)
    out = bn(conv(out, raw["w3_t"]), raw["s3"], raw["b3"]) + identity
    return jnp.maximum(out, 0.0)


# ------------------------------------ main ------------------------------------

if __name__ == "__main__":
    key = jax.random.PRNGKey(0)
    k_x, k_p = jax.random.split(key)

    # Identity residual requires in_channel == out_channel * expansion.
    out_channel = 32
    in_channel = out_channel * EXPANSION      # 128 (lane-dense output)
    batch, spatial = 2, 16                    # grid (2 images, 2 row tiles)

    x = jax.random.normal(k_x, (batch, in_channel, spatial, spatial), jnp.float32)
    raw = init_raw_params(k_p, in_channel, out_channel)
    y_ref = reference_forward(x, raw)

    # f32 MXU path: tight numerical check against the XLA conv reference.
    params_f32 = fold_params(raw, jnp.float32)
    y32 = jax.block_until_ready(bottleneck_forward(x, params_f32))
    assert y32.shape == (batch, out_channel * EXPANSION, spatial, spatial)
    err32 = float(jnp.max(jnp.abs(y32 - y_ref)))
    assert err32 < 1e-3, f"f32 max abs err {err32}"

    # bf16 MXU-operand path (f32 accumulate + f32 epilogue): looser tolerance.
    params_bf16 = fold_params(raw, jnp.bfloat16)
    y_bf = jax.block_until_ready(
        bottleneck_forward(x.astype(jnp.bfloat16), params_bf16))
    err_bf = float(jnp.max(jnp.abs(y_bf.astype(jnp.float32) - y_ref)))
    scale = float(jnp.max(jnp.abs(y_ref)))
    assert err_bf < 0.05 * scale + 0.05, f"bf16 max abs err {err_bf} (scale {scale})"

    print("KERNEL_OK")
</pallas_src>

<mosaic_0001>
module attributes {stable_mosaic.version = 11 : i64} {
  func.func @_fused_bottleneck_kernel(%arg0: i32, %arg1: i32, %arg2: memref<2x16x16x128xf32, #tpu.memory_space<any>>, %arg3: memref<128x32xf32, #tpu.memory_space<vmem>>, %arg4: memref<1x32xf32, #tpu.memory_space<vmem>>, %arg5: memref<9x32x32xf32, #tpu.memory_space<vmem>>, %arg6: memref<1x32xf32, #tpu.memory_space<vmem>>, %arg7: memref<32x128xf32, #tpu.memory_space<vmem>>, %arg8: memref<1x128xf32, #tpu.memory_space<vmem>>, %arg9: memref<128x128xf32, #tpu.memory_space<vmem>>, %arg10: memref<2x10x16x128xf32, #tpu.memory_space<vmem>>, %arg11: memref<160x32xf32, #tpu.memory_space<vmem>>, %arg12: memref<160x32xf32, #tpu.memory_space<vmem>>, %arg13: memref<160x32xf32, #tpu.memory_space<vmem>>, %arg14: memref<128x32xf32, #tpu.memory_space<vmem>>, %arg15: memref<2x3x!tpu.dma_semaphore, #tpu.memory_space<semaphore_mem>>) attributes {dimension_semantics = [#tpu.dimension_semantics<parallel>, #tpu.dimension_semantics<arbitrary>], iteration_bounds = array<i64: 2, 2>, scalar_prefetch = 0 : i64, scratch_operands = 6 : i64, tpu.core_type = #tpu.core_type<tc>, window_params = [{}, {pipeline_mode = #tpu.pipeline_mode<synchronous>, transform_indices = @transform_1, window_bounds = array<i64: 128, 32>}, {pipeline_mode = #tpu.pipeline_mode<synchronous>, transform_indices = @transform_2, window_bounds = array<i64: 1, 32>}, {pipeline_mode = #tpu.pipeline_mode<synchronous>, transform_indices = @transform_3, window_bounds = array<i64: 9, 32, 32>}, {pipeline_mode = #tpu.pipeline_mode<synchronous>, transform_indices = @transform_4, window_bounds = array<i64: 1, 32>}, {pipeline_mode = #tpu.pipeline_mode<synchronous>, transform_indices = @transform_5, window_bounds = array<i64: 32, 128>}, {pipeline_mode = #tpu.pipeline_mode<synchronous>, transform_indices = @transform_6, window_bounds = array<i64: 1, 128>}, {transform_indices = @transform_7, window_bounds = array<i64: 128, 128>}]} {
    %c2_i32 = arith.constant 2 : i32
    %0 = arith.remsi %arg1, %c2_i32 : i32
    %c0_i32 = arith.constant 0 : i32
    %1 = arith.cmpi eq, %arg1, %c0_i32 : i32
    %2 = arith.extui %1 : i1 to i32
    %c0_i32_0 = arith.constant 0 : i32
    %3 = arith.cmpi ne, %2, %c0_i32_0 : i32
    scf.if %3 {
      %c-1_i32 = arith.constant -1 : i32
      %c0_i32_141 = arith.constant 0 : i32
      %171 = arith.maxsi %c-1_i32, %c0_i32_141 : i32
      %c8_i32_142 = arith.constant 8 : i32
      %c15_i32_143 = arith.constant 15 : i32
      %172 = arith.minsi %c8_i32_142, %c15_i32_143 : i32
      %c0_i32_144 = arith.constant 0 : i32
      %c0_i32_145 = arith.constant 0 : i32
      %c0_i32_146 = arith.constant 0 : i32
      %c0_i32_147 = arith.constant 0 : i32
      %c0_i32_148 = arith.constant 0 : i32
      %c0_i32_149 = arith.constant 0 : i32
      %173 = tpu.memref_slice %arg2[%arg0, %c0_i32_147, %c0_i32_148, %c0_i32_149] : memref<2x16x16x128xf32, #tpu.memory_space<any>> -> memref<1x8x16x128xf32, #tpu.memory_space<any>>
      %174 = tpu.memref_squeeze %173 : memref<1x8x16x128xf32, #tpu.memory_space<any>> -> memref<8x16x128xf32, #tpu.memory_space<any>>
      %c1_i32_150 = arith.constant 1 : i32
      %c0_i32_151 = arith.constant 0 : i32
      %c0_i32_152 = arith.constant 0 : i32
      %175 = tpu.memref_slice %arg10[%c0_i32_144, %c1_i32_150, %c0_i32_151, %c0_i32_152] : memref<2x10x16x128xf32, #tpu.memory_space<vmem>> -> memref<1x8x16x128xf32, #tpu.memory_space<vmem>>
      %176 = tpu.memref_squeeze %175 : memref<1x8x16x128xf32, #tpu.memory_space<vmem>> -> memref<8x16x128xf32, #tpu.memory_space<vmem>>
      %177 = tpu.memref_slice %arg15[%c0_i32_145, %c0_i32_146] : memref<2x3x!tpu.dma_semaphore, #tpu.memory_space<semaphore_mem>> -> memref<1x1x!tpu.dma_semaphore, #tpu.memory_space<semaphore_mem>>
      %178 = tpu.memref_squeeze %177 : memref<1x1x!tpu.dma_semaphore, #tpu.memory_space<semaphore_mem>> -> memref<!tpu.dma_semaphore, #tpu.memory_space<semaphore_mem>>
      tpu.enqueue_dma source(%174 : memref<8x16x128xf32, #tpu.memory_space<any>>) target(%176 : memref<8x16x128xf32, #tpu.memory_space<vmem>>) target_semaphore(%178 : memref<!tpu.dma_semaphore, #tpu.memory_space<semaphore_mem>>)
      %c0_i32_153 = arith.constant 0 : i32
      %c0_i32_154 = arith.constant 0 : i32
      %c1_i32_155 = arith.constant 1 : i32
      %c0_i32_156 = arith.constant 0 : i32
      %c0_i32_157 = arith.constant 0 : i32
      %179 = tpu.memref_slice %arg2[%arg0, %171, %c0_i32_156, %c0_i32_157] : memref<2x16x16x128xf32, #tpu.memory_space<any>> -> memref<1x1x16x128xf32, #tpu.memory_space<any>>
      %180 = tpu.memref_squeeze %179 : memref<1x1x16x128xf32, #tpu.memory_space<any>> -> memref<1x16x128xf32, #tpu.memory_space<any>>
      %c0_i32_158 = arith.constant 0 : i32
      %c0_i32_159 = arith.constant 0 : i32
      %c0_i32_160 = arith.constant 0 : i32
      %181 = tpu.memref_slice %arg10[%c0_i32_153, %c0_i32_158, %c0_i32_159, %c0_i32_160] : memref<2x10x16x128xf32, #tpu.memory_space<vmem>> -> memref<1x1x16x128xf32, #tpu.memory_space<vmem>>
      %182 = tpu.memref_squeeze %181 : memref<1x1x16x128xf32, #tpu.memory_space<vmem>> -> memref<1x16x128xf32, #tpu.memory_space<vmem>>
      %183 = tpu.memref_slice %arg15[%c0_i32_154, %c1_i32_155] : memref<2x3x!tpu.dma_semaphore, #tpu.memory_space<semaphore_mem>> -> memref<1x1x!tpu.dma_semaphore, #tpu.memory_space<semaphore_mem>>
      %184 = tpu.memref_squeeze %183 : memref<1x1x!tpu.dma_semaphore, #tpu.memory_space<semaphore_mem>> -> memref<!tpu.dma_semaphore, #tpu.memory_space<semaphore_mem>>
      tpu.enqueue_dma source(%180 : memref<1x16x128xf32, #tpu.memory_space<any>>) target(%182 : memref<1x16x128xf32, #tpu.memory_space<vmem>>) target_semaphore(%184 : memref<!tpu.dma_semaphore, #tpu.memory_space<semaphore_mem>>)
      %c0_i32_161 = arith.constant 0 : i32
      %c0_i32_162 = arith.constant 0 : i32
      %c2_i32_163 = arith.constant 2 : i32
      %c0_i32_164 = arith.constant 0 : i32
      %c0_i32_165 = arith.constant 0 : i32
      %185 = tpu.memref_slice %arg2[%arg0, %172, %c0_i32_164, %c0_i32_165] : memref<2x16x16x128xf32, #tpu.memory_space<any>> -> memref<1x1x16x128xf32, #tpu.memory_space<any>>
      %186 = tpu.memref_squeeze %185 : memref<1x1x16x128xf32, #tpu.memory_space<any>> -> memref<1x16x128xf32, #tpu.memory_space<any>>
      %c9_i32_166 = arith.constant 9 : i32
      %c0_i32_167 = arith.constant 0 : i32
      %c0_i32_168 = arith.constant 0 : i32
      %187 = tpu.memref_slice %arg10[%c0_i32_161, %c9_i32_166, %c0_i32_167, %c0_i32_168] : memref<2x10x16x128xf32, #tpu.memory_space<vmem>> -> memref<1x1x16x128xf32, #tpu.memory_space<vmem>>
      %188 = tpu.memref_squeeze %187 : memref<1x1x16x128xf32, #tpu.memory_space<vmem>> -> memref<1x16x128xf32, #tpu.memory_space<vmem>>
      %189 = tpu.memref_slice %arg15[%c0_i32_162, %c2_i32_163] : memref<2x3x!tpu.dma_semaphore, #tpu.memory_space<semaphore_mem>> -> memref<1x1x!tpu.dma_semaphore, #tpu.memory_space<semaphore_mem>>
      %190 = tpu.memref_squeeze %189 : memref<1x1x!tpu.dma_semaphore, #tpu.memory_space<semaphore_mem>> -> memref<!tpu.dma_semaphore, #tpu.memory_space<semaphore_mem>>
      tpu.enqueue_dma source(%186 : memref<1x16x128xf32, #tpu.memory_space<any>>) target(%188 : memref<1x16x128xf32, #tpu.memory_space<vmem>>) target_semaphore(%190 : memref<!tpu.dma_semaphore, #tpu.memory_space<semaphore_mem>>)
    } else {
    }
    %c1_i32 = arith.constant 1 : i32
    %4 = arith.addi %arg1, %c1_i32 : i32
    %c2_i32_1 = arith.constant 2 : i32
    %5 = arith.cmpi slt, %4, %c2_i32_1 : i32
    %6 = arith.extui %5 : i1 to i32
    %c0_i32_2 = arith.constant 0 : i32
    %7 = arith.cmpi ne, %6, %c0_i32_2 : i32
    scf.if %7 {
      %c1_i32_141 = arith.constant 1 : i32
      %171 = arith.addi %arg1, %c1_i32_141 : i32
      %c1_i32_142 = arith.constant 1 : i32
      %172 = arith.addi %arg1, %c1_i32_142 : i32
      %c2_i32_143 = arith.constant 2 : i32
      %173 = arith.remsi %172, %c2_i32_143 : i32
      %c8_i32_144 = arith.constant 8 : i32
      %174 = arith.muli %171, %c8_i32_144 : i32
      %c1_i32_145 = arith.constant 1 : i32
      %175 = arith.subi %174, %c1_i32_145 : i32
      %c0_i32_146 = arith.constant 0 : i32
      %176 = arith.maxsi %175, %c0_i32_146 : i32
      %c8_i32_147 = arith.constant 8 : i32
      %177 = arith.addi %174, %c8_i32_147 : i32
      %c15_i32_148 = arith.constant 15 : i32
      %178 = arith.minsi %177, %c15_i32_148 : i32
      %c0_i32_149 = arith.constant 0 : i32
      %c0_i32_150 = arith.constant 0 : i32
      %c0_i32_151 = arith.constant 0 : i32
      %179 = tpu.memref_slice %arg2[%arg0, %174, %c0_i32_150, %c0_i32_151] : memref<2x16x16x128xf32, #tpu.memory_space<any>> -> memref<1x8x16x128xf32, #tpu.memory_space<any>>
      %180 = tpu.memref_squeeze %179 : memref<1x8x16x128xf32, #tpu.memory_space<any>> -> memref<8x16x128xf32, #tpu.memory_space<any>>
      %c1_i32_152 = arith.constant 1 : i32
      %c0_i32_153 = arith.constant 0 : i32
      %c0_i32_154 = arith.constant 0 : i32
      %181 = tpu.memref_slice %arg10[%173, %c1_i32_152, %c0_i32_153, %c0_i32_154] : memref<2x10x16x128xf32, #tpu.memory_space<vmem>> -> memref<1x8x16x128xf32, #tpu.memory_space<vmem>>
      %182 = tpu.memref_squeeze %181 : memref<1x8x16x128xf32, #tpu.memory_space<vmem>> -> memref<8x16x128xf32, #tpu.memory_space<vmem>>
      %183 = tpu.memref_slice %arg15[%173, %c0_i32_149] : memref<2x3x!tpu.dma_semaphore, #tpu.memory_space<semaphore_mem>> -> memref<1x1x!tpu.dma_semaphore, #tpu.memory_space<semaphore_mem>>
      %184 = tpu.memref_squeeze %183 : memref<1x1x!tpu.dma_semaphore, #tpu.memory_space<semaphore_mem>> -> memref<!tpu.dma_semaphore, #tpu.memory_space<semaphore_mem>>
      tpu.enqueue_dma source(%180 : memref<8x16x128xf32, #tpu.memory_space<any>>) target(%182 : memref<8x16x128xf32, #tpu.memory_space<vmem>>) target_semaphore(%184 : memref<!tpu.dma_semaphore, #tpu.memory_space<semaphore_mem>>)
      %c1_i32_155 = arith.constant 1 : i32
      %c0_i32_156 = arith.constant 0 : i32
      %c0_i32_157 = arith.constant 0 : i32
      %185 = tpu.memref_slice %arg2[%arg0, %176, %c0_i32_156, %c0_i32_157] : memref<2x16x16x128xf32, #tpu.memory_space<any>> -> memref<1x1x16x128xf32, #tpu.memory_space<any>>
      %186 = tpu.memref_squeeze %185 : memref<1x1x16x128xf32, #tpu.memory_space<any>> -> memref<1x16x128xf32, #tpu.memory_space<any>>
      %c0_i32_158 = arith.constant 0 : i32
      %c0_i32_159 = arith.constant 0 : i32
      %c0_i32_160 = arith.constant 0 : i32
      %187 = tpu.memref_slice %arg10[%173, %c0_i32_158, %c0_i32_159, %c0_i32_160] : memref<2x10x16x128xf32, #tpu.memory_space<vmem>> -> memref<1x1x16x128xf32, #tpu.memory_space<vmem>>
      %188 = tpu.memref_squeeze %187 : memref<1x1x16x128xf32, #tpu.memory_space<vmem>> -> memref<1x16x128xf32, #tpu.memory_space<vmem>>
      %189 = tpu.memref_slice %arg15[%173, %c1_i32_155] : memref<2x3x!tpu.dma_semaphore, #tpu.memory_space<semaphore_mem>> -> memref<1x1x!tpu.dma_semaphore, #tpu.memory_space<semaphore_mem>>
      %190 = tpu.memref_squeeze %189 : memref<1x1x!tpu.dma_semaphore, #tpu.memory_space<semaphore_mem>> -> memref<!tpu.dma_semaphore, #tpu.memory_space<semaphore_mem>>
      tpu.enqueue_dma source(%186 : memref<1x16x128xf32, #tpu.memory_space<any>>) target(%188 : memref<1x16x128xf32, #tpu.memory_space<vmem>>) target_semaphore(%190 : memref<!tpu.dma_semaphore, #tpu.memory_space<semaphore_mem>>)
      %c2_i32_161 = arith.constant 2 : i32
      %c0_i32_162 = arith.constant 0 : i32
      %c0_i32_163 = arith.constant 0 : i32
      %191 = tpu.memref_slice %arg2[%arg0, %178, %c0_i32_162, %c0_i32_163] : memref<2x16x16x128xf32, #tpu.memory_space<any>> -> memref<1x1x16x128xf32, #tpu.memory_space<any>>
      %192 = tpu.memref_squeeze %191 : memref<1x1x16x128xf32, #tpu.memory_space<any>> -> memref<1x16x128xf32, #tpu.memory_space<any>>
      %c9_i32_164 = arith.constant 9 : i32
      %c0_i32_165 = arith.constant 0 : i32
      %c0_i32_166 = arith.constant 0 : i32
      %193 = tpu.memref_slice %arg10[%173, %c9_i32_164, %c0_i32_165, %c0_i32_166] : memref<2x10x16x128xf32, #tpu.memory_space<vmem>> -> memref<1x1x16x128xf32, #tpu.memory_space<vmem>>
      %194 = tpu.memref_squeeze %193 : memref<1x1x16x128xf32, #tpu.memory_space<vmem>> -> memref<1x16x128xf32, #tpu.memory_space<vmem>>
      %195 = tpu.memref_slice %arg15[%173, %c2_i32_161] : memref<2x3x!tpu.dma_semaphore, #tpu.memory_space<semaphore_mem>> -> memref<1x1x!tpu.dma_semaphore, #tpu.memory_space<semaphore_mem>>
      %196 = tpu.memref_squeeze %195 : memref<1x1x!tpu.dma_semaphore, #tpu.memory_space<semaphore_mem>> -> memref<!tpu.dma_semaphore, #tpu.memory_space<semaphore_mem>>
      tpu.enqueue_dma source(%192 : memref<1x16x128xf32, #tpu.memory_space<any>>) target(%194 : memref<1x16x128xf32, #tpu.memory_space<vmem>>) target_semaphore(%196 : memref<!tpu.dma_semaphore, #tpu.memory_space<semaphore_mem>>)
    } else {
    }
    %c8_i32 = arith.constant 8 : i32
    %8 = arith.muli %arg1, %c8_i32 : i32
    %c1_i32_3 = arith.constant 1 : i32
    %9 = arith.subi %8, %c1_i32_3 : i32
    %c0_i32_4 = arith.constant 0 : i32
    %10 = arith.maxsi %9, %c0_i32_4 : i32
    %c8_i32_5 = arith.constant 8 : i32
    %11 = arith.addi %8, %c8_i32_5 : i32
    %c15_i32 = arith.constant 15 : i32
    %12 = arith.minsi %11, %c15_i32 : i32
    %c0_i32_6 = arith.constant 0 : i32
    %c0_i32_7 = arith.constant 0 : i32
    %c0_i32_8 = arith.constant 0 : i32
    %13 = tpu.memref_slice %arg2[%arg0, %8, %c0_i32_7, %c0_i32_8] : memref<2x16x16x128xf32, #tpu.memory_space<any>> -> memref<1x8x16x128xf32, #tpu.memory_space<any>>
    %14 = tpu.memref_squeeze %13 : memref<1x8x16x128xf32, #tpu.memory_space<any>> -> memref<8x16x128xf32, #tpu.memory_space<any>>
    %c1_i32_9 = arith.constant 1 : i32
    %c0_i32_10 = arith.constant 0 : i32
    %c0_i32_11 = arith.constant 0 : i32
    %15 = tpu.memref_slice %arg10[%0, %c1_i32_9, %c0_i32_10, %c0_i32_11] : memref<2x10x16x128xf32, #tpu.memory_space<vmem>> -> memref<1x8x16x128xf32, #tpu.memory_space<vmem>>
    %16 = tpu.memref_squeeze %15 : memref<1x8x16x128xf32, #tpu.memory_space<vmem>> -> memref<8x16x128xf32, #tpu.memory_space<vmem>>
    %17 = tpu.memref_slice %arg15[%0, %c0_i32_6] : memref<2x3x!tpu.dma_semaphore, #tpu.memory_space<semaphore_mem>> -> memref<1x1x!tpu.dma_semaphore, #tpu.memory_space<semaphore_mem>>
    %18 = tpu.memref_squeeze %17 : memref<1x1x!tpu.dma_semaphore, #tpu.memory_space<semaphore_mem>> -> memref<!tpu.dma_semaphore, #tpu.memory_space<semaphore_mem>>
    tpu.wait_dma2 semaphore(%18 : memref<!tpu.dma_semaphore, #tpu.memory_space<semaphore_mem>>) src(%14 : memref<8x16x128xf32, #tpu.memory_space<any>>) dst(%16 : memref<8x16x128xf32, #tpu.memory_space<vmem>>)
    %c1_i32_12 = arith.constant 1 : i32
    %c0_i32_13 = arith.constant 0 : i32
    %c0_i32_14 = arith.constant 0 : i32
    %19 = tpu.memref_slice %arg2[%arg0, %10, %c0_i32_13, %c0_i32_14] : memref<2x16x16x128xf32, #tpu.memory_space<any>> -> memref<1x1x16x128xf32, #tpu.memory_space<any>>
    %20 = tpu.memref_squeeze %19 : memref<1x1x16x128xf32, #tpu.memory_space<any>> -> memref<1x16x128xf32, #tpu.memory_space<any>>
    %c0_i32_15 = arith.constant 0 : i32
    %c0_i32_16 = arith.constant 0 : i32
    %c0_i32_17 = arith.constant 0 : i32
    %21 = tpu.memref_slice %arg10[%0, %c0_i32_15, %c0_i32_16, %c0_i32_17] : memref<2x10x16x128xf32, #tpu.memory_space<vmem>> -> memref<1x1x16x128xf32, #tpu.memory_space<vmem>>
    %22 = tpu.memref_squeeze %21 : memref<1x1x16x128xf32, #tpu.memory_space<vmem>> -> memref<1x16x128xf32, #tpu.memory_space<vmem>>
    %23 = tpu.memref_slice %arg15[%0, %c1_i32_12] : memref<2x3x!tpu.dma_semaphore, #tpu.memory_space<semaphore_mem>> -> memref<1x1x!tpu.dma_semaphore, #tpu.memory_space<semaphore_mem>>
    %24 = tpu.memref_squeeze %23 : memref<1x1x!tpu.dma_semaphore, #tpu.memory_space<semaphore_mem>> -> memref<!tpu.dma_semaphore, #tpu.memory_space<semaphore_mem>>
    tpu.wait_dma2 semaphore(%24 : memref<!tpu.dma_semaphore, #tpu.memory_space<semaphore_mem>>) src(%20 : memref<1x16x128xf32, #tpu.memory_space<any>>) dst(%22 : memref<1x16x128xf32, #tpu.memory_space<vmem>>)
    %c2_i32_18 = arith.constant 2 : i32
    %c0_i32_19 = arith.constant 0 : i32
    %c0_i32_20 = arith.constant 0 : i32
    %25 = tpu.memref_slice %arg2[%arg0, %12, %c0_i32_19, %c0_i32_20] : memref<2x16x16x128xf32, #tpu.memory_space<any>> -> memref<1x1x16x128xf32, #tpu.memory_space<any>>
    %26 = tpu.memref_squeeze %25 : memref<1x1x16x128xf32, #tpu.memory_space<any>> -> memref<1x16x128xf32, #tpu.memory_space<any>>
    %c9_i32 = arith.constant 9 : i32
    %c0_i32_21 = arith.constant 0 : i32
    %c0_i32_22 = arith.constant 0 : i32
    %27 = tpu.memref_slice %arg10[%0, %c9_i32, %c0_i32_21, %c0_i32_22] : memref<2x10x16x128xf32, #tpu.memory_space<vmem>> -> memref<1x1x16x128xf32, #tpu.memory_space<vmem>>
    %28 = tpu.memref_squeeze %27 : memref<1x1x16x128xf32, #tpu.memory_space<vmem>> -> memref<1x16x128xf32, #tpu.memory_space<vmem>>
    %29 = tpu.memref_slice %arg15[%0, %c2_i32_18] : memref<2x3x!tpu.dma_semaphore, #tpu.memory_space<semaphore_mem>> -> memref<1x1x!tpu.dma_semaphore, #tpu.memory_space<semaphore_mem>>
    %30 = tpu.memref_squeeze %29 : memref<1x1x!tpu.dma_semaphore, #tpu.memory_space<semaphore_mem>> -> memref<!tpu.dma_semaphore, #tpu.memory_space<semaphore_mem>>
    tpu.wait_dma2 semaphore(%30 : memref<!tpu.dma_semaphore, #tpu.memory_space<semaphore_mem>>) src(%26 : memref<1x16x128xf32, #tpu.memory_space<any>>) dst(%28 : memref<1x16x128xf32, #tpu.memory_space<vmem>>)
    %31 = arith.index_cast %0 : i32 to index
    %c0 = arith.constant 0 : index
    %c0_23 = arith.constant 0 : index
    %c0_24 = arith.constant 0 : index
    %32 = vector.load %arg10[%31, %c0, %c0_23, %c0_24] : memref<2x10x16x128xf32, #tpu.memory_space<vmem>>, vector<1x10x16x128xf32>
    %33 = vector.shape_cast %32 : vector<1x10x16x128xf32> to vector<10x16x128xf32>
    %34 = vector.shape_cast %33 : vector<10x16x128xf32> to vector<160x128xf32>
    %c0_25 = arith.constant 0 : index
    %c0_26 = arith.constant 0 : index
    %35 = vector.load %arg3[%c0_25, %c0_26] : memref<128x32xf32, #tpu.memory_space<vmem>>, vector<128x32xf32>
    %cst = arith.constant dense<0.000000e+00> : vector<160x32xf32>
    %36 = tpu.matmul %34, %35, %cst {dimension_numbers = #tpu.dot_dimension_numbers<[1], [0], [0], [1], [0, 0, 1, 1], [], []>} : vector<160x128xf32>, vector<128x32xf32>, vector<160x32xf32> -> vector<160x32xf32>
    %c0_27 = arith.constant 0 : index
    %c0_28 = arith.constant 0 : index
    %37 = vector.load %arg4[%c0_27, %c0_28] : memref<1x32xf32, #tpu.memory_space<vmem>>, vector<1x32xf32>
    %38 = vector.broadcast %37 : vector<1x32xf32> to vector<160x32xf32>
    %39 = arith.addf %36, %38 : vector<160x32xf32>
    %cst_29 = arith.constant 0.000000e+00 : f32
    %40 = vector.broadcast %cst_29 : f32 to vector<160x32xf32>
    %41 = arith.maximumf %39, %40 : vector<160x32xf32>
    %42 = tpu.iota {dimensions = array<i32: 0>} : vector<160x1xi32>
    %c16_i32 = arith.constant 16 : i32
    %43 = vector.broadcast %c16_i32 : i32 to vector<160x1xi32>
    %44 = arith.cmpi slt, %42, %43 : vector<160x1xi32>
    %c0_i32_30 = arith.constant 0 : i32
    %45 = arith.cmpi eq, %arg1, %c0_i32_30 : i32
    %46 = vector.broadcast %45 : i1 to vector<160x1xi1>
    %47 = arith.andi %44, %46 : vector<160x1xi1>
    %c144_i32 = arith.constant 144 : i32
    %48 = vector.broadcast %c144_i32 : i32 to vector<160x1xi32>
    %49 = arith.cmpi sge, %42, %48 : vector<160x1xi32>
    %c1_i32_31 = arith.constant 1 : i32
    %50 = arith.cmpi eq, %arg1, %c1_i32_31 : i32
    %51 = vector.broadcast %50 : i1 to vector<160x1xi1>
    %52 = arith.andi %49, %51 : vector<160x1xi1>
    %53 = arith.ori %47, %52 : vector<160x1xi1>
    %cst_32 = arith.constant 0.000000e+00 : f32
    %54 = vector.shape_cast %53 : vector<160x1xi1> to vector<160x1xi1>
    %55 = vector.broadcast %54 : vector<160x1xi1> to vector<160x32xi1>
    %56 = vector.broadcast %cst_32 : f32 to vector<160x32xf32>
    %57 = arith.select %55, %56, %41 : vector<160x32xi1>, vector<160x32xf32>
    %c16_i32_33 = arith.constant 16 : i32
    %c0_i32_34 = arith.constant 0 : i32
    %58 = arith.cmpi eq, %c16_i32_33, %c0_i32_34 : i32
    %c1_i32_35 = arith.constant 1 : i32
    %59 = arith.select %58, %c1_i32_35, %c16_i32_33 : i32
    %60 = vector.broadcast %59 : i32 to vector<160x1xi32>
    %61 = arith.remsi %42, %60 : vector<160x1xi32>
    %c0_i32_36 = arith.constant 0 : i32
    %62 = vector.broadcast %c0_i32_36 : i32 to vector<160x1xi32>
    %63 = arith.cmpi ne, %61, %62 : vector<160x1xi32>
    %c0_i32_37 = arith.constant 0 : i32
    %64 = vector.broadcast %c0_i32_37 : i32 to vector<160x1xi32>
    %65 = arith.cmpi slt, %61, %64 : vector<160x1xi32>
    %c0_i32_38 = arith.constant 0 : i32
    %66 = arith.cmpi slt, %59, %c0_i32_38 : i32
    %67 = vector.broadcast %66 : i1 to vector<160x1xi1>
    %68 = vector.broadcast %67 : vector<160x1xi1> to vector<160x1xi1>
    %69 = arith.xori %65, %68 : vector<160x1xi1>
    %70 = arith.andi %69, %63 : vector<160x1xi1>
    %71 = vector.broadcast %59 : i32 to vector<160x1xi32>
    %72 = arith.addi %61, %71 : vector<160x1xi32>
    %73 = arith.select %70, %72, %61 : vector<160x1xi1>, vector<160x1xi32>
    %cst_39 = arith.constant 0.000000e+00 : f32
    %74 = vector.broadcast %cst_39 : f32 to vector<1x32xf32>
    %c0_i32_40 = arith.constant 0 : i32
    %75 = vector.broadcast %c0_i32_40 : i32 to vector<160x1xi32>
    %76 = arith.cmpi eq, %73, %75 : vector<160x1xi32>
    %77 = vector.extract_strided_slice %57 {offsets = [0, 0], sizes = [159, 32], strides = [1, 1]} : vector<160x32xf32> to vector<159x32xf32>
    %78 = tpu.concatenate %74, %77 in 0 : vector<1x32xf32>, vector<159x32xf32> -> vector<160x32xf32>
    %cst_41 = arith.constant 0.000000e+00 : f32
    %79 = vector.shape_cast %76 : vector<160x1xi1> to vector<160x1xi1>
    %80 = vector.broadcast %79 : vector<160x1xi1> to vector<160x32xi1>
    %81 = vector.broadcast %cst_41 : f32 to vector<160x32xf32>
    %82 = arith.select %80, %81, %78 : vector<160x32xi1>, vector<160x32xf32>
    %c15_i32_42 = arith.constant 15 : i32
    %83 = vector.broadcast %c15_i32_42 : i32 to vector<160x1xi32>
    %84 = arith.cmpi eq, %73, %83 : vector<160x1xi32>
    %85 = vector.extract_strided_slice %57 {offsets = [1, 0], sizes = [159, 32], strides = [1, 1]} : vector<160x32xf32> to vector<159x32xf32>
    %86 = tpu.concatenate %85, %74 in 0 : vector<159x32xf32>, vector<1x32xf32> -> vector<160x32xf32>
    %cst_43 = arith.constant 0.000000e+00 : f32
    %87 = vector.shape_cast %84 : vector<160x1xi1> to vector<160x1xi1>
    %88 = vector.broadcast %87 : vector<160x1xi1> to vector<160x32xi1>
    %89 = vector.broadcast %cst_43 : f32 to vector<160x32xf32>
    %90 = arith.select %88, %89, %86 : vector<160x32xi1>, vector<160x32xf32>
    %c0_44 = arith.constant 0 : index
    %c0_45 = arith.constant 0 : index
    %91 = vector.load %arg11[%c0_44, %c0_45] : memref<160x32xf32, #tpu.memory_space<vmem>>, vector<160x32xf32>
    tpu.vector_store %arg11[%c0_44, %c0_45], %57 {strides = array<i32>} : memref<160x32xf32, #tpu.memory_space<vmem>>, vector<160x32xf32>,
    %c0_46 = arith.constant 0 : index
    %c0_47 = arith.constant 0 : index
    %92 = vector.load %arg12[%c0_46, %c0_47] : memref<160x32xf32, #tpu.memory_space<vmem>>, vector<160x32xf32>
    tpu.vector_store %arg12[%c0_46, %c0_47], %82 {strides = array<i32>} : memref<160x32xf32, #tpu.memory_space<vmem>>, vector<160x32xf32>,
    %c0_48 = arith.constant 0 : index
    %c0_49 = arith.constant 0 : index
    %93 = vector.load %arg13[%c0_48, %c0_49] : memref<160x32xf32, #tpu.memory_space<vmem>>, vector<160x32xf32>
    tpu.vector_store %arg13[%c0_48, %c0_49], %90 {strides = array<i32>} : memref<160x32xf32, #tpu.memory_space<vmem>>, vector<160x32xf32>,
    %c0_50 = arith.constant 0 : index
    %c0_51 = arith.constant 0 : index
    %94 = vector.load %arg12[%c0_50, %c0_51] : memref<160x32xf32, #tpu.memory_space<vmem>>, vector<128x32xf32>
    %c0_52 = arith.constant 0 : index
    %c0_53 = arith.constant 0 : index
    %c0_54 = arith.constant 0 : index
    %95 = vector.load %arg5[%c0_52, %c0_53, %c0_54] : memref<9x32x32xf32, #tpu.memory_space<vmem>>, vector<1x32x32xf32>
    %96 = vector.shape_cast %95 : vector<1x32x32xf32> to vector<32x32xf32>
    %cst_55 = arith.constant dense<0.000000e+00> : vector<128x32xf32>
    %97 = tpu.matmul %94, %96, %cst_55 {dimension_numbers = #tpu.dot_dimension_numbers<[1], [0], [0], [1], [0, 0, 1, 1], [], []>} : vector<128x32xf32>, vector<32x32xf32>, vector<128x32xf32> -> vector<128x32xf32>
    %c0_56 = arith.constant 0 : index
    %c0_57 = arith.constant 0 : index
    %98 = vector.load %arg14[%c0_56, %c0_57] : memref<128x32xf32, #tpu.memory_space<vmem>>, vector<128x32xf32>
    tpu.vector_store %arg14[%c0_56, %c0_57], %97 {strides = array<i32>} : memref<128x32xf32, #tpu.memory_space<vmem>>, vector<128x32xf32>,
    %c0_58 = arith.constant 0 : index
    %c0_59 = arith.constant 0 : index
    %99 = vector.load %arg11[%c0_58, %c0_59] : memref<160x32xf32, #tpu.memory_space<vmem>>, vector<128x32xf32>
    %c1 = arith.constant 1 : index
    %c0_60 = arith.constant 0 : index
    %c0_61 = arith.constant 0 : index
    %100 = vector.load %arg5[%c1, %c0_60, %c0_61] : memref<9x32x32xf32, #tpu.memory_space<vmem>>, vector<1x32x32xf32>
    %101 = vector.shape_cast %100 : vector<1x32x32xf32> to vector<32x32xf32>
    %cst_62 = arith.constant dense<0.000000e+00> : vector<128x32xf32>
    %102 = tpu.matmul %99, %101, %cst_62 {dimension_numbers = #tpu.dot_dimension_numbers<[1], [0], [0], [1], [0, 0, 1, 1], [], []>} : vector<128x32xf32>, vector<32x32xf32>, vector<128x32xf32> -> vector<128x32xf32>
    %c0_63 = arith.constant 0 : index
    %c0_64 = arith.constant 0 : index
    %103 = vector.load %arg14[%c0_63, %c0_64] : memref<128x32xf32, #tpu.memory_space<vmem>>, vector<128x32xf32>
    %104 = arith.addf %103, %102 : vector<128x32xf32>
    %c0_65 = arith.constant 0 : index
    %c0_66 = arith.constant 0 : index
    %105 = vector.load %arg14[%c0_65, %c0_66] : memref<128x32xf32, #tpu.memory_space<vmem>>, vector<128x32xf32>
    tpu.vector_store %arg14[%c0_65, %c0_66], %104 {strides = array<i32>} : memref<128x32xf32, #tpu.memory_space<vmem>>, vector<128x32xf32>,
    %c0_67 = arith.constant 0 : index
    %c0_68 = arith.constant 0 : index
    %106 = vector.load %arg13[%c0_67, %c0_68] : memref<160x32xf32, #tpu.memory_space<vmem>>, vector<128x32xf32>
    %c2 = arith.constant 2 : index
    %c0_69 = arith.constant 0 : index
    %c0_70 = arith.constant 0 : index
    %107 = vector.load %arg5[%c2, %c0_69, %c0_70] : memref<9x32x32xf32, #tpu.memory_space<vmem>>, vector<1x32x32xf32>
    %108 = vector.shape_cast %107 : vector<1x32x32xf32> to vector<32x32xf32>
    %cst_71 = arith.constant dense<0.000000e+00> : vector<128x32xf32>
    %109 = tpu.matmul %106, %108, %cst_71 {dimension_numbers = #tpu.dot_dimension_numbers<[1], [0], [0], [1], [0, 0, 1, 1], [], []>} : vector<128x32xf32>, vector<32x32xf32>, vector<128x32xf32> -> vector<128x32xf32>
    %c0_72 = arith.constant 0 : index
    %c0_73 = arith.constant 0 : index
    %110 = vector.load %arg14[%c0_72, %c0_73] : memref<128x32xf32, #tpu.memory_space<vmem>>, vector<128x32xf32>
    %111 = arith.addf %110, %109 : vector<128x32xf32>
    %c0_74 = arith.constant 0 : index
    %c0_75 = arith.constant 0 : index
    %112 = vector.load %arg14[%c0_74, %c0_75] : memref<128x32xf32, #tpu.memory_space<vmem>>, vector<128x32xf32>
    tpu.vector_store %arg14[%c0_74, %c0_75], %111 {strides = array<i32>} : memref<128x32xf32, #tpu.memory_space<vmem>>, vector<128x32xf32>,
    %c16 = arith.constant 16 : index
    %c0_76 = arith.constant 0 : index
    %113 = vector.load %arg12[%c16, %c0_76] : memref<160x32xf32, #tpu.memory_space<vmem>>, vector<128x32xf32>
    %c3 = arith.constant 3 : index
    %c0_77 = arith.constant 0 : index
    %c0_78 = arith.constant 0 : index
    %114 = vector.load %arg5[%c3, %c0_77, %c0_78] : memref<9x32x32xf32, #tpu.memory_space<vmem>>, vector<1x32x32xf32>
    %115 = vector.shape_cast %114 : vector<1x32x32xf32> to vector<32x32xf32>
    %cst_79 = arith.constant dense<0.000000e+00> : vector<128x32xf32>
    %116 = tpu.matmul %113, %115, %cst_79 {dimension_numbers = #tpu.dot_dimension_numbers<[1], [0], [0], [1], [0, 0, 1, 1], [], []>} : vector<128x32xf32>, vector<32x32xf32>, vector<128x32xf32> -> vector<128x32xf32>
    %c0_80 = arith.constant 0 : index
    %c0_81 = arith.constant 0 : index
    %117 = vector.load %arg14[%c0_80, %c0_81] : memref<128x32xf32, #tpu.memory_space<vmem>>, vector<128x32xf32>
    %118 = arith.addf %117, %116 : vector<128x32xf32>
    %c0_82 = arith.constant 0 : index
    %c0_83 = arith.constant 0 : index
    %119 = vector.load %arg14[%c0_82, %c0_83] : memref<128x32xf32, #tpu.memory_space<vmem>>, vector<128x32xf32>
    tpu.vector_store %arg14[%c0_82, %c0_83], %118 {strides = array<i32>} : memref<128x32xf32, #tpu.memory_space<vmem>>, vector<128x32xf32>,
    %c16_84 = arith.constant 16 : index
    %c0_85 = arith.constant 0 : index
    %120 = vector.load %arg11[%c16_84, %c0_85] : memref<160x32xf32, #tpu.memory_space<vmem>>, vector<128x32xf32>
    %c4 = arith.constant 4 : index
    %c0_86 = arith.constant 0 : index
    %c0_87 = arith.constant 0 : index
    %121 = vector.load %arg5[%c4, %c0_86, %c0_87] : memref<9x32x32xf32, #tpu.memory_space<vmem>>, vector<1x32x32xf32>
    %122 = vector.shape_cast %121 : vector<1x32x32xf32> to vector<32x32xf32>
    %cst_88 = arith.constant dense<0.000000e+00> : vector<128x32xf32>
    %123 = tpu.matmul %120, %122, %cst_88 {dimension_numbers = #tpu.dot_dimension_numbers<[1], [0], [0], [1], [0, 0, 1, 1], [], []>} : vector<128x32xf32>, vector<32x32xf32>, vector<128x32xf32> -> vector<128x32xf32>
    %c0_89 = arith.constant 0 : index
    %c0_90 = arith.constant 0 : index
    %124 = vector.load %arg14[%c0_89, %c0_90] : memref<128x32xf32, #tpu.memory_space<vmem>>, vector<128x32xf32>
    %125 = arith.addf %124, %123 : vector<128x32xf32>
    %c0_91 = arith.constant 0 : index
    %c0_92 = arith.constant 0 : index
    %126 = vector.load %arg14[%c0_91, %c0_92] : memref<128x32xf32, #tpu.memory_space<vmem>>, vector<128x32xf32>
    tpu.vector_store %arg14[%c0_91, %c0_92], %125 {strides = array<i32>} : memref<128x32xf32, #tpu.memory_space<vmem>>, vector<128x32xf32>,
    %c16_93 = arith.constant 16 : index
    %c0_94 = arith.constant 0 : index
    %127 = vector.load %arg13[%c16_93, %c0_94] : memref<160x32xf32, #tpu.memory_space<vmem>>, vector<128x32xf32>
    %c5 = arith.constant 5 : index
    %c0_95 = arith.constant 0 : index
    %c0_96 = arith.constant 0 : index
    %128 = vector.load %arg5[%c5, %c0_95, %c0_96] : memref<9x32x32xf32, #tpu.memory_space<vmem>>, vector<1x32x32xf32>
    %129 = vector.shape_cast %128 : vector<1x32x32xf32> to vector<32x32xf32>
    %cst_97 = arith.constant dense<0.000000e+00> : vector<128x32xf32>
    %130 = tpu.matmul %127, %129, %cst_97 {dimension_numbers = #tpu.dot_dimension_numbers<[1], [0], [0], [1], [0, 0, 1, 1], [], []>} : vector<128x32xf32>, vector<32x32xf32>, vector<128x32xf32> -> vector<128x32xf32>
    %c0_98 = arith.constant 0 : index
    %c0_99 = arith.constant 0 : index
    %131 = vector.load %arg14[%c0_98, %c0_99] : memref<128x32xf32, #tpu.memory_space<vmem>>, vector<128x32xf32>
    %132 = arith.addf %131, %130 : vector<128x32xf32>
    %c0_100 = arith.constant 0 : index
    %c0_101 = arith.constant 0 : index
    %133 = vector.load %arg14[%c0_100, %c0_101] : memref<128x32xf32, #tpu.memory_space<vmem>>, vector<128x32xf32>
    tpu.vector_store %arg14[%c0_100, %c0_101], %132 {strides = array<i32>} : memref<128x32xf32, #tpu.memory_space<vmem>>, vector<128x32xf32>,
    %c32 = arith.constant 32 : index
    %c0_102 = arith.constant 0 : index
    %134 = vector.load %arg12[%c32, %c0_102] : memref<160x32xf32, #tpu.memory_space<vmem>>, vector<128x32xf32>
    %c6 = arith.constant 6 : index
    %c0_103 = arith.constant 0 : index
    %c0_104 = arith.constant 0 : index
    %135 = vector.load %arg5[%c6, %c0_103, %c0_104] : memref<9x32x32xf32, #tpu.memory_space<vmem>>, vector<1x32x32xf32>
    %136 = vector.shape_cast %135 : vector<1x32x32xf32> to vector<32x32xf32>
    %cst_105 = arith.constant dense<0.000000e+00> : vector<128x32xf32>
    %137 = tpu.matmul %134, %136, %cst_105 {dimension_numbers = #tpu.dot_dimension_numbers<[1], [0], [0], [1], [0, 0, 1, 1], [], []>} : vector<128x32xf32>, vector<32x32xf32>, vector<128x32xf32> -> vector<128x32xf32>
    %c0_106 = arith.constant 0 : index
    %c0_107 = arith.constant 0 : index
    %138 = vector.load %arg14[%c0_106, %c0_107] : memref<128x32xf32, #tpu.memory_space<vmem>>, vector<128x32xf32>
    %139 = arith.addf %138, %137 : vector<128x32xf32>
    %c0_108 = arith.constant 0 : index
    %c0_109 = arith.constant 0 : index
    %140 = vector.load %arg14[%c0_108, %c0_109] : memref<128x32xf32, #tpu.memory_space<vmem>>, vector<128x32xf32>
    tpu.vector_store %arg14[%c0_108, %c0_109], %139 {strides = array<i32>} : memref<128x32xf32, #tpu.memory_space<vmem>>, vector<128x32xf32>,
    %c32_110 = arith.constant 32 : index
    %c0_111 = arith.constant 0 : index
    %141 = vector.load %arg11[%c32_110, %c0_111] : memref<160x32xf32, #tpu.memory_space<vmem>>, vector<128x32xf32>
    %c7 = arith.constant 7 : index
    %c0_112 = arith.constant 0 : index
    %c0_113 = arith.constant 0 : index
    %142 = vector.load %arg5[%c7, %c0_112, %c0_113] : memref<9x32x32xf32, #tpu.memory_space<vmem>>, vector<1x32x32xf32>
    %143 = vector.shape_cast %142 : vector<1x32x32xf32> to vector<32x32xf32>
    %cst_114 = arith.constant dense<0.000000e+00> : vector<128x32xf32>
    %144 = tpu.matmul %141, %143, %cst_114 {dimension_numbers = #tpu.dot_dimension_numbers<[1], [0], [0], [1], [0, 0, 1, 1], [], []>} : vector<128x32xf32>, vector<32x32xf32>, vector<128x32xf32> -> vector<128x32xf32>
    %c0_115 = arith.constant 0 : index
    %c0_116 = arith.constant 0 : index
    %145 = vector.load %arg14[%c0_115, %c0_116] : memref<128x32xf32, #tpu.memory_space<vmem>>, vector<128x32xf32>
    %146 = arith.addf %145, %144 : vector<128x32xf32>
    %c0_117 = arith.constant 0 : index
    %c0_118 = arith.constant 0 : index
    %147 = vector.load %arg14[%c0_117, %c0_118] : memref<128x32xf32, #tpu.memory_space<vmem>>, vector<128x32xf32>
    tpu.vector_store %arg14[%c0_117, %c0_118], %146 {strides = array<i32>} : memref<128x32xf32, #tpu.memory_space<vmem>>, vector<128x32xf32>,
    %c32_119 = arith.constant 32 : index
    %c0_120 = arith.constant 0 : index
    %148 = vector.load %arg13[%c32_119, %c0_120] : memref<160x32xf32, #tpu.memory_space<vmem>>, vector<128x32xf32>
    %c8 = arith.constant 8 : index
    %c0_121 = arith.constant 0 : index
    %c0_122 = arith.constant 0 : index
    %149 = vector.load %arg5[%c8, %c0_121, %c0_122] : memref<9x32x32xf32, #tpu.memory_space<vmem>>, vector<1x32x32xf32>
    %150 = vector.shape_cast %149 : vector<1x32x32xf32> to vector<32x32xf32>
    %cst_123 = arith.constant dense<0.000000e+00> : vector<128x32xf32>
    %151 = tpu.matmul %148, %150, %cst_123 {dimension_numbers = #tpu.dot_dimension_numbers<[1], [0], [0], [1], [0, 0, 1, 1], [], []>} : vector<128x32xf32>, vector<32x32xf32>, vector<128x32xf32> -> vector<128x32xf32>
    %c0_124 = arith.constant 0 : index
    %c0_125 = arith.constant 0 : index
    %152 = vector.load %arg14[%c0_124, %c0_125] : memref<128x32xf32, #tpu.memory_space<vmem>>, vector<128x32xf32>
    %153 = arith.addf %152, %151 : vector<128x32xf32>
    %c0_126 = arith.constant 0 : index
    %c0_127 = arith.constant 0 : index
    %154 = vector.load %arg14[%c0_126, %c0_127] : memref<128x32xf32, #tpu.memory_space<vmem>>, vector<128x32xf32>
    tpu.vector_store %arg14[%c0_126, %c0_127], %153 {strides = array<i32>} : memref<128x32xf32, #tpu.memory_space<vmem>>, vector<128x32xf32>,
    %c0_128 = arith.constant 0 : index
    %c0_129 = arith.constant 0 : index
    %155 = vector.load %arg14[%c0_128, %c0_129] : memref<128x32xf32, #tpu.memory_space<vmem>>, vector<128x32xf32>
    %c0_130 = arith.constant 0 : index
    %c0_131 = arith.constant 0 : index
    %156 = vector.load %arg6[%c0_130, %c0_131] : memref<1x32xf32, #tpu.memory_space<vmem>>, vector<1x32xf32>
    %157 = vector.broadcast %156 : vector<1x32xf32> to vector<128x32xf32>
    %158 = arith.addf %155, %157 : vector<128x32xf32>
    %cst_132 = arith.constant 0.000000e+00 : f32
    %159 = vector.broadcast %cst_132 : f32 to vector<128x32xf32>
    %160 = arith.maximumf %158, %159 : vector<128x32xf32>
    %161 = vector.extract_strided_slice %34 {offsets = [16, 0], sizes = [128, 128], strides = [1, 1]} : vector<160x128xf32> to vector<128x128xf32>
    %c0_133 = arith.constant 0 : index
    %c0_134 = arith.constant 0 : index
    %162 = vector.load %arg7[%c0_133, %c0_134] : memref<32x128xf32, #tpu.memory_space<vmem>>, vector<32x128xf32>
    %cst_135 = arith.constant dense<0.000000e+00> : vector<128x128xf32>
    %163 = tpu.matmul %160, %162, %cst_135 {dimension_numbers = #tpu.dot_dimension_numbers<[1], [0], [0], [1], [0, 0, 1, 1], [], []>} : vector<128x32xf32>, vector<32x128xf32>, vector<128x128xf32> -> vector<128x128xf32>
    %c0_136 = arith.constant 0 : index
    %c0_137 = arith.constant 0 : index
    %164 = vector.load %arg8[%c0_136, %c0_137] : memref<1x128xf32, #tpu.memory_space<vmem>>, vector<1x128xf32>
    %165 = vector.broadcast %164 : vector<1x128xf32> to vector<128x128xf32>
    %166 = arith.addf %163, %165 : vector<128x128xf32>
    %167 = arith.addf %166, %161 : vector<128x128xf32>
    %cst_138 = arith.constant 0.000000e+00 : f32
    %168 = vector.broadcast %cst_138 : f32 to vector<128x128xf32>
    %169 = arith.maximumf %167, %168 : vector<128x128xf32>
    %c0_139 = arith.constant 0 : index
    %c0_140 = arith.constant 0 : index
    %170 = vector.load %arg9[%c0_139, %c0_140] : memref<128x128xf32, #tpu.memory_space<vmem>>, vector<128x128xf32>
    tpu.vector_store %arg9[%c0_139, %c0_140], %169 {strides = array<i32>} : memref<128x128xf32, #tpu.memory_space<vmem>>, vector<128x128xf32>,
    return
  }
  func.func @transform_1(%arg0: i32, %arg1: i32) -> (i32, i32) {
    %c0_i32 = arith.constant 0 : i32
    %c0_i32_0 = arith.constant 0 : i32
    %c0_i32_1 = arith.constant 0 : i32
    return %c0_i32, %c0_i32_0 : i32, i32
  }
  func.func @transform_2(%arg0: i32, %arg1: i32) -> (i32, i32) {
    %c0_i32 = arith.constant 0 : i32
    %c0_i32_0 = arith.constant 0 : i32
    %c0_i32_1 = arith.constant 0 : i32
    return %c0_i32, %c0_i32_0 : i32, i32
  }
  func.func @transform_3(%arg0: i32, %arg1: i32) -> (i32, i32, i32) {
    %c0_i32 = arith.constant 0 : i32
    %c0_i32_0 = arith.constant 0 : i32
    %c0_i32_1 = arith.constant 0 : i32
    %c0_i32_2 = arith.constant 0 : i32
    return %c0_i32, %c0_i32_0, %c0_i32_1 : i32, i32, i32
  }
  func.func @transform_4(%arg0: i32, %arg1: i32) -> (i32, i32) {
    %c0_i32 = arith.constant 0 : i32
    %c0_i32_0 = arith.constant 0 : i32
    %c0_i32_1 = arith.constant 0 : i32
    return %c0_i32, %c0_i32_0 : i32, i32
  }
  func.func @transform_5(%arg0: i32, %arg1: i32) -> (i32, i32) {
    %c0_i32 = arith.constant 0 : i32
    %c0_i32_0 = arith.constant 0 : i32
    %c0_i32_1 = arith.constant 0 : i32
    return %c0_i32, %c0_i32_0 : i32, i32
  }
  func.func @transform_6(%arg0: i32, %arg1: i32) -> (i32, i32) {
    %c0_i32 = arith.constant 0 : i32
    %c0_i32_0 = arith.constant 0 : i32
    %c0_i32_1 = arith.constant 0 : i32
    return %c0_i32, %c0_i32_0 : i32, i32
  }
  func.func @transform_7(%arg0: i32, %arg1: i32) -> (i32, i32) {
    %c2_i32 = arith.constant 2 : i32
    %0 = arith.muli %arg0, %c2_i32 : i32
    %1 = arith.addi %0, %arg1 : i32
    %c0_i32 = arith.constant 0 : i32
    %c0_i32_0 = arith.constant 0 : i32
    return %1, %c0_i32 : i32, i32
  }
}

</mosaic_0001>

<bundles_post_ra>
// kernel: bottleneck_forward.1
= control target key start
LH: loop header
LB: loop body
LE: loop exit
PB: predicated region body
PF: predicated region fallthrough
CT: control target
= control target key end

     0   :  { %s5233_s0 = inlined_call_operand.hbm [shape: f32[2,16,16,128], index: 0, kind: input, shape index: {}]   ;;  %s5234_s1 = inlined_call_operand.vmem [shape: f32[128,32], index: 1, kind: input, shape index: {}]   ;;  %s5235_s2 = inlined_call_operand.vmem [shape: f32[1,32], index: 2, kind: input, shape index: {}]   ;;  %s5236_s3 = inlined_call_operand.hbm [shape: f32[9,32,32], index: 3, kind: input, shape index: {}]   ;;  %s5237_s4 = inlined_call_operand.vmem [shape: f32[1,32], index: 4, kind: input, shape index: {}]   ;;  %s5238_s5 = inlined_call_operand.vmem [shape: f32[32,128], index: 5, kind: input, shape index: {}]   ;;  %s5239_s6 = inlined_call_operand.vmem [shape: f32[1,128], index: 6, kind: input, shape index: {}]   ;;  %s5240_s7 = inlined_call_operand.hbm [shape: f32[512,128], index: 7, kind: output, shape index: {}]  }
   0x1   :  { %5257 = sst [smem:[#allocation42_spill]] %s5236_s3 }
   0x2   :  { %5258 = sst [smem:[#allocation43_spill]] %s5240_s7 }
   0x3   :  { %12 = vsyncpa [#allocation9], 0 }
   0x4   :  { %13 = vsyncpa [#allocation10], 0 }
   0x5   :  { %15 = vsyncpa [#allocation10 + $0x1], 0  ;;  %s4032_s24 = smov 0   ;;  %s4034_s25 = smov 0  }
   0x6   :  { %s4036_s26 = smov 0   ;;  %s4038_s27 = smov 0  }
   0x7   :  { %s4040_s28 = smov 0   ;;  %s4042_s29 = smov 0  }
   0x8   :  { %s4044_s30 = smov 0   ;;  %s4046_s8 = smov 0  }
   0x9 LB: > { %5259 = sst [smem:[#allocation31_spill]] %s3954_s24  ;;  %s3353_s9 = sadd.s32 4294967295, %s3982_s8   ;;  %s3982_s8 = sphi %s4046_s8, %s21_s8   ;;  %s3978_s30 = sphi %s4044_s30, %s5317_s30   ;;  %s3974_s29 = sphi %s4042_s29, %s5316_s29   ;;  %s3970_s28 = sphi %s4040_s28, %s5315_s28   ;;  %s3966_s27 = sphi %s4038_s27, %s5314_s27   ;;  %s3962_s26 = sphi %s4036_s26, %s5313_s26   ;;  %s3958_s25 = sphi %s4034_s25, %s5312_s25   ;;  %s3954_s24 = sphi %s4032_s24, %s5311_s24  }
   0xa   : > { %5260 = sst [smem:[#allocation32_spill]] %s3958_s25  ;;  %s3354_s10 = sadd.s32 4294967294, %s3982_s8  }
   0xb   : > { %5261 = sst [smem:[#allocation33_spill]] %s3962_s26  ;;  %s30_s11 = sadd.s32 1, %s3974_s29 }
   0xc   : > { %5262 = sst [smem:[#allocation34_spill]] %s3974_s29  ;;  %s33_s12 = sadd.s32 1, %s3978_s30 }
   0xd   : > { %5263 = sst [smem:[#allocation35_spill]] %s3978_s30  ;;  %p31_p0 = scmp.ge.s32.totalorder %s30_s11, 2 }
   0xe   : > { %5264 = sst [smem:[#allocation36_spill]] %s3982_s8  ;;  %s3355_s13 = sshll.u32 %s3978_s30, 1 }
   0xf   : > { %s164_s14 = sadd.s32 %s3974_s29, %s3355_s13  ;;  %s170_s15 = sadd.s32 1, %s3962_s26 }
  0x10   : > { %s5319_s11 = smov (%p31_p0, %s30_s11), 0  ;;  %s5321_s12 = smov (!%p31_p0, %s33_s12), %s3978_s30 }
  0x11   : > { %5265 = sst [smem:[#allocation37_spill]] %s5319_s11  ;;  %p180_p1 = scmp.ne.s32.totalorder %s3962_s26, %s3958_s25 }
  0x12   : > { %p181_p2 = scmp.eq.s32.totalorder %s3353_s9, 3  ;;  %p35_p3 = scmp.ge.s32.totalorder %s5321_s12, 2 }
  0x13   : > { %p186_p4 = scmp.ne.s32.totalorder %s3958_s25, %s3954_s24  ;;  %p187_p6 = scmp.eq.s32.totalorder %s3354_s10, 3 }
  0x14   : > { %p4086_p5 = por %p181_p2, %p180_p1  ;;  %s5323_s12 = smov (%p35_p3, %s5321_s12), 0 }
  0x15   : > { %5268 = sst [smem:[#allocation39_spill]] %s5323_s12  ;;  %p4092_p7 = por %p187_p6, %p186_p4 }
  0x16   : > { %s5266_s16 = scalar_select %p4086_p5, 1, 0 }
  0x17   : > { %s5269_s17 = scalar_select %p4092_p7, 1, 0 }
  0x18   : > { %5267 = sst [smem:[#allocation38_spill]] %s5266_s16  ;;  %p3357_p8 = scmp.ge.s32.totalorder %s3982_s8, 1 }
  0x19   : > { %5270 = sst [smem:[#allocation40_spill]] %s5269_s17  ;;  %s3356_s18 = sshll.u32 %s5323_s12, 1 }
  0x1a   : > { %p194_p9 = scmp.lt.s32.totalorder %s3982_s8, 5  ;;  %s166_s19 = sadd.s32 %s3356_s18, %s5319_s11 }
  0x1b   : > { %s167_s20 = ssub.s32 %s164_s14, %s166_s19  ;;  %p4104_p12 = scmp.eq.s32.totalorder %s3353_s9, 0 }
  0x1c   : > { %p4100_p10 = pnand %p3357_p8, %p194_p9  ;;  %p168_p11 = scmp.eq.s32.totalorder %s167_s20, 0 }
  0x1d   : > { %s5273_s3 = sld [smem:[#allocation42_spill]]  ;;  %s3984_s14 = smov [#allocation8]  }
  0x1e   : > { %p3576_p13 = pneg %p4100_p10  ;;  %s213_s18 = sshll.u32 %s3984_s14, 4  ;;  %s214_s18 = int_to_ptr.vmem [resolvable:$true] %s213_s18 }
  0x1f   : > { %s4114_s12 = scalar_select %p168_p11, %s3962_s26, %s170_s15  }
  0x20   : > { %p3577_p0 = pnand %p4104_p12, %p3576_p13  ;;  %s3985_s19 = smov 128  }
  0x21   : > { %5274 = sst [smem:[#allocation41_spill]] %s4114_s12  ;;  %s3986_s9 = smov 8  }
  0x22   : > { %238 = sbr.rel (%p4100_p10) target bundleno = 1022 (0x3fe), region = 44 }
  0x23   : > { %s211_s13 = sshll.u32 %s5273_s3, 4  ;;  %s212_s13 = int_to_ptr.hbm [resolvable:$true] %s211_s13 }
  0x24   : > { %3579 = dma.hbm_to_vmem [thread:$0]  (!%p3577_p0), %s212_s13, 4608, %s214_s18, [#allocation9], %s3985_s19, %s3985_s19, %s3986_s9  }
  0x27   : > { %3939 = dma.done.wait (%p4104_p12), [#allocation9], 4608  }
  0x28   : > { %3941 = vsyncadd (%p4104_p12), [#allocation9], 4294962688  ;;  %s5243_s15 = sand.u32 1, %s3958_s25   ;;  %p267_p1 = scmp.lt.s32.totalorder %s3966_s27, 0 }
  0x29   : > { %s4128_s20 = sshll.u32 %s5243_s15, 7  ;;  %s268_s21 = ssub.s32 0, %s3966_s27 }
  0x2a   : > { %s3362_s23 = smin.u32 %s3966_s27, %s268_s21  ;;  %p5251_p2 = scmp.eq.s32.totalorder %s3966_s27, 0 }
  0x2b   : > { %s270_s10 = sand.u32 1, %s3362_s23   ;;  %s4136_s22 = sshll.u32 %s3970_s28, 8 }
  0x2c   : > { %s271_s13 = ssub.s32 0, %s270_s10  ;;  %s278_s19 = scalar_lea.hbm %s5233_s0, %s4136_s22 }
  0x2d   : > { %s5325_s13 = smov (!%p267_p1, %s271_s13), %s270_s10  ;;  %s3987_s9 = smov [#allocation2 + $0x10]  }
  0x2e   : > { %s289_s3 = sshll.u32 %s3987_s9, 4  ;;  %s287_s11 = sshll.u32 %s278_s19, 4  ;;  %s290_s3 = int_to_ptr.vmem [resolvable:$true] %s289_s3  ;;  %s288_s11 = int_to_ptr.hbm [resolvable:$true] %s287_s11 }
  0x2f   : > { %s3268_s15 = scalar_lea.hbm %s278_s19, 128  ;;  %s3710_s21 = sshra.s32 %s288_s11, 4  ;;  %s3711_s21 = int_to_ptr.hbm [resolvable:$true] %s3710_s21 }
  0x30   : > { %s3712_s23 = scalar_lea.hbm %s3711_s21, 128  ;;  %s4147_s29 = scalar_lea.hbm %s5233_s0, 512 }
  0x31   : > { %p3713_p3 = scmp.ne.s32.totalorder %s3711_s21, %s3712_s23  ;;  %p3717_p8 = scmp.lt.s32.totalorder %s3711_s21, %s5233_s0 }
  0x32   : > { %p3718_p9 = scmp.lt.s32.totalorder %s4147_s29, %s3712_s23 }
  0x33   : > { %p3714_p4 = pnand %p3713_p3, %p5251_p2 }
  0x34   : > { %p3719_p10 = por %p3718_p9, %p3717_p8 }
  0x35   : > { %p3715_p6 = pneg %p3714_p4 }
  0x37   : > { %p3720_p11 = pnand %p3719_p10, %p3715_p6 }
  0x39   : > { %3723 = shalt.err (!%p3720_p11)  }
  0x3a   : > { %3567 = dma.hbm_to_vmem [thread:$0]  (%p5251_p2), %s288_s11, 2048, %s290_s3, [#allocation7] }
  0x3b   : > { %s4159_s30 = sshll.u32 %s3268_s15, 4  ;;  %s3988_s10 = smov [#allocation2]   ;;  %s319_s30 = int_to_ptr.hbm [resolvable:$true] %s4159_s30 }
  0x3c   : > { %s303_s14 = sshll.u32 %s3988_s10, 4  ;;  %s3740_s23 = scalar_lea.hbm %s3711_s21, 16  ;;  %s304_s14 = int_to_ptr.vmem [resolvable:$true] %s303_s14 }
  0x3d   : > { %p3741_p12 = scmp.ne.s32.totalorder %s3711_s21, %s3740_s23  ;;  %p3746_p1 = scmp.lt.s32.totalorder %s4147_s29, %s3740_s23 }
  0x3f   : > { %p3742_p13 = pnand %p3741_p12, %p5251_p2  ;;  %p3747_p3 = por %p3746_p1, %p3717_p8 }
  0x41   : > { %p3743_p0 = pneg %p3742_p13 }
  0x43   : > { %p3748_p4 = pnand %p3747_p3, %p3743_p0 }
  0x45   : > { %3751 = shalt.err (!%p3748_p4)  }
  0x46   : > { %3568 = dma.hbm_to_vmem [thread:$0]  (%p5251_p2), %s288_s11, 256, %s304_s14, [#allocation7 + $0x1] }
  0x47   : > { %s3989_s3 = smov [#allocation2 + $0x90]   ;;  %s4172_s19 = sadd.s32 1, %s3966_s27 }
  0x48   : > { %s320_s15 = sshll.u32 %s3989_s3, 4  ;;  %s3766_s10 = sshra.s32 %s319_s30, 4  ;;  %s321_s15 = int_to_ptr.vmem [resolvable:$true] %s320_s15  ;;  %s3767_s10 = int_to_ptr.hbm [resolvable:$true] %s3766_s10 }
  0x49   : > { %s3768_s23 = scalar_lea.hbm %s3767_s10, 16  ;;  %p3773_p10 = scmp.lt.s32.totalorder %s3767_s10, %s5233_s0 }
  0x4a   : > { %p3769_p6 = scmp.ne.s32.totalorder %s3767_s10, %s3768_s23  ;;  %p3774_p11 = scmp.lt.s32.totalorder %s4147_s29, %s3768_s23 }
  0x4c   : > { %p3770_p9 = pnand %p3769_p6, %p5251_p2  ;;  %p3775_p12 = por %p3774_p11, %p3773_p10 }
  0x4e   : > { %p3771_p8 = pneg %p3770_p9 }
  0x50   : > { %p3776_p13 = pnand %p3775_p12, %p3771_p8 }
  0x52   : > { %3779 = shalt.err (!%p3776_p13)  }
  0x53   : > { %3569 = dma.hbm_to_vmem [thread:$0]  (%p5251_p2), %s319_s30, 256, %s321_s15, [#allocation7 + $0x2] }
  0x54   : > { %p3587_p0 = scmp.lt.s32.totalorder %s4172_s19, 2  ;;  %p329_p1 = scmp.lt.s32.totalorder %s4172_s19, 0 }
  0x55   : > { %s330_s11 = ssub.s32 0, %s4172_s19  ;;  %s3371_s14 = sshll.u32 %s3966_s27, 7 }
  0x56   : > { %s3367_s9 = smin.u32 %s330_s11, %s4172_s19  ;;  %s3271_s3 = sadd.s32 %s3371_s14, %s4136_s22 }
  0x57   : > { %s332_s10 = sand.u32 1, %s3367_s9   ;;  %s3272_s18 = scalar_lea.hbm %s5233_s0, %s3271_s3 }
  0x58   : > { %s333_s12 = ssub.s32 0, %s332_s10  ;;  %s3273_s26 = scalar_lea.hbm %s3272_s18, 128 }
  0x59   : > { %s5327_s12 = smov (!%p329_p1, %s333_s12), %s332_s10  ;;  %s358_s17 = sshll.u32 %s3273_s26, 4  ;;  %s4192_s17 = int_to_ptr.hbm [resolvable:$true] %s358_s17 }
  0x5a   : > { %s3547_s24 = sshll.u32 %s3966_s27, 3  ;;  %s346_s8 = smul.u32 160, %s5327_s12 }
  0x5b   : > { %s349_s30 = smul.u32 3, %s5327_s12  ;;  %s4194_s15 = sadd.s32 8, %s3547_s24 }
  0x5c   : > { %s3369_s11 = sadd.s32 4294967295, %s4194_s15  ;;  %s4197_s14 = scalar_lea.vmem [#allocation2], %s346_s8 }
  0x5d   : > { %s3276_s9 = scalar_lea.vmem %s4197_s14, 16 [#allocation2]  ;;  %p4202_p3 = scmp.gt.s32.totalorder %s3369_s11, 0 }
  0x5e   : > { %s360_s3 = sshll.u32 %s3276_s9, 4  ;;  %s4206_s10 = scalar_lea.sflag [#allocation7], %s349_s30  ;;  %s361_s3 = int_to_ptr.vmem [resolvable:$true] %s360_s3 }
  0x5f   : > { %s3794_s12 = sshra.s32 %s4192_s17, 4  ;;  %s3795_s12 = int_to_ptr.hbm [resolvable:$true] %s3794_s12 }
  0x60   : > { %s3796_s24 = scalar_lea.hbm %s3795_s12, 128  ;;  %p3801_p8 = scmp.lt.s32.totalorder %s3795_s12, %s5233_s0 }
  0x61   : > { %p3797_p4 = scmp.ne.s32.totalorder %s3795_s12, %s3796_s24  ;;  %p3802_p10 = scmp.lt.s32.totalorder %s4147_s29, %s3796_s24 }
  0x63   : > { %p3798_p6 = pnand %p3797_p4, %p3587_p0  ;;  %p3803_p11 = por %p3802_p10, %p3801_p8 }
  0x65   : > { %p3799_p9 = pneg %p3798_p6 }
  0x67   : > { %p3804_p12 = pnand %p3803_p11, %p3799_p9 }
  0x69   : > { %3807 = shalt.err (!%p3804_p12)  }
  0x6a   : > { %s3808_s21 = sshra.s32 %s361_s3, 4  ;;  %s3809_s21 = int_to_ptr.vmem [resolvable:$true] %s3808_s21 }
  0x6b   : > { %s3810_s18 = scalar_lea.vmem %s3809_s21, 128  ;;  %p3815_p7 = scmp.lt.s32.totalorder %s3809_s21, [#allocation2] }
  0x6c   : > { %p3811_p13 = scmp.ne.s32.totalorder %s3809_s21, %s3810_s18 }
  0x6e   : > { %p3812_p1 = pnand %p3811_p13, %p3587_p0 }
  0x70   : > { %p3813_p2 = pneg %p3812_p1 }
  0x72   : > { %p3818_p5 = pnand %p3815_p7, %p3813_p2 }
  0x74   : > { %3821 = shalt.err (!%p3818_p5)  }
  0x75   : > { %3571 = dma.hbm_to_vmem [thread:$0]  (%p3587_p0), %s4192_s17, 2048, %s361_s3, %s4206_s10 }
  0x76   : > { %s5329_s11 = smov (!%p4202_p3, %s3369_s11), 0  ;;  %s379_s30 = sshll.u32 %s4197_s14, 4  ;;  %s380_s30 = int_to_ptr.vmem [resolvable:$true] %s379_s30 }
  0x77   : > { %s339_s9 = sadd.s32 8, %s4194_s15  ;;  %s3373_s12 = sshll.u32 %s5329_s11, 4 }
  0x78   : > { %s3287_s24 = scalar_lea.sflag %s4206_s10, 1 [#allocation7]  ;;  %s365_s8 = sadd.s32 %s3373_s12, %s4136_s22 }
  0x79   : > { %s366_s18 = scalar_lea.hbm %s5233_s0, %s365_s8  ;;  %p4234_p5 = scmp.lt.s32.totalorder %s339_s9, 15 }
  0x7a   : > { %s377_s17 = sshll.u32 %s366_s18, 4  ;;  %s3294_s3 = scalar_lea.vmem %s4197_s14, 144 [#allocation2]  ;;  %s378_s17 = int_to_ptr.hbm [resolvable:$true] %s377_s17 }
  0x7b   : > { %s3822_s26 = sshra.s32 %s378_s17, 4  ;;  %s3823_s26 = int_to_ptr.hbm [resolvable:$true] %s3822_s26 }
  0x7c   : > { %s3824_s7 = scalar_lea.hbm %s3823_s26, 16  ;;  %p3829_p4 = scmp.lt.s32.totalorder %s3823_s26, %s5233_s0 }
  0x7d   : > { %p3825_p7 = scmp.ne.s32.totalorder %s3823_s26, %s3824_s7  ;;  %p3830_p6 = scmp.lt.s32.totalorder %s4147_s29, %s3824_s7 }
  0x7f   : > { %p3826_p2 = pnand %p3825_p7, %p3587_p0  ;;  %p3831_p9 = por %p3830_p6, %p3829_p4 }
  0x81   : > { %p3827_p3 = pneg %p3826_p2 }
  0x83   : > { %p3832_p8 = pnand %p3831_p9, %p3827_p3 }
  0x85   : > { %3835 = shalt.err (!%p3832_p8)  }
  0x86   : > { %s3836_s8 = sshra.s32 %s380_s30, 4  ;;  %s3837_s8 = int_to_ptr.vmem [resolvable:$true] %s3836_s8 }
  0x87   : > { %s3838_s23 = scalar_lea.vmem %s3837_s8, 16  ;;  %p3843_p13 = scmp.lt.s32.totalorder %s3837_s8, [#allocation2] }
  0x88   : > { %p3839_p10 = scmp.ne.s32.totalorder %s3837_s8, %s3838_s23 }
  0x8a   : > { %p3840_p11 = pnand %p3839_p10, %p3587_p0 }
  0x8c   : > { %p3841_p12 = pneg %p3840_p11 }
  0x8e   : > { %p3846_p1 = pnand %p3843_p13, %p3841_p12 }
  0x90   : > { %3849 = shalt.err (!%p3846_p1)  }
  0x91   : > { %3572 = dma.hbm_to_vmem [thread:$0]  (%p3587_p0), %s378_s17, 256, %s380_s30, %s3287_s24 }
  0x92   : > { %s5331_s9 = smov (!%p4234_p5, %s339_s9), 15  ;;  %s4255_s7 = sshll.u32 %s3294_s3, 4  ;;  %s400_s7 = int_to_ptr.vmem [resolvable:$true] %s4255_s7 }
  0x93   : > { %s403_s14 = smul.u32 3, %s5325_s13  ;;  %s3374_s21 = sshll.u32 %s5331_s9, 4 }
  0x94   : > { %s3297_s18 = scalar_lea.sflag %s4206_s10, 2 [#allocation7]  ;;  %s384_s26 = sadd.s32 %s3374_s21, %s4136_s22 }
  0x95   : > { %s385_s8 = scalar_lea.hbm %s5233_s0, %s384_s26 }
  0x96   : > { %s397_s23 = sshll.u32 %s385_s8, 4  ;;  %s398_s23 = int_to_ptr.hbm [resolvable:$true] %s397_s23 }
  0x97   : > { %s3850_s25 = sshra.s32 %s398_s23, 4  ;;  %s3851_s25 = int_to_ptr.hbm [resolvable:$true] %s3850_s25 }
  0x98   : > { %s3852_s15 = scalar_lea.hbm %s3851_s25, 16  ;;  %p3857_p3 = scmp.lt.s32.totalorder %s3851_s25, %s5233_s0 }
  0x99   : > { %p3853_p7 = scmp.ne.s32.totalorder %s3851_s25, %s3852_s15  ;;  %p3858_p4 = scmp.lt.s32.totalorder %s4147_s29, %s3852_s15 }
  0x9b   : > { %p3854_p5 = pnand %p3853_p7, %p3587_p0  ;;  %p3859_p6 = por %p3858_p4, %p3857_p3 }
  0x9d   : > { %p3855_p2 = pneg %p3854_p5 }
  0x9f   : > { %p3860_p9 = pnand %p3859_p6, %p3855_p2 }
  0xa1   : > { %3863 = shalt.err (!%p3860_p9)  }
  0xa2   : > { %s3864_s22 = sshra.s32 %s400_s7, 4  ;;  %s3865_s22 = int_to_ptr.vmem [resolvable:$true] %s3864_s22 }
  0xa3   : > { %s3866_s10 = scalar_lea.vmem %s3865_s22, 16  ;;  %p3871_p12 = scmp.lt.s32.totalorder %s3865_s22, [#allocation2] }
  0xa4   : > { %p3867_p8 = scmp.ne.s32.totalorder %s3865_s22, %s3866_s10 }
  0xa6   : > { %p3868_p10 = pnand %p3867_p8, %p3587_p0 }
  0xa8   : > { %p3869_p11 = pneg %p3868_p10 }
  0xaa   : > { %p3874_p13 = pnand %p3871_p12, %p3869_p11 }
  0xac   : > { %3877 = shalt.err (!%p3874_p13)  }
  0xad   : > { %3573 = dma.hbm_to_vmem [thread:$0]  (%p3587_p0), %s398_s23, 256, %s400_s7, %s3297_s18 }
  0xae   : > { %s4275_s25 = scalar_lea.vmem [#allocation11], %s4128_s20  ;;  %s404_s29 = scalar_lea.sflag [#allocation7], %s403_s14 }
  0xaf   : > { %3942 = dma.done.wait %s404_s29, 2048 }
  0xb0   : > { %3943 = vsyncadd %s404_s29, 4294965248  ;;  %s3302_s9 = scalar_lea.sflag %s404_s29, 1 [#allocation7] }
  0xb1   : > { %3944 = dma.done.wait %s3302_s9, 256 }
  0xb2   : > { %3945 = vsyncadd %s3302_s9, 4294967040  ;;  %s3305_s24 = scalar_lea.sflag %s404_s29, 2 [#allocation7] }
  0xb3   : > { %3946 = dma.done.wait %s3305_s24, 256 }
  0xb4   : > { %3947 = vsyncadd %s3305_s24, 4294967040  ;;  %v456_v0 = vld [vmem:[%s5234_s1 + $0x78] sm:$0xff]  ;;  %v455_v1 = vld [vmem:[%s5234_s1 + $0x70] sm:$0xff]  ;;  %s419_s7 = smul.u32 160, %s5325_s13  ;;  %v558_v34 = vlaneseq  ;;  %p5277_p0 = scmp.eq.s32.totalorder %s3966_s27, 0  ;;  %vm1288_vm1 = vcmask 261120  }
  0xb5   : > { %461 = vmatpush.msra.mxu0 %v456_v0  ;;  %v454_v2 = vld [vmem:[%s5234_s1 + $0x68] sm:$0xff]  ;;  %v453_v3 = vld [vmem:[%s5234_s1 + $0x60] sm:$0xff]  ;;  %v452_v4 = vld [vmem:[%s5234_s1 + $0x58] sm:$0xff]  ;;  %vm1026_vm2 = vcmask 1040384   ;;  %vm1167_vm4 = vcmask 1046528   ;;  %p642_p1 = scmp.eq.s32.totalorder %s3966_s27, 1 }
  0xb6   : > { %v451_v5 = vld [vmem:[%s5234_s1 + $0x50] sm:$0xff]  ;;  %v450_v6 = vld [vmem:[%s5234_s1 + $0x48] sm:$0xff]  ;;  %v449_v7 = vld [vmem:[%s5234_s1 + $0x40] sm:$0xff]  ;;  %s4328_s23 = scalar_lea.vmem [#allocation2], %s419_s7  ;;  %v4353_v40 = vshrl.u32 %v558_v34, 7  ;;  %s3536_s18 = sshll.u32 %s3970_s28, 1 }
  0xb7   : > { %462 = vmatpush.msra.mxu0 %v455_v1  ;;  %v448_v8 = vld [vmem:[%s5234_s1 + $0x38] sm:$0xff]  ;;  %v447_v9 = vld [vmem:[%s5234_s1 + $0x30] sm:$0xff]  ;;  %v446_v10 = vld [vmem:[%s5234_s1 + $0x28] sm:$0xff]  ;;  %s599_s13 = scalar_select %p5277_p0, 1, 0 }
  0xb8   : > { %v445_v11 = vld [vmem:[%s5234_s1 + $0x20] sm:$0xff]  ;;  %v444_v12 = vld [vmem:[%s5234_s1 + $0x18] sm:$0xff]  ;;  %v443_v13 = vld [vmem:[%s5234_s1 + $0x10] sm:$0xff]  ;;  %v750_v49 = vand.u32 15, %v4353_v40  ;;  %v560_v1 = vadd.s32 8, %v4353_v40  ;;  %s3184_s26 = sadd.s32 %s3966_s27, %s3536_s18  ;;  %s5302_s11 = sld [smem:[#allocation32_spill]] }
  0xb9   : > { %463 = vmatpush.msra.mxu0 %v454_v2  ;;  %v442_v14 = vld [vmem:[%s5234_s1 + $0x8] sm:$0xff]  ;;  %v441_v15 = vld [vmem:[%s5234_s1] sm:$0xff]  ;;  %v423_v18 = vld [vmem:[%s4328_s23 + $0x10] sm:$0xff]  ;;  %v600_v42 = vstv %s599_s13  ;;  %v561_v2 = vadd.s32 16, %v4353_v40  ;;  %s643_s30 = scalar_select %p642_p1, 1, 0 }
  0xba   : > { %v421_v16 = vld [vmem:[%s4328_s23] sm:$0xff]  ;;  %v422_v17 = vld [vmem:[%s4328_s23 + $0x8] sm:$0xff]  ;;  %v424_v19 = vld [vmem:[%s4328_s23 + $0x18] sm:$0xff]  ;;  %vm4359_vm0 = vcmp.eq.s32.totalorder %v600_v42, 1  ;;  %vm986_vm3 = vcmp.eq.s32.totalorder %v750_v49, 0  ;;  %s3549_s12 = sshll.u32 %s3184_s26, 7 }
  0xbb   : > { %464 = vmatpush.msra.mxu0 %v453_v3  ;;  %v425_v20 = vld [vmem:[%s4328_s23 + $0x20] sm:$0xff]  ;;  %v426_v21 = vld [vmem:[%s4328_s23 + $0x28] sm:$0xff]  ;;  %v427_v22 = vld [vmem:[%s4328_s23 + $0x30] sm:$0xff]  ;;  %s5303_s15 = sld [smem:[#allocation43_spill]]  ;;  %s3190_s28 = sshll.u32 %s4275_s25, 4  ;;  %s3191_s28 = int_to_ptr.vmem [resolvable:$true] %s3190_s28 }
  0xbc   : > { %v428_v23 = vld [vmem:[%s4328_s23 + $0x38] sm:$0xff]  ;;  %v429_v24 = vld [vmem:[%s4328_s23 + $0x40] sm:$0xff]  ;;  %v430_v25 = vld [vmem:[%s4328_s23 + $0x48] sm:$0xff] }
  0xbd   : > { %465 = vmatpush.msra.mxu0 %v452_v4  ;;  %v431_v26 = vld [vmem:[%s4328_s23 + $0x50] sm:$0xff]  ;;  %v432_v27 = vld [vmem:[%s4328_s23 + $0x58] sm:$0xff]  ;;  %v433_v28 = vld [vmem:[%s4328_s23 + $0x60] sm:$0xff] }
  0xbe   : > { %v434_v29 = vld [vmem:[%s4328_s23 + $0x68] sm:$0xff]  ;;  %v435_v30 = vld [vmem:[%s4328_s23 + $0x70] sm:$0xff]  ;;  %v1518_v31 = vld [vmem:[#allocation8 + $0x38] sm:$0xff]  ;;  %s5305_s27 = sand.u32 1, %s5302_s11  }
  0xbf   : > { %466 = vmatpush.msra.mxu0 %v451_v5  ;;  %3554 = vmatpush.msra.mxu2 %v1518_v31  ;;  %v436_v32 = vld [vmem:[%s4328_s23 + $0x78] sm:$0xff]  ;;  %v1517_v33 = vld [vmem:[#allocation8 + $0x30] sm:$0xff]  ;;  %v1516_v36 = vld [vmem:[#allocation8 + $0x28] sm:$0xff]  ;;  %s3176_s10 = scalar_lea.sflag [#allocation10], %s5305_s27 }
  0xc0   : > { %v1368_v35 = vld [vmem:[#allocation8 + $0x18] sm:$0xff]  ;;  %v1367_v37 = vld [vmem:[#allocation8 + $0x10] sm:$0xff]  ;;  %v1515_v38 = vld [vmem:[#allocation8 + $0x20] sm:$0xff] }
  0xc1   : > { %467 = vmatpush.msra.mxu0 %v450_v6  ;;  %3555 = vmatpush.msra.mxu2 %v1517_v33  ;;  %v4351_v39 = vld [vmem:[%s5235_s2] ss:$0 sm:$0xff]  ;;  %v1366_v41 = vld [vmem:[#allocation8 + $0x8] sm:$0xff]  ;;  %v4357_v47 = vld [vmem:[#allocation8 + $0x58] sm:$0xff]  ;;  %s3189_s16 = scalar_lea.hbm %s5303_s15, %s3549_s12  ;;  %s3898_s3 = scalar_lea.hbm %s5303_s15, 512 }
  0xc2   : > { %3550 = vmatpush.msra.mxu1 %v1368_v35  ;;  %v437_v44 = vld [vmem:[%s4328_s23 + $0x80] sm:$0xff]  ;;  %3558 = vmatpush.msra.mxu3 %v4357_v47  ;;  %v4365_v51 = vld [vmem:[#allocation8 + $0x50] sm:$0xff]  ;;  %v4370_v53 = vld [vmem:[#allocation8 + $0x48] sm:$0xff]  ;;  %s3192_s22 = sshll.u32 %s3189_s16, 4  ;;  %s3193_s22 = int_to_ptr.hbm [resolvable:$true] %s3192_s22 }
  0xc3   : > { %468 = vmatpush.msra.mxu0 %v449_v7  ;;  %3556 = vmatpush.msra.mxu2 %v1516_v36  ;;  %v1365_v45 = vld [vmem:[#allocation8] sm:$0xff]  ;;  %v438_v58 = vld [vmem:[%s4328_s23 + $0x88] sm:$0xff]  ;;  %v1882_v61 = vld [vmem:[#allocation8 + $0x78] sm:$0xff]  ;;  %s3892_s29 = sshra.s32 %s3193_s22, 4  ;;  %s3893_s29 = int_to_ptr.hbm [resolvable:$true] %s3892_s29 }
  0xc4   : > { %3551 = vmatpush.msra.mxu1 %v1367_v37  ;;  %3559 = vmatpush.msra.mxu3 %v4365_v51  ;;  %v4374_v55 = vld [vmem:[#allocation8 + $0x40] sm:$0xff]  ;;  %v2064_v62 = vld [vmem:[#allocation8 + $0x98] sm:$0xff]  ;;  %s3894_s9 = scalar_lea.hbm %s3893_s29, 128  ;;  %p3899_p4 = scmp.lt.s32.totalorder %s3893_s29, %s5303_s15 }
  0xc5   : > { %469 = vmatpush.msra.mxu0 %v448_v8  ;;  %3557 = vmatpush.msra.mxu2 %v1515_v38  ;;  %p3895_p7 = scmp.ne.s32.totalorder %s3893_s29, %s3894_s9  ;;  %p3900_p6 = scmp.lt.s32.totalorder %s3898_s3, %s3894_s9 }
  0xc6   : > { %3552 = vmatpush.msra.mxu1 %v1366_v41  ;;  %3560 = vmatpush.msra.mxu3 %v4370_v53 }
  0xc7   : > { %470 = vmatpush.msra.mxu0 %v447_v9  ;;  %2125 = vmatpush.msrb.mxu2 %v2064_v62  ;;  %v439_v9 = vld [vmem:[%s4328_s23 + $0x90] sm:$0xff]  ;;  %v565_v62 = vadd.s32 48, %v4353_v40  ;;  %p3901_p9 = por %p3900_p6, %p3899_p4 }
  0xc8   : > { %3553 = vmatpush.msra.mxu1 %v1365_v45  ;;  %3561 = vmatpush.msra.mxu3 %v4374_v55 }
  0xc9   : > { %471 = vmatpush.msra.mxu0 %v446_v10 }
  0xca   : > { %1943 = vmatpush.msrb.mxu1 %v1882_v61  ;;  %v564_v61 = vadd.s32 40, %v4353_v40 }
  0xcb   : > { %472 = vmatpush.msra.mxu0 %v445_v11  ;;  %v757_v11 = vand.u32 15, %v560_v1 }
  0xcd   : > { %473 = vmatpush.msra.mxu0 %v444_v12  ;;  %v764_v12 = vand.u32 15, %v561_v2  ;;  %vm1148_vm6 = vcmp.eq.s32.totalorder %v757_v11, 15 }
  0xcf   : > { %474 = vmatpush.msra.mxu0 %v443_v13  ;;  %vm988_vm5 = vcmp.eq.s32.totalorder %v764_v12, 0 }
  0xd1   : > { %475 = vmatpush.msra.mxu0 %v442_v14 }
  0xd3   : > { %476 = vmatpush.msra.mxu0 %v441_v15 }
  0xd4   : > { %477 = vmatmul.f32.vlgmr.msra.gmra.mxu0 %v421_v16 }
  0xd5   : > { %1429 = vmatpush.msrb.mxu0 %v1368_v35 }
  0xd7   : > { %1430 = vmatpush.msrb.mxu0 %v1367_v37 }
  0xd9   : > { %1431 = vmatpush.msrb.mxu0 %v1366_v41 }
  0xdb   : > { %1432 = vmatpush.msrb.mxu0 %v1365_v45 }
  0xdc   : > { %480 = vmatmul.f32.gmra.mxu0 %v422_v17 }
  0xdd   : > { %1579 = vmatpush.msra.mxu0 %v1518_v31 }
  0xdf   : > { %1580 = vmatpush.msra.mxu0 %v1517_v33 }
  0xe1   : > { %1581 = vmatpush.msra.mxu0 %v1516_v36  ;;  %v1881_v36 = vld [vmem:[#allocation8 + $0x70] sm:$0xff] }
  0xe2   : > { %1944 = vmatpush.msrb.mxu1 %v1881_v36 }
  0xe3   : > { %1582 = vmatpush.msra.mxu0 %v1515_v38 }
  0xe4   : > { %483 = vmatmul.f32.gmra.mxu0 %v423_v18 }
  0xec   : > { %486 = vmatmul.f32.gmra.mxu0 %v424_v19 }
  0xf4   : > { %489 = vmatmul.f32.gmra.mxu0 %v425_v20 }
  0xfc   : > { %492 = vmatmul.f32.gmra.mxu0 %v426_v21  ;;  %v440_v21 = vld [vmem:[%s4328_s23 + $0x98] sm:$0xff] }
 0x104   : > { %495 = vmatmul.f32.gmra.mxu0 %v427_v22 }
 0x10c   : > { %498 = vmatmul.f32.gmra.mxu0 %v428_v23 }
 0x114   : > { %501 = vmatmul.f32.gmra.mxu0 %v429_v24 }
 0x11c   : > { %504 = vmatmul.f32.gmra.mxu0 %v430_v25 }
 0x124   : > { %507 = vmatmul.f32.gmra.mxu0 %v431_v26 }
 0x12c   : > { %510 = vmatmul.f32.gmra.mxu0 %v432_v27  ;;  %v562_v27 = vadd.s32 24, %v4353_v40 }
 0x12e   : > { %v771_v34 = vand.u32 15, %v562_v27 }
 0x130   : > { %vm4423_vm8 = vcmp.eq.s32.totalorder %v771_v34, 15 }
 0x134   : > { %513 = vmatmul.f32.gmra.mxu0 %v433_v28  ;;  %v563_v28 = vadd.s32 32, %v4353_v40 }
 0x136   : > { %v778_v35 = vand.u32 15, %v563_v28 }
 0x138   : > { %vm4419_vm7 = vcmp.eq.s32.totalorder %v778_v35, 0 }
 0x13c   : > { %516 = vmatmul.f32.gmra.mxu0 %v434_v29 }
 0x144   : > { %519 = vmatmul.f32.gmra.mxu0 %v435_v30 }
 0x14c   : > { %522 = vmatmul.f32.gmra.mxu0 %v436_v32 }
 0x151   : > { %v478_v43 = vpop.f32.mrf.mxu0 }
 0x152   : > { %v479_v46 = vadd.f32 %v4351_v39, %v478_v43 }
 0x154   : > { %v538_v50 = vmax.f32 %v479_v46, 0.0  ;;  %525 = vmatmul.f32.gmra.mxu0 %v437_v44 }
 0x156   : > { %v726_v52 = vsel %vm4359_vm0, 0.0, %v538_v50 }
 0x157   : > { %v1027_v54 = vrot.slane %v726_v52, 7  ;;  %1289 = vst.msk [vmem:[#allocation3] sm:$0xff] %vm1288_vm1, %v726_v52  ;;  %v1168_v3 = vrot.slane %v726_v52, 1 }
 0x159   : > { %v1086_v56 = vsel %vm1026_vm2, 0.0, %v1027_v54  ;;  %v481_v57 = vpop.f32.mrf.mxu0 }
 0x15a   : > { %v1127_v59 = vsel %vm986_vm3, 0.0, %v1086_v56  ;;  %v482_v60 = vadd.f32 %v4351_v39, %v481_v57  ;;  %v2063_v57 = vld [vmem:[#allocation8 + $0x90] sm:$0xff] }
 0x15b   : > { %1309 = vst.msk [vmem:[#allocation4] sm:$0xff] %vm1288_vm1, %v1127_v59  ;;  %2126 = vmatpush.msrb.mxu2 %v2063_v57 }
 0x15c   : > { %v539_v63 = vmax.f32 %v482_v60, 0.0  ;;  %528 = vmatmul.f32.gmra.mxu0 %v438_v58 }
 0x15e   : > { %v727_v0 = vsel %vm4359_vm0, 0.0, %v539_v63 }
 0x15f   : > { %v1028_v4 = vrot.slane %v727_v0, 7  ;;  %v1169_v5 = vrot.slane %v727_v0, 1  ;;  %1290 = vst.msk [vmem:[#allocation3 + $0x8] sm:$0xff] %vm1288_vm1, %v727_v0 }
 0x161   : > { %v1029_v6 = vsel %vm1026_vm2, %v1027_v54, %v1028_v4  ;;  %v1170_v7 = vsel %vm1167_vm4, %v1168_v3, %v1169_v5  ;;  %v484_v8 = vpop.f32.mrf.mxu0  ;;  %v785_v3 = vand.u32 15, %v564_v61 }
 0x162   : > { %1310 = vst.msk [vmem:[#allocation4 + $0x8] sm:$0xff] %vm1288_vm1, %v1029_v6  ;;  %v485_v10 = vadd.f32 %v4351_v39, %v484_v8  ;;  %v1349_v37 = vld [vmem:[#allocation4] sm:$0xff]  ;;  %v2428_v6 = vld [vmem:[#allocation8 + $0xd8] sm:$0xff] }
 0x163   : > { %1329 = vst.msk [vmem:[#allocation5] sm:$0xff] %vm1288_vm1, %v1170_v7  ;;  %v1498_v7 = vld [vmem:[#allocation3] sm:$0xff]  ;;  %vm4478_vm10 = vcmp.eq.s32.totalorder %v785_v3, 15 }
 0x164   : > { %v540_v13 = vmax.f32 %v485_v10, 0.0  ;;  %531 = vmatmul.f32.gmra.mxu0 %v439_v9  ;;  %v2427_v9 = vld [vmem:[#allocation8 + $0xd0] sm:$0xff] }
 0x166   : > { %v1030_v14 = vrot.slane %v540_v13, 7  ;;  %v1171_v15 = vrot.slane %v540_v13, 1  ;;  %1291 = vst.msk [vmem:[#allocation3 + $0x10] sm:$0xff] %vm1288_vm1, %v540_v13 }
 0x168   : > { %v1031_v16 = vsel %vm1026_vm2, %v1028_v4, %v1030_v14  ;;  %v1172_v17 = vsel %vm1167_vm4, %v1169_v5, %v1171_v15  ;;  %v792_v4 = vand.u32 15, %v565_v62 }
 0x169   : > { %v1129_v18 = vsel %vm988_vm5, 0.0, %v1031_v16  ;;  %v1269_v19 = vsel %vm1148_vm6, 0.0, %v1172_v17  ;;  %v487_v20 = vpop.f32.mrf.mxu0  ;;  %v1350_v56 = vld [vmem:[#allocation4 + $0x8] sm:$0xff] }
 0x16a   : > { %1311 = vst.msk [vmem:[#allocation4 + $0x10] sm:$0xff] %vm1288_vm1, %v1129_v18  ;;  %v488_v22 = vadd.f32 %v4351_v39, %v487_v20  ;;  %vm4474_vm9 = vcmp.eq.s32.totalorder %v792_v4, 0 }
 0x16b   : > { %1330 = vst.msk [vmem:[#allocation5 + $0x8] sm:$0xff] %vm1288_vm1, %v1269_v19  ;;  %v2425_v19 = vld [vmem:[#allocation8 + $0xc0] sm:$0xff] }
 0x16c   : > { %v541_v23 = vmax.f32 %v488_v22, 0.0  ;;  %534 = vmatmul.f32.gmra.mxu0 %v440_v21 }
 0x16d   : > { %v4399_v24 = vld [vmem:[#allocation3 + $0x10] sm:$0xff] }
 0x16e   : > { %v1032_v25 = vrot.slane %v541_v23, 7  ;;  %v1173_v26 = vrot.slane %v541_v23, 1  ;;  %1292 = vst.msk [vmem:[#allocation3 + $0x18] sm:$0xff] %vm1288_vm1, %v541_v23  ;;  %3393 = vmatmul.msk.f32.vlgmr.msra.gmra.mxu2 %vm1288_vm1, %v4399_v24 }
 0x170   : > { %v1033_v29 = vsel %vm1026_vm2, %v1030_v14, %v1032_v25  ;;  %v1174_v30 = vsel %vm1167_vm4, %v1171_v15, %v1173_v26  ;;  %v2426_v15 = vld [vmem:[#allocation8 + $0xc8] sm:$0xff] }
 0x171   : > { %1312 = vst.msk [vmem:[#allocation4 + $0x18] sm:$0xff] %vm1288_vm1, %v1033_v29  ;;  %v490_v31 = vpop.f32.mrf.mxu0  ;;  %v4409_v32 = vld [vmem:[#allocation4 + $0x10] sm:$0xff] }
 0x172   : > { %1331 = vst.msk [vmem:[#allocation5 + $0x10] sm:$0xff] %vm1288_vm1, %v1174_v30  ;;  %v491_v33 = vadd.f32 %v4351_v39, %v490_v31  ;;  %3377 = vmatmul.msk.f32.vlgmr.msra.gmra.mxu1 %vm1288_vm1, %v4409_v32  ;;  %v566_v31 = vadd.s32 56, %v4353_v40 }
 0x174   : > { %v542_v38 = vmax.f32 %v491_v33, 0.0  ;;  %3375 = vmatmul.msk.f32.vlgmr.msrb.gmra.mxu0 %vm1288_vm1, %v1349_v37  ;;  %v567_v33 = vadd.s32 64, %v4353_v40  ;;  %v799_v42 = vand.u32 15, %v566_v31 }
 0x175   : > { %v4416_v41 = vld [vmem:[#allocation3 + $0x18] sm:$0xff]  ;;  %1761 = vmatpush.msrb.mxu0 %v4357_v47 }
 0x176   : > { %v1034_v43 = vrot.slane %v542_v38, 7  ;;  %v1175_v45 = vrot.slane %v542_v38, 1  ;;  %1293 = vst.msk [vmem:[#allocation3 + $0x20] sm:$0xff] %vm1288_vm1, %v542_v38  ;;  %3394 = vmatmul.msk.f32.gmra.mxu2 %vm1288_vm1, %v4416_v41  ;;  %vm1154_vm12 = vcmp.eq.s32.totalorder %v799_v42, 15 }
 0x177   : > { %1762 = vmatpush.msrb.mxu0 %v4365_v51 }
 0x178   : > { %v1035_v46 = vsel %vm1026_vm2, %v1032_v25, %v1034_v43  ;;  %v1176_v47 = vsel %vm1167_vm4, %v1173_v26, %v1175_v45  ;;  %v4433_v48 = vld [vmem:[#allocation4 + $0x18] sm:$0xff]  ;;  %v1499_v26 = vld [vmem:[#allocation3 + $0x8] sm:$0xff] }
 0x179   : > { %v1131_v49 = vsel %vm4419_vm7, 0.0, %v1035_v46  ;;  %v1271_v50 = vsel %vm4423_vm8, 0.0, %v1176_v47  ;;  %v493_v52 = vpop.f32.mrf.mxu0  ;;  %v4439_v54 = vld [vmem:[#allocation5 + $0x10] sm:$0xff]  ;;  %1763 = vmatpush.msrb.mxu0 %v4370_v53  ;;  %v2062_v46 = vld [vmem:[#allocation8 + $0x88] sm:$0xff]  ;;  %v1680_v47 = vld [vmem:[#allocation5] sm:$0xff] }
 0x17a   : > { %1313 = vst.msk [vmem:[#allocation4 + $0x20] sm:$0xff] %vm1288_vm1, %v1131_v49  ;;  %v494_v51 = vadd.f32 %v4351_v39, %v493_v52  ;;  %3409 = vmatmul.msk.f32.vlgmr.msra.gmra.mxu3 %vm1288_vm1, %v4439_v54  ;;  %3378 = vmatmul.msk.f32.gmra.mxu1 %vm1288_vm1, %v4433_v48 }
 0x17b   : > { %1332 = vst.msk [vmem:[#allocation5 + $0x18] sm:$0xff] %vm1288_vm1, %v1271_v50  ;;  %1764 = vmatpush.msrb.mxu0 %v4374_v55  ;;  %2127 = vmatpush.msrb.mxu2 %v2062_v46 }
 0x17c   : > { %v543_v58 = vmax.f32 %v494_v51, 0.0  ;;  %3376 = vmatmul.msk.f32.gmra.mxu0 %vm1288_vm1, %v1350_v56 }
 0x17d   : > { %v4451_v53 = vld [vmem:[#allocation3 + $0x20] sm:$0xff] }
 0x17e   : > { %v1036_v59 = vrot.slane %v543_v58, 7  ;;  %v1177_v60 = vrot.slane %v543_v58, 1  ;;  %1294 = vst.msk [vmem:[#allocation3 + $0x28] sm:$0xff] %vm1288_vm1, %v543_v58  ;;  %3395 = vmatmul.msk.f32.gmra.mxu2 %vm1288_vm1, %v4451_v53 }
 0x180   : > { %v1037_v63 = vsel %vm1026_vm2, %v1034_v43, %v1036_v59  ;;  %v1178_v55 = vsel %vm1167_vm4, %v1175_v45, %v1177_v60  ;;  %v806_v43 = vand.u32 15, %v567_v33  ;;  %v1880_v45 = vld [vmem:[#allocation8 + $0x68] sm:$0xff] }
 0x181   : > { %1314 = vst.msk [vmem:[#allocation4 + $0x28] sm:$0xff] %vm1288_vm1, %v1037_v63  ;;  %v496_v0 = vpop.f32.mrf.mxu0  ;;  %v4461_v1 = vld [vmem:[#allocation4 + $0x20] sm:$0xff]  ;;  %1945 = vmatpush.msrb.mxu1 %v1880_v45  ;;  %v571_v45 = vadd.s32 96, %v4353_v40 }
 0x182   : > { %1333 = vst.msk [vmem:[#allocation5 + $0x20] sm:$0xff] %vm1288_vm1, %v1178_v55  ;;  %v497_v2 = vadd.f32 %v4351_v39, %v496_v0  ;;  %3379 = vmatmul.msk.f32.gmra.mxu1 %vm1288_vm1, %v4461_v1  ;;  %v4467_v5 = vld [vmem:[#allocation5 + $0x18] sm:$0xff]  ;;  %vm994_vm11 = vcmp.eq.s32.totalorder %v806_v43, 0  ;;  %v1681_v55 = vld [vmem:[#allocation5 + $0x8] sm:$0xff]  ;;  %v570_v43 = vadd.s32 88, %v4353_v40 }
 0x183   : > { %3410 = vmatmul.msk.f32.gmra.mxu3 %vm1288_vm1, %v4467_v5 }
 0x184   : > { %v544_v8 = vmax.f32 %v497_v2, 0.0  ;;  %3391 = vmatmul.msk.f32.vlgmr.msra.gmra.mxu0 %vm1288_vm1, %v1498_v7  ;;  %v569_v7 = vadd.s32 80, %v4353_v40 }
 0x185   : > { %v4472_v10 = vld [vmem:[#allocation3 + $0x28] sm:$0xff]  ;;  %2489 = vmatpush.msra.mxu0 %v2428_v6  ;;  %v568_v6 = vadd.s32 72, %v4353_v40 }
 0x186   : > { %v1038_v12 = vrot.slane %v544_v8, 7  ;;  %v1179_v14 = vrot.slane %v544_v8, 1  ;;  %1295 = vst.msk [vmem:[#allocation3 + $0x30] sm:$0xff] %vm1288_vm1, %v544_v8  ;;  %3396 = vmatmul.msk.f32.gmra.mxu2 %vm1288_vm1, %v4472_v10 }
 0x187   : > { %2490 = vmatpush.msra.mxu0 %v2427_v9 }
 0x188   : > { %v1039_v16 = vsel %vm1026_vm2, %v1036_v59, %v1038_v12  ;;  %v1180_v17 = vsel %vm1167_vm4, %v1177_v60, %v1179_v14  ;;  %v4487_v18 = vld [vmem:[#allocation4 + $0x28] sm:$0xff] }
 0x189   : > { %v1133_v20 = vsel %vm4474_vm9, 0.0, %v1039_v16  ;;  %v1273_v21 = vsel %vm4478_vm10, 0.0, %v1180_v17  ;;  %v499_v22 = vpop.f32.mrf.mxu0  ;;  %v4493_v23 = vld [vmem:[#allocation5 + $0x20] sm:$0xff]  ;;  %2491 = vmatpush.msra.mxu0 %v2426_v15  ;;  %v820_v15 = vand.u32 15, %v569_v7 }
 0x18a   : > { %1315 = vst.msk [vmem:[#allocation4 + $0x30] sm:$0xff] %vm1288_vm1, %v1133_v20  ;;  %v500_v25 = vadd.f32 %v4351_v39, %v499_v22  ;;  %3380 = vmatmul.msk.f32.gmra.mxu1 %vm1288_vm1, %v4487_v18 }
 0x18b   : > { %1334 = vst.msk [vmem:[#allocation5 + $0x28] sm:$0xff] %vm1288_vm1, %v1273_v21  ;;  %3411 = vmatmul.msk.f32.gmra.mxu3 %vm1288_vm1, %v4493_v23  ;;  %2492 = vmatpush.msra.mxu0 %v2425_v19  ;;  %vm996_vm13 = vcmp.eq.s32.totalorder %v820_v15, 0 }
 0x18c   : > { %v545_v27 = vmax.f32 %v500_v25, 0.0  ;;  %3392 = vmatmul.msk.f32.gmra.mxu0 %vm1288_vm1, %v1499_v26 }
 0x18d   : > { %v4503_v28 = vld [vmem:[#allocation3 + $0x30] sm:$0xff] }
 0x18e   : > { %v1040_v29 = vrot.slane %v545_v27, 7  ;;  %v1181_v30 = vrot.slane %v545_v27, 1  ;;  %1296 = vst.msk [vmem:[#allocation3 + $0x38] sm:$0xff] %vm1288_vm1, %v545_v27  ;;  %3397 = vmatmul.msk.f32.gmra.mxu2 %vm1288_vm1, %v4503_v28 }
 0x190   : > { %v1041_v34 = vsel %vm1026_vm2, %v1038_v12, %v1040_v29  ;;  %v1182_v35 = vsel %vm1167_vm4, %v1179_v14, %v1181_v30  ;;  %v813_v14 = vand.u32 15, %v568_v6 }
 0x191   : > { %1316 = vst.msk [vmem:[#allocation4 + $0x38] sm:$0xff] %vm1288_vm1, %v1041_v34  ;;  %v502_v36 = vpop.f32.mrf.mxu0  ;;  %v4513_v37 = vld [vmem:[#allocation4 + $0x30] sm:$0xff]  ;;  %v1879_v34 = vld [vmem:[#allocation8 + $0x60] sm:$0xff] }
 0x192   : > { %1335 = vst.msk [vmem:[#allocation5 + $0x30] sm:$0xff] %vm1288_vm1, %v1182_v35  ;;  %v503_v38 = vadd.f32 %v4351_v39, %v502_v36  ;;  %3381 = vmatmul.msk.f32.gmra.mxu1 %vm1288_vm1, %v4513_v37  ;;  %v4519_v44 = vld [vmem:[#allocation5 + $0x28] sm:$0xff]  ;;  %vm1156_vm14 = vcmp.eq.s32.totalorder %v813_v14, 15  ;;  %v2246_v14 = vld [vmem:[#allocation8 + $0xb8] sm:$0xff] }
 0x193   : > { %3412 = vmatmul.msk.f32.gmra.mxu3 %vm1288_vm1, %v4519_v44  ;;  %1946 = vmatpush.msrb.mxu1 %v1879_v34 }
 0x194   : > { %v546_v49 = vmax.f32 %v503_v38, 0.0  ;;  %3407 = vmatmul.msk.f32.vlgmr.msrb.gmra.mxu0 %vm1288_vm1, %v1680_v47  ;;  %2307 = vmatpush.msrb.mxu3 %v2246_v14  ;;  %v2610_v14 = vld [vmem:[#allocation8 + $0xf8] sm:$0xff] }
 0x195   : > { %v4524_v50 = vld [vmem:[#allocation3 + $0x38] sm:$0xff]  ;;  %2671 = vmatpush.msra.mxu1 %v2610_v14 }
 0x196   : > { %v1042_v52 = vrot.slane %v546_v49, 7  ;;  %v1183_v51 = vrot.slane %v546_v49, 1  ;;  %1297 = vst.msk [vmem:[#allocation3 + $0x40] sm:$0xff] %vm1288_vm1, %v546_v49  ;;  %3398 = vmatmul.msk.f32.gmra.mxu2 %vm1288_vm1, %v4524_v50 }
 0x198   : > { %v1043_v56 = vsel %vm1026_vm2, %v1040_v29, %v1042_v52  ;;  %v1184_v57 = vsel %vm1167_vm4, %v1181_v30, %v1183_v51  ;;  %v4531_v58 = vld [vmem:[#allocation4 + $0x38] sm:$0xff] }
 0x199   : > { %v1135_v59 = vsel %vm994_vm11, 0.0, %v1043_v56  ;;  %v1275_v60 = vsel %vm1154_vm12, 0.0, %v1184_v57  ;;  %v505_v61 = vpop.f32.mrf.mxu0  ;;  %v4533_v62 = vld [vmem:[#allocation5 + $0x30] sm:$0xff]  ;;  %v827_v56 = vand.u32 15, %v570_v43  ;;  %v834_v57 = vand.u32 15, %v571_v45 }
 0x19a   : > { %1317 = vst.msk [vmem:[#allocation4 + $0x40] sm:$0xff] %vm1288_vm1, %v1135_v59  ;;  %v506_v63 = vadd.f32 %v4351_v39, %v505_v61  ;;  %3382 = vmatmul.msk.f32.gmra.mxu1 %vm1288_vm1, %v4531_v58 }
 0x19b   : > { %1336 = vst.msk [vmem:[#allocation5 + $0x38] sm:$0xff] %vm1288_vm1, %v1275_v60  ;;  %3413 = vmatmul.msk.f32.gmra.mxu3 %vm1288_vm1, %v4533_v62  ;;  %v2061_v60 = vld [vmem:[#allocation8 + $0x80] sm:$0xff]  ;;  %vm998_vm15 = vcmp.eq.s32.totalorder %v834_v57, 0  ;;  %vm1158_vm0 = vcmp.eq.s32.totalorder %v827_v56, 15  ;;  %v2244_v57 = vld [vmem:[#allocation8 + $0xa8] sm:$0xff] }
 0x19c   : > { %v547_v0 = vmax.f32 %v506_v63, 0.0  ;;  %3408 = vmatmul.msk.f32.gmra.mxu0 %vm1288_vm1, %v1681_v55  ;;  %2128 = vmatpush.msrb.mxu2 %v2061_v60 }
 0x19d   : > { %v4543_v2 = vld [vmem:[#allocation3 + $0x40] sm:$0xff] }
 0x19e   : > { %v1044_v3 = vrot.slane %v547_v0, 7  ;;  %v1185_v4 = vrot.slane %v547_v0, 1  ;;  %1298 = vst.msk [vmem:[#allocation3 + $0x48] sm:$0xff] %vm1288_vm1, %v547_v0  ;;  %3399 = vmatmul.msk.f32.gmra.mxu2 %vm1288_vm1, %v4543_v2 }
 0x1a0   : > { %v1045_v8 = vsel %vm1026_vm2, %v1042_v52, %v1044_v3  ;;  %v1186_v9 = vsel %vm1167_vm4, %v1183_v51, %v1185_v4 }
 0x1a1   : > { %1318 = vst.msk [vmem:[#allocation4 + $0x48] sm:$0xff] %vm1288_vm1, %v1045_v8  ;;  %v508_v11 = vpop.f32.mrf.mxu0  ;;  %v4553_v12 = vld [vmem:[#allocation4 + $0x40] sm:$0xff] }
 0x1a2   : > { %1337 = vst.msk [vmem:[#allocation5 + $0x40] sm:$0xff] %vm1288_vm1, %v1186_v9  ;;  %v509_v13 = vadd.f32 %v4351_v39, %v508_v11  ;;  %3383 = vmatmul.msk.f32.gmra.mxu1 %vm1288_vm1, %v4553_v12  ;;  %v4559_v16 = vld [vmem:[#allocation5 + $0x38] sm:$0xff] }
 0x1a3   : > { %3414 = vmatmul.msk.f32.gmra.mxu3 %vm1288_vm1, %v4559_v16 }
 0x1a4   : > { %v548_v17 = vmax.f32 %v509_v13, 0.0  ;;  %3471 = vmatmul.msk.f32.vlgmr.msra.gmra.mxu0 %vm1288_vm1, %v4461_v1 }
 0x1a5   : > { %v4565_v19 = vld [vmem:[#allocation3 + $0x48] sm:$0xff] }
 0x1a6   : > { %v1046_v20 = vrot.slane %v548_v17, 7  ;;  %v1187_v21 = vrot.slane %v548_v17, 1  ;;  %1299 = vst.msk [vmem:[#allocation3 + $0x50] sm:$0xff] %vm1288_vm1, %v548_v17  ;;  %3400 = vmatmul.msk.f32.gmra.mxu2 %vm1288_vm1, %v4565_v19 }
 0x1a8   : > { %v1047_v22 = vsel %vm1026_vm2, %v1044_v3, %v1046_v20  ;;  %v1188_v25 = vsel %vm1167_vm4, %v1185_v4, %v1187_v21  ;;  %v4572_v26 = vld [vmem:[#allocation4 + $0x48] sm:$0xff] }
 0x1a9   : > { %v1137_v27 = vsel %vm996_vm13, 0.0, %v1047_v22  ;;  %v1277_v29 = vsel %vm1156_vm14, 0.0, %v1188_v25  ;;  %v511_v30 = vpop.f32.mrf.mxu0  ;;  %v4574_v31 = vld [vmem:[#allocation5 + $0x40] sm:$0xff]  ;;  %v572_v22 = vadd.s32 104, %v4353_v40  ;;  %v573_v25 = vadd.s32 112, %v4353_v40 }
 0x1aa   : > { %1319 = vst.msk [vmem:[#allocation4 + $0x50] sm:$0xff] %vm1288_vm1, %v1137_v27  ;;  %v512_v33 = vadd.f32 %v4351_v39, %v511_v30  ;;  %3384 = vmatmul.msk.f32.gmra.mxu1 %vm1288_vm1, %v4572_v26 }
 0x1ab   : > { %1338 = vst.msk [vmem:[#allocation5 + $0x48] sm:$0xff] %vm1288_vm1, %v1277_v29  ;;  %3415 = vmatmul.msk.f32.gmra.mxu3 %vm1288_vm1, %v4574_v31 }
 0x1ac   : > { %v549_v35 = vmax.f32 %v512_v33, 0.0  ;;  %3472 = vmatmul.msk.f32.gmra.mxu0 %vm1288_vm1, %v4487_v18 }
 0x1ad   : > { %v4585_v36 = vld [vmem:[#allocation3 + $0x50] sm:$0xff] }
 0x1ae   : > { %v1048_v38 = vrot.slane %v549_v35, 7  ;;  %v1189_v42 = vrot.slane %v549_v35, 1  ;;  %1300 = vst.msk [vmem:[#allocation3 + $0x58] sm:$0xff] %vm1288_vm1, %v549_v35  ;;  %3401 = vmatmul.msk.f32.gmra.mxu2 %vm1288_vm1, %v4585_v36  ;;  %v841_v35 = vand.u32 15, %v572_v22 }
 0x1b0   : > { %v1049_v46 = vsel %vm1026_vm2, %v1046_v20, %v1048_v38  ;;  %v1190_v47 = vsel %vm1167_vm4, %v1187_v21, %v1189_v42  ;;  %vm4655_vm5 = vcmp.eq.s32.totalorder %v841_v35, 15 }
 0x1b1   : > { %1320 = vst.msk [vmem:[#allocation4 + $0x58] sm:$0xff] %vm1288_vm1, %v1049_v46  ;;  %v514_v49 = vpop.f32.mrf.mxu0  ;;  %v4595_v52 = vld [vmem:[#allocation4 + $0x50] sm:$0xff] }
 0x1b2   : > { %1339 = vst.msk [vmem:[#allocation5 + $0x50] sm:$0xff] %vm1288_vm1, %v1190_v47  ;;  %v515_v51 = vadd.f32 %v4351_v39, %v514_v49  ;;  %3385 = vmatmul.msk.f32.gmra.mxu1 %vm1288_vm1, %v4595_v52  ;;  %v4601_v59 = vld [vmem:[#allocation5 + $0x48] sm:$0xff]  ;;  %v2245_v46 = vld [vmem:[#allocation8 + $0xb0] sm:$0xff] }
 0x1b3   : > { %3416 = vmatmul.msk.f32.gmra.mxu3 %vm1288_vm1, %v4601_v59 }
 0x1b4   : > { %v550_v61 = vmax.f32 %v515_v51, 0.0  ;;  %3473 = vmatmul.msk.f32.gmra.mxu0 %vm1288_vm1, %v4513_v37  ;;  %2308 = vmatpush.msrb.mxu3 %v2245_v46 }
 0x1b5   : > { %v4607_v63 = vld [vmem:[#allocation3 + $0x58] sm:$0xff] }
 0x1b6   : > { %v1050_v55 = vrot.slane %v550_v61, 7  ;;  %v1191_v0 = vrot.slane %v550_v61, 1  ;;  %1301 = vst.msk [vmem:[#allocation3 + $0x60] sm:$0xff] %vm1288_vm1, %v550_v61  ;;  %3402 = vmatmul.msk.f32.gmra.mxu2 %vm1288_vm1, %v4607_v63  ;;  %2309 = vmatpush.msrb.mxu3 %v2244_v57 }
 0x1b8   : > { %v1051_v3 = vsel %vm1026_vm2, %v1048_v38, %v1050_v55  ;;  %v1192_v4 = vsel %vm1167_vm4, %v1189_v42, %v1191_v0  ;;  %v4614_v6 = vld [vmem:[#allocation4 + $0x58] sm:$0xff]  ;;  %v848_v38 = vand.u32 15, %v573_v25  ;;  %v574_v25 = vadd.s32 120, %v4353_v40 }
 0x1b9   : > { %v1139_v7 = vsel %vm998_vm15, 0.0, %v1051_v3  ;;  %v1279_v8 = vsel %vm1158_vm0, 0.0, %v1192_v4  ;;  %v517_v9 = vpop.f32.mrf.mxu0  ;;  %v4616_v11 = vld [vmem:[#allocation5 + $0x50] sm:$0xff] }
 0x1ba   : > { %1321 = vst.msk [vmem:[#allocation4 + $0x60] sm:$0xff] %vm1288_vm1, %v1139_v7  ;;  %v518_v13 = vadd.f32 %v4351_v39, %v517_v9  ;;  %3386 = vmatmul.msk.f32.gmra.mxu1 %vm1288_vm1, %v4614_v6  ;;  %vm4651_vm3 = vcmp.eq.s32.totalorder %v848_v38, 0 }
 0x1bb   : > { %1340 = vst.msk [vmem:[#allocation5 + $0x58] sm:$0xff] %vm1288_vm1, %v1279_v8  ;;  %3417 = vmatmul.msk.f32.gmra.mxu3 %vm1288_vm1, %v4616_v11  ;;  %v2243_v8 = vld [vmem:[#allocation8 + $0xa0] sm:$0xff] }
 0x1bc   : > { %v551_v15 = vmax.f32 %v518_v13, 0.0  ;;  %3474 = vmatmul.msk.f32.gmra.mxu0 %vm1288_vm1, %v4531_v58  ;;  %2310 = vmatpush.msrb.mxu3 %v2243_v8 }
 0x1bd   : > { %v4627_v17 = vld [vmem:[#allocation3 + $0x60] sm:$0xff] }
 0x1be   : > { %v1052_v20 = vrot.slane %v551_v15, 7  ;;  %v1193_v21 = vrot.slane %v551_v15, 1  ;;  %1302 = vst.msk [vmem:[#allocation3 + $0x68] sm:$0xff] %vm1288_vm1, %v551_v15  ;;  %3403 = vmatmul.msk.f32.gmra.mxu2 %vm1288_vm1, %v4627_v17  ;;  %v2792_v15 = vld [vmem:[#allocation8 + $0x118] sm:$0xff] }
 0x1bf   : > { %2853 = vmatpush.msra.mxu2 %v2792_v15 }
 0x1c0   : > { %v1053_v27 = vsel %vm1026_vm2, %v1050_v55, %v1052_v20  ;;  %v1194_v29 = vsel %vm1167_vm4, %v1191_v0, %v1193_v21 }
 0x1c1   : > { %1322 = vst.msk [vmem:[#allocation4 + $0x68] sm:$0xff] %vm1288_vm1, %v1053_v27  ;;  %v520_v30 = vpop.f32.mrf.mxu0  ;;  %v4637_v33 = vld [vmem:[#allocation4 + $0x60] sm:$0xff]  ;;  %v575_v27 = vadd.s32 128, %v4353_v40 }
 0x1c2   : > { %1341 = vst.msk [vmem:[#allocation5 + $0x60] sm:$0xff] %vm1288_vm1, %v1194_v29  ;;  %v521_v34 = vadd.f32 %v4351_v39, %v520_v30  ;;  %3387 = vmatmul.msk.f32.gmra.mxu1 %vm1288_vm1, %v4637_v33  ;;  %v4643_v42 = vld [vmem:[#allocation5 + $0x58] sm:$0xff] }
 0x1c3   : > { %3418 = vmatmul.msk.f32.gmra.mxu3 %vm1288_vm1, %v4643_v42  ;;  %v862_v46 = vand.u32 15, %v575_v27  ;;  %v576_v27 = vadd.s32 136, %v4353_v40 }
 0x1c4   : > { %v552_v43 = vmax.f32 %v521_v34, 0.0  ;;  %3475 = vmatmul.msk.f32.gmra.mxu0 %vm1288_vm1, %v4553_v12 }
 0x1c5   : > { %v4649_v45 = vld [vmem:[#allocation3 + $0x68] sm:$0xff]  ;;  %vm1002_vm6 = vcmp.eq.s32.totalorder %v862_v46, 0 }
 0x1c6   : > { %v1054_v49 = vrot.slane %v552_v43, 7  ;;  %v1195_v56 = vrot.slane %v552_v43, 1  ;;  %1303 = vst.msk [vmem:[#allocation3 + $0x70] sm:$0xff] %vm1288_vm1, %v552_v43  ;;  %3404 = vmatmul.msk.f32.gmra.mxu2 %vm1288_vm1, %v4649_v45  ;;  %v855_v43 = vand.u32 15, %v574_v25  ;;  %v577_v25 = vadd.s32 144, %v4353_v40 }
 0x1c8   : > { %v1055_v60 = vsel %vm1026_vm2, %v1052_v20, %v1054_v49  ;;  %v1196_v61 = vsel %vm1167_vm4, %v1193_v21, %v1195_v56  ;;  %v4664_v55 = vld [vmem:[#allocation4 + $0x68] sm:$0xff]  ;;  %vm4705_vm7 = vcmp.eq.s32.totalorder %v855_v43, 15  ;;  %v876_v46 = vand.u32 15, %v577_v25 }
 0x1c9   : > { %v1141_v0 = vsel %vm4651_vm3, 0.0, %v1055_v60  ;;  %v1281_v3 = vsel %vm4655_vm5, 0.0, %v1196_v61  ;;  %v523_v4 = vpop.f32.mrf.mxu0  ;;  %v4670_v7 = vld [vmem:[#allocation5 + $0x60] sm:$0xff] }
 0x1ca   : > { %1323 = vst.msk [vmem:[#allocation4 + $0x70] sm:$0xff] %vm1288_vm1, %v1141_v0  ;;  %v524_v9 = vadd.f32 %v4351_v39, %v523_v4  ;;  %3388 = vmatmul.msk.f32.gmra.mxu1 %vm1288_vm1, %v4664_v55  ;;  %vm4754_vm9 = vcmp.eq.s32.totalorder %v876_v46, 0 }
 0x1cb   : > { %1342 = vst.msk [vmem:[#allocation5 + $0x68] sm:$0xff] %vm1288_vm1, %v1281_v3  ;;  %3419 = vmatmul.msk.f32.gmra.mxu3 %vm1288_vm1, %v4670_v7 }
 0x1cc   : > { %v553_v13 = vmax.f32 %v524_v9, 0.0  ;;  %3476 = vmatmul.msk.f32.gmra.mxu0 %vm1288_vm1, %v4572_v26 }
 0x1cd   : > { %v4681_v20 = vld [vmem:[#allocation3 + $0x70] sm:$0xff] }
 0x1ce   : > { %v1056_v21 = vrot.slane %v553_v13, 7  ;;  %v1197_v22 = vrot.slane %v553_v13, 1  ;;  %1304 = vst.msk [vmem:[#allocation3 + $0x78] sm:$0xff] %vm1288_vm1, %v553_v13  ;;  %3405 = vmatmul.msk.f32.gmra.mxu2 %vm1288_vm1, %v4681_v20 }
 0x1d0   : > { %v1057_v29 = vsel %vm1026_vm2, %v1054_v49, %v1056_v21  ;;  %v1198_v30 = vsel %vm1167_vm4, %v1195_v56, %v1197_v22 }
 0x1d1   : > { %1324 = vst.msk [vmem:[#allocation4 + $0x78] sm:$0xff] %vm1288_vm1, %v1057_v29  ;;  %v526_v34 = vpop.f32.mrf.mxu0  ;;  %v4691_v35 = vld [vmem:[#allocation4 + $0x70] sm:$0xff] }
 0x1d2   : > { %1343 = vst.msk [vmem:[#allocation5 + $0x70] sm:$0xff] %vm1288_vm1, %v1198_v30  ;;  %v527_v38 = vadd.f32 %v4351_v39, %v526_v34  ;;  %3389 = vmatmul.msk.f32.gmra.mxu1 %vm1288_vm1, %v4691_v35  ;;  %v4697_v47 = vld [vmem:[#allocation5 + $0x68] sm:$0xff]  ;;  %v644_v34 = vstv %s643_s30  ;;  %s5304_s30 = sld [smem:[#allocation38_spill]] }
 0x1d3   : > { %3420 = vmatmul.msk.f32.gmra.mxu3 %vm1288_vm1, %v4697_v47  ;;  %vm4744_vm8 = vcmp.eq.s32.totalorder %v644_v34, 1 }
 0x1d4   : > { %v554_v49 = vmax.f32 %v527_v38, 0.0  ;;  %3477 = vmatmul.msk.f32.gmra.mxu0 %vm1288_vm1, %v4595_v52 }
 0x1d5   : > { %v4703_v51 = vld [vmem:[#allocation3 + $0x78] sm:$0xff] }
 0x1d6   : > { %v1058_v56 = vrot.slane %v554_v49, 7  ;;  %v1199_v60 = vrot.slane %v554_v49, 1  ;;  %1305 = vst.msk [vmem:[#allocation3 + $0x80] sm:$0xff] %vm1288_vm1, %v554_v49  ;;  %3406 = vmatmul.msk.f32.gmra.mxu2 %vm1288_vm1, %v4703_v51 }
 0x1d8   : > { %v1059_v61 = vsel %vm1026_vm2, %v1056_v21, %v1058_v56  ;;  %v1200_v0 = vsel %vm1167_vm4, %v1197_v22, %v1199_v60  ;;  %v4714_v3 = vld [vmem:[#allocation4 + $0x78] sm:$0xff]  ;;  %p5306_p5 = scmp.ne.s32.totalorder %s5304_s30, 0 }
 0x1d9   : > { %v1143_v4 = vsel %vm1002_vm6, 0.0, %v1059_v61  ;;  %v1283_v8 = vsel %vm4705_vm7, 0.0, %v1200_v0  ;;  %v529_v9 = vpop.f32.mrf.mxu0  ;;  %v4719_v13 = vld [vmem:[#allocation5 + $0x70] sm:$0xff] }
 0x1da   : > { %1325 = vst.msk [vmem:[#allocation4 + $0x80] sm:$0xff] %vm1288_vm1, %v1143_v4  ;;  %v530_v14 = vadd.f32 %v4351_v39, %v529_v9  ;;  %3390 = vmatmul.msk.f32.gmra.mxu1 %vm1288_vm1, %v4714_v3  ;;  %p3896_p2 = pnand %p3895_p7, %p5306_p5 }
 0x1db   : > { %1344 = vst.msk [vmem:[#allocation5 + $0x78] sm:$0xff] %vm1288_vm1, %v1283_v8  ;;  %3421 = vmatmul.msk.f32.gmra.mxu3 %vm1288_vm1, %v4719_v13  ;;  %v578_v8 = vadd.s32 152, %v4353_v40 }
 0x1dc   : > { %v555_v15 = vmax.f32 %v530_v14, 0.0  ;;  %3478 = vmatmul.msk.f32.gmra.mxu0 %vm1288_vm1, %v4614_v6  ;;  %p3897_p3 = pneg %p3896_p2 }
 0x1dd   : > { %v883_v40 = vand.u32 15, %v578_v8 }
 0x1de   : > { %v1060_v21 = vrot.slane %v555_v15, 7  ;;  %v1201_v22 = vrot.slane %v555_v15, 1  ;;  %1306 = vst.msk [vmem:[#allocation3 + $0x88] sm:$0xff] %vm1288_vm1, %v555_v15  ;;  %3439 = vmatmul.msk.f32.vlgmr.msrb.gmra.mxu2 %vm1288_vm1, %v4399_v24  ;;  %p3902_p8 = pnand %p3901_p9, %p3897_p3 }
 0x1df   : > { %vm4785_vm11 = vcmp.eq.s32.totalorder %v883_v40, 15 }
 0x1e0   : > { %v1061_v29 = vsel %vm1026_vm2, %v1058_v56, %v1060_v21  ;;  %v1202_v30 = vsel %vm1167_vm4, %v1199_v60, %v1201_v22  ;;  %v869_v56 = vand.u32 15, %v576_v27 }
 0x1e1   : > { %1326 = vst.msk [vmem:[#allocation4 + $0x88] sm:$0xff] %vm1288_vm1, %v1061_v29  ;;  %v532_v38 = vpop.f32.mrf.mxu0  ;;  %v2609_v29 = vld [vmem:[#allocation8 + $0xf0] sm:$0xff] }
 0x1e2   : > { %1345 = vst.msk [vmem:[#allocation5 + $0x80] sm:$0xff] %vm1288_vm1, %v1202_v30  ;;  %v533_v43 = vadd.f32 %v4351_v39, %v532_v38  ;;  %v4740_v49 = vld [vmem:[#allocation5 + $0x78] sm:$0xff]  ;;  %3423 = vmatmul.msk.f32.vlgmr.msrb.gmra.mxu1 %vm1288_vm1, %v4409_v32  ;;  %vm4760_vm10 = vcmp.eq.s32.totalorder %v869_v56, 15 }
 0x1e3   : > { %3422 = vmatmul.msk.f32.gmra.mxu3 %vm1288_vm1, %v4740_v49  ;;  %2672 = vmatpush.msra.mxu1 %v2609_v29 }
 0x1e4   : > { %v556_v57 = vmax.f32 %v533_v43, 0.0  ;;  %3479 = vmatmul.msk.f32.gmra.mxu0 %vm1288_vm1, %v4637_v33 }
 0x1e6   : > { %v744_v60 = vsel %vm4744_vm8, 0.0, %v556_v57  ;;  %3440 = vmatmul.msk.f32.gmra.mxu2 %vm1288_vm1, %v4416_v41 }
 0x1e7   : > { %v1062_v32 = vrot.slane %v744_v60, 7  ;;  %v1203_v4 = vrot.slane %v744_v60, 1  ;;  %1307 = vst.msk [vmem:[#allocation3 + $0x90] sm:$0xff] %vm1288_vm1, %v744_v60 }
 0x1e9   : > { %v1063_v9 = vsel %vm1026_vm2, %v1060_v21, %v1062_v32  ;;  %v1204_v14 = vsel %vm1167_vm4, %v1201_v22, %v1203_v4  ;;  %v535_v15 = vpop.f32.mrf.mxu0  ;;  %v2791_v22 = vld [vmem:[#allocation8 + $0x110] sm:$0xff] }
 0x1ea   : > { %v1145_v25 = vsel %vm4754_vm9, 0.0, %v1063_v9  ;;  %v1285_v41 = vsel %vm4760_vm10, 0.0, %v1204_v14  ;;  %v536_v27 = vadd.f32 %v4351_v39, %v535_v15  ;;  %3424 = vmatmul.msk.f32.gmra.mxu1 %vm1288_vm1, %v4433_v48  ;;  %2854 = vmatpush.msra.mxu2 %v2791_v22 }
 0x1eb   : > { %1327 = vst.msk [vmem:[#allocation4 + $0x90] sm:$0xff] %vm1288_vm1, %v1145_v25  ;;  %3455 = vmatmul.msk.f32.vlgmr.msrb.gmra.mxu3 %vm1288_vm1, %v4439_v54 }
 0x1ec   : > { %1346 = vst.msk [vmem:[#allocation5 + $0x88] sm:$0xff] %vm1288_vm1, %v1285_v41  ;;  %v557_v21 = vmax.f32 %v536_v27, 0.0  ;;  %3480 = vmatmul.msk.f32.gmra.mxu0 %vm1288_vm1, %v4664_v55 }
 0x1ee   : > { %v745_v39 = vsel %vm4744_vm8, 0.0, %v557_v21  ;;  %3441 = vmatmul.msk.f32.gmra.mxu2 %vm1288_vm1, %v4451_v53 }
 0x1ef   : > { %v1064_v48 = vrot.slane %v745_v39, 7  ;;  %v1205_v54 = vrot.slane %v745_v39, 1  ;;  %1308 = vst.msk [vmem:[#allocation3 + $0x98] sm:$0xff] %vm1288_vm1, %v745_v39  ;;  %v1440_v34 = vpop.f32.mrf.mxu1 }
 0x1f0   : > { %1484 = vst.msk [vmem:[#allocation6 + $0x10] sm:$0xff] %vm1288_vm1, %v1440_v34 }
 0x1f1   : > { %v1065_v38 = vsel %vm1026_vm2, %v1062_v32, %v1064_v48  ;;  %v1206_v43 = vsel %vm1167_vm4, %v1203_v4, %v1205_v54  ;;  %v1227_v46 = vsel %vm1167_vm4, %v1205_v54, 0.0  ;;  %v1434_v24 = vpop.f32.mrf.mxu0  ;;  %v1590_v56 = vpop.f32.mrf.mxu2  ;;  %v2608_v48 = vld [vmem:[#allocation8 + $0xe8] sm:$0xff] }
 0x1f2   : > { %v1287_v53 = vsel %vm4785_vm11, 0.0, %v1227_v46  ;;  %1328 = vst.msk [vmem:[#allocation4 + $0x98] sm:$0xff] %vm1288_vm1, %v1065_v38  ;;  %3425 = vmatmul.msk.f32.gmra.mxu1 %vm1288_vm1, %v4461_v1 }
 0x1f3   : > { %1347 = vst.msk [vmem:[#allocation5 + $0x90] sm:$0xff] %vm1288_vm1, %v1206_v43  ;;  %3456 = vmatmul.msk.f32.gmra.mxu3 %vm1288_vm1, %v4467_v5  ;;  %2673 = vmatpush.msra.mxu1 %v2608_v48 }
 0x1f4   : > { %1348 = vst.msk [vmem:[#allocation5 + $0x98] sm:$0xff] %vm1288_vm1, %v1287_v53  ;;  %3481 = vmatmul.msk.f32.gmra.mxu0 %vm1288_vm1, %v4691_v35 }
 0x1f5   : > { %1482 = vst.msk [vmem:[#allocation6] sm:$0xff] %vm1288_vm1, %v1434_v24 }
 0x1f6   : > { %3442 = vmatmul.msk.f32.gmra.mxu2 %vm1288_vm1, %v4472_v10 }
 0x1f7   : > { %v1634_v57 = vld [vmem:[#allocation6 + $0x10] sm:$0xff]  ;;  %v1443_v60 = vpop.f32.mrf.mxu1 }
 0x1f8   : > { %v1650_v61 = vadd.f32 %v1634_v57, %v1590_v56  ;;  %1485 = vst.msk [vmem:[#allocation6 + $0x18] sm:$0xff] %vm1288_vm1, %v1443_v60 }
 0x1f9   : > { %v1437_v1 = vpop.f32.mrf.mxu0  ;;  %v1593_v32 = vpop.f32.mrf.mxu2 }
 0x1fa   : > { %1666 = vst.msk [vmem:[#allocation6 + $0x10] sm:$0xff] %vm1288_vm1, %v1650_v61  ;;  %3426 = vmatmul.msk.f32.gmra.mxu1 %vm1288_vm1, %v4487_v18 }
 0x1fb   : > { %1483 = vst.msk [vmem:[#allocation6 + $0x8] sm:$0xff] %vm1288_vm1, %v1437_v1  ;;  %3457 = vmatmul.msk.f32.gmra.mxu3 %vm1288_vm1, %v4493_v23 }
 0x1fc   : > { %3482 = vmatmul.msk.f32.gmra.mxu0 %vm1288_vm1, %v4714_v3  ;;  %v1632_v18 = vld [vmem:[#allocation6] sm:$0xff] }
 0x1fd   : > { %v1772_v5 = vpop.f32.mrf.mxu3 }
 0x1fe   : > { %3443 = vmatmul.msk.f32.gmra.mxu2 %vm1288_vm1, %v4503_v28  ;;  %v4825_v28 = vld [vmem:[#allocation4 + $0x80] sm:$0xff] }
 0x1ff   : > { %v1635_v10 = vld [vmem:[#allocation6 + $0x18] sm:$0xff]  ;;  %v1446_v0 = vpop.f32.mrf.mxu1 }
 0x200   : > { %v1651_v4 = vadd.f32 %v1635_v10, %v1593_v32  ;;  %1486 = vst.msk [vmem:[#allocation6 + $0x20] sm:$0xff] %vm1288_vm1, %v1446_v0 }
 0x201   : > { %v1816_v8 = vld [vmem:[#allocation6 + $0x10] sm:$0xff]  ;;  %v1584_v9 = vpop.f32.mrf.mxu0  ;;  %v1596_v14 = vpop.f32.mrf.mxu2 }
 0x202   : > { %1667 = vst.msk [vmem:[#allocation6 + $0x18] sm:$0xff] %vm1288_vm1, %v1651_v4  ;;  %v1832_v15 = vadd.f32 %v1816_v8, %v1772_v5  ;;  %v1648_v23 = vadd.f32 %v1632_v18, %v1584_v9  ;;  %3427 = vmatmul.msk.f32.gmra.mxu1 %vm1288_vm1, %v4513_v37  ;;  %v1633_v40 = vld [vmem:[#allocation6 + $0x8] sm:$0xff] }
 0x203   : > { %3458 = vmatmul.msk.f32.gmra.mxu3 %vm1288_vm1, %v4519_v44  ;;  %v4864_v18 = vld [vmem:[#allocation4 + $0x88] sm:$0xff] }
 0x204   : > { %1848 = vst.msk [vmem:[#allocation6 + $0x10] sm:$0xff] %vm1288_vm1, %v1832_v15  ;;  %3483 = vmatmul.msk.f32.gmra.mxu0 %vm1288_vm1, %v4825_v28 }
 0x205   : > { %1664 = vst.msk [vmem:[#allocation6] sm:$0xff] %vm1288_vm1, %v1648_v23 }
 0x206   : > { %v1775_v25 = vpop.f32.mrf.mxu3  ;;  %3444 = vmatmul.msk.f32.gmra.mxu2 %vm1288_vm1, %v4524_v50  ;;  %v2790_v50 = vld [vmem:[#allocation8 + $0x108] sm:$0xff] }
 0x207   : > { %v1636_v41 = vld [vmem:[#allocation6 + $0x20] sm:$0xff]  ;;  %v1449_v27 = vpop.f32.mrf.mxu1  ;;  %2855 = vmatpush.msra.mxu2 %v2790_v50 }
 0x208   : > { %v1652_v29 = vadd.f32 %v1636_v41, %v1596_v14  ;;  %1487 = vst.msk [vmem:[#allocation6 + $0x28] sm:$0xff] %vm1288_vm1, %v1449_v27 }
 0x209   : > { %v1817_v37 = vld [vmem:[#allocation6 + $0x18] sm:$0xff]  ;;  %v1587_v44 = vpop.f32.mrf.mxu0  ;;  %v1599_v21 = vpop.f32.mrf.mxu2 }
 0x20a   : > { %1668 = vst.msk [vmem:[#allocation6 + $0x20] sm:$0xff] %vm1288_vm1, %v1652_v29  ;;  %v1833_v22 = vadd.f32 %v1817_v37, %v1775_v25  ;;  %v1649_v39 = vadd.f32 %v1633_v40, %v1587_v44  ;;  %3428 = vmatmul.msk.f32.gmra.mxu1 %vm1288_vm1, %v4531_v58 }
 0x20b   : > { %3459 = vmatmul.msk.f32.gmra.mxu3 %vm1288_vm1, %v4533_v62 }
 0x20c   : > { %1849 = vst.msk [vmem:[#allocation6 + $0x18] sm:$0xff] %vm1288_vm1, %v1833_v22  ;;  %v1814_v62 = vld [vmem:[#allocation6] sm:$0xff]  ;;  %3484 = vmatmul.msk.f32.gmra.mxu0 %vm1288_vm1, %v4864_v18 }
 0x20d   : > { %1665 = vst.msk [vmem:[#allocation6 + $0x8] sm:$0xff] %vm1288_vm1, %v1649_v39 }
 0x20e   : > { %v1778_v30 = vpop.f32.mrf.mxu3  ;;  %3445 = vmatmul.msk.f32.gmra.mxu2 %vm1288_vm1, %v4543_v2 }
 0x20f   : > { %v1637_v54 = vld [vmem:[#allocation6 + $0x28] sm:$0xff]  ;;  %v1452_v34 = vpop.f32.mrf.mxu1 }
 0x210   : > { %v1653_v38 = vadd.f32 %v1637_v54, %v1599_v21  ;;  %1488 = vst.msk [vmem:[#allocation6 + $0x30] sm:$0xff] %vm1288_vm1, %v1452_v34 }
 0x211   : > { %v1818_v58 = vld [vmem:[#allocation6 + $0x20] sm:$0xff]  ;;  %v1602_v43 = vpop.f32.mrf.mxu2  ;;  %v1766_v46 = vpop.f32.mrf.mxu0 }
 0x212   : > { %1669 = vst.msk [vmem:[#allocation6 + $0x28] sm:$0xff] %vm1288_vm1, %v1653_v38  ;;  %v1834_v24 = vadd.f32 %v1818_v58, %v1778_v30  ;;  %v1830_v56 = vadd.f32 %v1814_v62, %v1766_v46  ;;  %3429 = vmatmul.msk.f32.gmra.mxu1 %vm1288_vm1, %v4553_v12 }
 0x213   : > { %3460 = vmatmul.msk.f32.gmra.mxu3 %vm1288_vm1, %v4559_v16 }
 0x214   : > { %1850 = vst.msk [vmem:[#allocation6 + $0x20] sm:$0xff] %vm1288_vm1, %v1834_v24  ;;  %v1815_v12 = vld [vmem:[#allocation6 + $0x8] sm:$0xff] }
 0x215   : > { %1846 = vst.msk [vmem:[#allocation6] sm:$0xff] %vm1288_vm1, %v1830_v56 }
 0x216   : > { %v1781_v2 = vpop.f32.mrf.mxu3  ;;  %3446 = vmatmul.msk.f32.gmra.mxu2 %vm1288_vm1, %v4565_v19 }
 0x217   : > { %v1638_v53 = vld [vmem:[#allocation6 + $0x30] sm:$0xff]  ;;  %v1455_v57 = vpop.f32.mrf.mxu1 }
 0x218   : > { %v1654_v60 = vadd.f32 %v1638_v53, %v1602_v43  ;;  %1489 = vst.msk [vmem:[#allocation6 + $0x38] sm:$0xff] %vm1288_vm1, %v1455_v57 }
 0x219   : > { %v1819_v61 = vld [vmem:[#allocation6 + $0x28] sm:$0xff]  ;;  %v1605_v1 = vpop.f32.mrf.mxu2  ;;  %v1769_v32 = vpop.f32.mrf.mxu0 }
 0x21a   : > { %1670 = vst.msk [vmem:[#allocation6 + $0x30] sm:$0xff] %vm1288_vm1, %v1654_v60  ;;  %v1835_v16 = vadd.f32 %v1819_v61, %v1781_v2  ;;  %v1831_v5 = vadd.f32 %v1815_v12, %v1769_v32  ;;  %3430 = vmatmul.msk.f32.gmra.mxu1 %vm1288_vm1, %v4572_v26 }
 0x21b   : > { %3461 = vmatmul.msk.f32.gmra.mxu3 %vm1288_vm1, %v4574_v31 }
 0x21c   : > { %1851 = vst.msk [vmem:[#allocation6 + $0x28] sm:$0xff] %vm1288_vm1, %v1835_v16 }
 0x21d   : > { %1847 = vst.msk [vmem:[#allocation6 + $0x8] sm:$0xff] %vm1288_vm1, %v1831_v5  ;;  %v4939_v5 = vld [vmem:[#allocation5 + $0x80] sm:$0xff] }
 0x21e   : > { %v1784_v19 = vpop.f32.mrf.mxu3  ;;  %3447 = vmatmul.msk.f32.gmra.mxu2 %vm1288_vm1, %v4585_v36 }
 0x21f   : > { %v1639_v10 = vld [vmem:[#allocation6 + $0x38] sm:$0xff]  ;;  %v1458_v0 = vpop.f32.mrf.mxu1 }
 0x220   : > { %v1655_v4 = vadd.f32 %v1639_v10, %v1605_v1  ;;  %1490 = vst.msk [vmem:[#allocation6 + $0x40] sm:$0xff] %vm1288_vm1, %v1458_v0  ;;  %v2772_v10 = vld [vmem:[#allocation5 + $0x20] sm:$0xff] }
 0x221   : > { %v1820_v8 = vld [vmem:[#allocation6 + $0x30] sm:$0xff]  ;;  %v1608_v9 = vpop.f32.mrf.mxu2 }
 0x222   : > { %1671 = vst.msk [vmem:[#allocation6 + $0x38] sm:$0xff] %vm1288_vm1, %v1655_v4  ;;  %v1836_v26 = vadd.f32 %v1820_v8, %v1784_v19  ;;  %3431 = vmatmul.msk.f32.gmra.mxu1 %vm1288_vm1, %v4595_v52  ;;  %v2423_v19 = vld [vmem:[#allocation4 + $0x98] sm:$0xff] }
 0x223   : > { %3462 = vmatmul.msk.f32.gmra.mxu3 %vm1288_vm1, %v4601_v59  ;;  %v2607_v59 = vld [vmem:[#allocation8 + $0xe0] sm:$0xff]  ;;  %v3009_v4 = vld [vmem:[%s5238_s5 + $0x18] sm:$0xff] }
 0x224   : > { %1852 = vst.msk [vmem:[#allocation6 + $0x30] sm:$0xff] %vm1288_vm1, %v1836_v26  ;;  %2674 = vmatpush.msra.mxu1 %v2607_v59  ;;  %3074 = vmatpush.msra.mxu3 %v3009_v4  ;;  %v2773_v59 = vld [vmem:[#allocation5 + $0x28] sm:$0xff] }
 0x226   : > { %v1787_v31 = vpop.f32.mrf.mxu3  ;;  %3448 = vmatmul.msk.f32.gmra.mxu2 %vm1288_vm1, %v4607_v63  ;;  %v2789_v63 = vld [vmem:[#allocation8 + $0x100] sm:$0xff] }
 0x227   : > { %v1640_v36 = vld [vmem:[#allocation6 + $0x40] sm:$0xff]  ;;  %v1461_v14 = vpop.f32.mrf.mxu1  ;;  %2856 = vmatpush.msra.mxu2 %v2789_v63 }
 0x228   : > { %v1656_v15 = vadd.f32 %v1640_v36, %v1608_v9  ;;  %1491 = vst.msk [vmem:[#allocation6 + $0x48] sm:$0xff] %vm1288_vm1, %v1461_v14 }
 0x229   : > { %v1821_v23 = vld [vmem:[#allocation6 + $0x38] sm:$0xff]  ;;  %v1611_v25 = vpop.f32.mrf.mxu2 }
 0x22a   : > { %1672 = vst.msk [vmem:[#allocation6 + $0x40] sm:$0xff] %vm1288_vm1, %v1656_v15  ;;  %v1837_v52 = vadd.f32 %v1821_v23, %v1787_v31  ;;  %3432 = vmatmul.msk.f32.gmra.mxu1 %vm1288_vm1, %v4614_v6  ;;  %v2590_v15 = vld [vmem:[#allocation3 + $0x20] sm:$0xff] }
 0x22b   : > { %3463 = vmatmul.msk.f32.gmra.mxu3 %vm1288_vm1, %v4616_v11 }
 0x22c   : > { %1853 = vst.msk [vmem:[#allocation6 + $0x38] sm:$0xff] %vm1288_vm1, %v1837_v52  ;;  %v2494_v52 = vpop.f32.mrf.mxu0 }
 0x22e   : > { %v1790_v41 = vpop.f32.mrf.mxu3  ;;  %3449 = vmatmul.msk.f32.gmra.mxu2 %vm1288_vm1, %v4627_v17 }
 0x22f   : > { %v1641_v27 = vld [vmem:[#allocation6 + $0x48] sm:$0xff]  ;;  %v1464_v29 = vpop.f32.mrf.mxu1 }
 0x230   : > { %v1657_v37 = vadd.f32 %v1641_v27, %v1611_v25  ;;  %1492 = vst.msk [vmem:[#allocation6 + $0x50] sm:$0xff] %vm1288_vm1, %v1464_v29  ;;  %v4950_v25 = vld [vmem:[#allocation5 + $0x88] sm:$0xff] }
 0x231   : > { %v1822_v44 = vld [vmem:[#allocation6 + $0x40] sm:$0xff]  ;;  %v1614_v6 = vpop.f32.mrf.mxu2  ;;  %v1997_v27 = vld [vmem:[#allocation6 + $0x8] sm:$0xff] }
 0x232   : > { %1673 = vst.msk [vmem:[#allocation6 + $0x48] sm:$0xff] %vm1288_vm1, %v1657_v37  ;;  %v1838_v40 = vadd.f32 %v1822_v44, %v1790_v41  ;;  %3433 = vmatmul.msk.f32.gmra.mxu1 %vm1288_vm1, %v4637_v33  ;;  %v2422_v33 = vld [vmem:[#allocation4 + $0x90] sm:$0xff] }
 0x233   : > { %3464 = vmatmul.msk.f32.gmra.mxu3 %vm1288_vm1, %v4643_v42  ;;  %3485 = vmatmul.msk.f32.gmra.mxu0 %vm1288_vm1, %v2422_v33 }
 0x234   : > { %1854 = vst.msk [vmem:[#allocation6 + $0x40] sm:$0xff] %vm1288_vm1, %v1838_v40 }
 0x236   : > { %v1793_v11 = vpop.f32.mrf.mxu3  ;;  %3450 = vmatmul.msk.f32.gmra.mxu2 %vm1288_vm1, %v4649_v45 }
 0x237   : > { %v1642_v17 = vld [vmem:[#allocation6 + $0x50] sm:$0xff]  ;;  %v1467_v21 = vpop.f32.mrf.mxu1 }
 0x238   : > { %v1658_v22 = vadd.f32 %v1642_v17, %v1614_v6  ;;  %1493 = vst.msk [vmem:[#allocation6 + $0x58] sm:$0xff] %vm1288_vm1, %v1467_v21  ;;  %v2591_v6 = vld [vmem:[#allocation3 + $0x28] sm:$0xff]  ;;  %v2497_v21 = vpop.f32.mrf.mxu0 }
 0x239   : > { %v1823_v39 = vld [vmem:[#allocation6 + $0x48] sm:$0xff]  ;;  %v1617_v48 = vpop.f32.mrf.mxu2 }
 0x23a   : > { %1674 = vst.msk [vmem:[#allocation6 + $0x50] sm:$0xff] %vm1288_vm1, %v1658_v22  ;;  %v1839_v50 = vadd.f32 %v1823_v39, %v1793_v11  ;;  %3434 = vmatmul.msk.f32.gmra.mxu1 %vm1288_vm1, %v4664_v55  ;;  %v2774_v22 = vld [vmem:[#allocation5 + $0x30] sm:$0xff] }
 0x23b   : > { %3465 = vmatmul.msk.f32.gmra.mxu3 %vm1288_vm1, %v4670_v7  ;;  %3486 = vmatmul.msk.f32.gmra.mxu0 %vm1288_vm1, %v2423_v19 }
 0x23c   : > { %1855 = vst.msk [vmem:[#allocation6 + $0x48] sm:$0xff] %vm1288_vm1, %v1839_v50  ;;  %v1998_v50 = vld [vmem:[#allocation6 + $0x10] sm:$0xff] }
 0x23e   : > { %v1796_v42 = vpop.f32.mrf.mxu3  ;;  %3451 = vmatmul.msk.f32.gmra.mxu2 %vm1288_vm1, %v4681_v20 }
 0x23f   : > { %v1643_v45 = vld [vmem:[#allocation6 + $0x58] sm:$0xff]  ;;  %v1470_v30 = vpop.f32.mrf.mxu1 }
 0x240   : > { %v1659_v54 = vadd.f32 %v1643_v45, %v1617_v48  ;;  %1494 = vst.msk [vmem:[#allocation6 + $0x60] sm:$0xff] %vm1288_vm1, %v1470_v30  ;;  %v2592_v30 = vld [vmem:[#allocation3 + $0x30] sm:$0xff] }
 0x241   : > { %v1824_v34 = vld [vmem:[#allocation6 + $0x50] sm:$0xff]  ;;  %v1620_v38 = vpop.f32.mrf.mxu2 }
 0x242   : > { %1675 = vst.msk [vmem:[#allocation6 + $0x58] sm:$0xff] %vm1288_vm1, %v1659_v54  ;;  %v1840_v55 = vadd.f32 %v1824_v34, %v1796_v42  ;;  %3435 = vmatmul.msk.f32.gmra.mxu1 %vm1288_vm1, %v4691_v35  ;;  %v4920_v35 = vld [vmem:[#allocation3 + $0x80] sm:$0xff] }
 0x243   : > { %3466 = vmatmul.msk.f32.gmra.mxu3 %vm1288_vm1, %v4697_v47 }
 0x244   : > { %1856 = vst.msk [vmem:[#allocation6 + $0x50] sm:$0xff] %vm1288_vm1, %v1840_v55  ;;  %v2775_v55 = vld [vmem:[#allocation5 + $0x38] sm:$0xff] }
 0x246   : > { %v1799_v7 = vpop.f32.mrf.mxu3  ;;  %3452 = vmatmul.msk.f32.gmra.mxu2 %vm1288_vm1, %v4703_v51 }
 0x247   : > { %v1644_v20 = vld [vmem:[#allocation6 + $0x60] sm:$0xff]  ;;  %v1473_v58 = vpop.f32.mrf.mxu1 }
 0x248   : > { %v1660_v43 = vadd.f32 %v1644_v20, %v1620_v38  ;;  %1495 = vst.msk [vmem:[#allocation6 + $0x68] sm:$0xff] %vm1288_vm1, %v1473_v58  ;;  %v2500_v20 = vpop.f32.mrf.mxu0 }
 0x249   : > { %v1825_v46 = vld [vmem:[#allocation6 + $0x58] sm:$0xff]  ;;  %v1623_v62 = vpop.f32.mrf.mxu2 }
 0x24a   : > { %1676 = vst.msk [vmem:[#allocation6 + $0x60] sm:$0xff] %vm1288_vm1, %v1660_v43  ;;  %v1841_v24 = vadd.f32 %v1825_v46, %v1799_v7  ;;  %3436 = vmatmul.msk.f32.gmra.mxu1 %vm1288_vm1, %v4714_v3  ;;  %v1999_v43 = vld [vmem:[#allocation6 + $0x18] sm:$0xff] }
 0x24b   : > { %3467 = vmatmul.msk.f32.gmra.mxu3 %vm1288_vm1, %v4719_v13  ;;  %v4930_v13 = vld [vmem:[#allocation3 + $0x88] sm:$0xff] }
 0x24c   : > { %1857 = vst.msk [vmem:[#allocation6 + $0x58] sm:$0xff] %vm1288_vm1, %v1841_v24 }
 0x24e   : > { %v1802_v47 = vpop.f32.mrf.mxu3  ;;  %3453 = vmatmul.msk.f32.gmra.mxu2 %vm1288_vm1, %v4920_v35 }
 0x24f   : > { %v1645_v51 = vld [vmem:[#allocation6 + $0x68] sm:$0xff]  ;;  %v1476_v56 = vpop.f32.mrf.mxu1 }
 0x250   : > { %v1661_v2 = vadd.f32 %v1645_v51, %v1623_v62  ;;  %1496 = vst.msk [vmem:[#allocation6 + $0x70] sm:$0xff] %vm1288_vm1, %v1476_v56 }
 0x251   : > { %v1826_v53 = vld [vmem:[#allocation6 + $0x60] sm:$0xff]  ;;  %v1626_v57 = vpop.f32.mrf.mxu2 }
 0x252   : > { %1677 = vst.msk [vmem:[#allocation6 + $0x68] sm:$0xff] %vm1288_vm1, %v1661_v2  ;;  %v1842_v3 = vadd.f32 %v1826_v53, %v1802_v47  ;;  %3437 = vmatmul.msk.f32.gmra.mxu1 %vm1288_vm1, %v4825_v28  ;;  %v2593_v47 = vld [vmem:[#allocation3 + $0x38] sm:$0xff]  ;;  %v2776_v53 = vld [vmem:[#allocation5 + $0x40] sm:$0xff] }
 0x253   : > { %3468 = vmatmul.msk.f32.gmra.mxu3 %vm1288_vm1, %v4740_v49 }
 0x254   : > { %1858 = vst.msk [vmem:[#allocation6 + $0x60] sm:$0xff] %vm1288_vm1, %v1842_v3  ;;  %v3008_v3 = vld [vmem:[%s5238_s5 + $0x10] sm:$0xff] }
 0x255   : > { %3075 = vmatpush.msra.mxu3 %v3008_v3 }
 0x256   : > { %v1805_v60 = vpop.f32.mrf.mxu3  ;;  %3454 = vmatmul.msk.f32.gmra.mxu2 %vm1288_vm1, %v4930_v13 }
 0x257   : > { %v1646_v61 = vld [vmem:[#allocation6 + $0x70] sm:$0xff]  ;;  %v1479_v1 = vpop.f32.mrf.mxu1 }
 0x258   : > { %v1662_v32 = vadd.f32 %v1646_v61, %v1626_v57  ;;  %1497 = vst.msk [vmem:[#allocation6 + $0x78] sm:$0xff] %vm1288_vm1, %v1479_v1  ;;  %v2000_v1 = vld [vmem:[#allocation6 + $0x20] sm:$0xff] }
 0x259   : > { %v1827_v12 = vld [vmem:[#allocation6 + $0x68] sm:$0xff]  ;;  %v1629_v16 = vpop.f32.mrf.mxu2 }
 0x25a   : > { %1678 = vst.msk [vmem:[#allocation6 + $0x70] sm:$0xff] %vm1288_vm1, %v1662_v32  ;;  %v1843_v28 = vadd.f32 %v1827_v12, %v1805_v60  ;;  %3438 = vmatmul.msk.f32.gmra.mxu1 %vm1288_vm1, %v4864_v18  ;;  %v1996_v18 = vld [vmem:[#allocation6] sm:$0xff] }
 0x25b   : > { %3469 = vmatmul.msk.f32.gmra.mxu3 %vm1288_vm1, %v4939_v5 }
 0x25c   : > { %1859 = vst.msk [vmem:[#allocation6 + $0x68] sm:$0xff] %vm1288_vm1, %v1843_v28 }
 0x25e   : > { %v1808_v0 = vpop.f32.mrf.mxu3  ;;  %3503 = vmatmul.msk.f32.vlgmr.msra.gmra.mxu2 %vm1288_vm1, %v2772_v10  ;;  %v2594_v10 = vld [vmem:[#allocation3 + $0x40] sm:$0xff] }
 0x25f   : > { %v1647_v8 = vld [vmem:[#allocation6 + $0x78] sm:$0xff]  ;;  %v1948_v9 = vpop.f32.mrf.mxu1 }
 0x260   : > { %v1663_v26 = vadd.f32 %v1647_v8, %v1629_v16  ;;  %v2012_v31 = vadd.f32 %v1996_v18, %v1948_v9  ;;  %v2503_v16 = vpop.f32.mrf.mxu0  ;;  %v2777_v9 = vld [vmem:[#allocation5 + $0x48] sm:$0xff] }
 0x261   : > { %v1828_v36 = vld [vmem:[#allocation6 + $0x70] sm:$0xff]  ;;  %v2130_v14 = vpop.f32.mrf.mxu2 }
 0x262   : > { %1679 = vst.msk [vmem:[#allocation6 + $0x78] sm:$0xff] %vm1288_vm1, %v1663_v26  ;;  %v1844_v23 = vadd.f32 %v1828_v36, %v1808_v0  ;;  %3487 = vmatmul.msk.f32.vlgmr.msra.gmra.mxu1 %vm1288_vm1, %v2590_v15 }
 0x263   : > { %2028 = vst.msk [vmem:[#allocation6] sm:$0xff] %vm1288_vm1, %v2012_v31  ;;  %3470 = vmatmul.msk.f32.gmra.mxu3 %vm1288_vm1, %v4950_v25 }
 0x264   : > { %1860 = vst.msk [vmem:[#allocation6 + $0x70] sm:$0xff] %vm1288_vm1, %v1844_v23 }
 0x266   : > { %v1811_v63 = vpop.f32.mrf.mxu3  ;;  %3504 = vmatmul.msk.f32.gmra.mxu2 %vm1288_vm1, %v2773_v59  ;;  %v2595_v59 = vld [vmem:[#allocation3 + $0x48] sm:$0xff] }
 0x267   : > { %v1951_v41 = vpop.f32.mrf.mxu1 }
 0x268   : > { %v2013_v29 = vadd.f32 %v1997_v27, %v1951_v41  ;;  %v2506_v41 = vpop.f32.mrf.mxu0 }
 0x269   : > { %v1829_v37 = vld [vmem:[#allocation6 + $0x78] sm:$0xff]  ;;  %v2133_v44 = vpop.f32.mrf.mxu2 }
 0x26a   : > { %v2178_v40 = vld [vmem:[#allocation6] sm:$0xff]  ;;  %v1845_v11 = vadd.f32 %v1829_v37, %v1811_v63  ;;  %2029 = vst.msk [vmem:[#allocation6 + $0x8] sm:$0xff] %vm1288_vm1, %v2013_v29  ;;  %3488 = vmatmul.msk.f32.gmra.mxu1 %vm1288_vm1, %v2591_v6  ;;  %v2778_v37 = vld [vmem:[#allocation5 + $0x50] sm:$0xff] }
 0x26b   : > { %v2194_v17 = vadd.f32 %v2178_v40, %v2130_v14  ;;  %v2001_v14 = vld [vmem:[#allocation6 + $0x28] sm:$0xff] }
 0x26c   : > { %1861 = vst.msk [vmem:[#allocation6 + $0x78] sm:$0xff] %vm1288_vm1, %v1845_v11 }
 0x26d   : > { %2210 = vst.msk [vmem:[#allocation6] sm:$0xff] %vm1288_vm1, %v2194_v17  ;;  %v2002_v17 = vld [vmem:[#allocation6 + $0x30] sm:$0xff] }
 0x26e   : > { %v2312_v39 = vpop.f32.mrf.mxu3  ;;  %3505 = vmatmul.msk.f32.gmra.mxu2 %vm1288_vm1, %v2774_v22 }
 0x26f   : > { %v1954_v48 = vpop.f32.mrf.mxu1 }
 0x270   : > { %v2014_v33 = vadd.f32 %v1998_v50, %v1954_v48  ;;  %v2596_v48 = vld [vmem:[#allocation3 + $0x50] sm:$0xff] }
 0x271   : > { %v2179_v42 = vld [vmem:[#allocation6 + $0x8] sm:$0xff]  ;;  %v2136_v45 = vpop.f32.mrf.mxu2 }
 0x272   : > { %v2195_v54 = vadd.f32 %v2179_v42, %v2133_v44  ;;  %2030 = vst.msk [vmem:[#allocation6 + $0x10] sm:$0xff] %vm1288_vm1, %v2014_v33  ;;  %3489 = vmatmul.msk.f32.gmra.mxu1 %vm1288_vm1, %v2592_v30  ;;  %v2779_v30 = vld [vmem:[#allocation5 + $0x58] sm:$0xff] }
 0x274   : > { %2211 = vst.msk [vmem:[#allocation6 + $0x8] sm:$0xff] %vm1288_vm1, %v2195_v54  ;;  %v2360_v34 = vld [vmem:[#allocation6] sm:$0xff] }
 0x275   : > { %v2376_v38 = vadd.f32 %v2360_v34, %v2312_v39 }
 0x276   : > { %v2315_v7 = vpop.f32.mrf.mxu3  ;;  %3506 = vmatmul.msk.f32.gmra.mxu2 %vm1288_vm1, %v2775_v55 }
 0x277   : > { %2392 = vst.msk [vmem:[#allocation6] sm:$0xff] %vm1288_vm1, %v2376_v38  ;;  %v1957_v58 = vpop.f32.mrf.mxu1 }
 0x278   : > { %v2015_v46 = vadd.f32 %v1999_v43, %v1957_v58 }
 0x279   : > { %v2180_v62 = vld [vmem:[#allocation6 + $0x10] sm:$0xff]  ;;  %v2139_v24 = vpop.f32.mrf.mxu2 }
 0x27a   : > { %v2196_v51 = vadd.f32 %v2180_v62, %v2136_v45  ;;  %2031 = vst.msk [vmem:[#allocation6 + $0x18] sm:$0xff] %vm1288_vm1, %v2015_v46  ;;  %3490 = vmatmul.msk.f32.gmra.mxu1 %vm1288_vm1, %v2593_v47  ;;  %v2509_v45 = vpop.f32.mrf.mxu0  ;;  %v2597_v46 = vld [vmem:[#allocation3 + $0x58] sm:$0xff] }
 0x27b   : > { %v2361_v56 = vld [vmem:[#allocation6 + $0x8] sm:$0xff] }
 0x27c   : > { %2212 = vst.msk [vmem:[#allocation6 + $0x10] sm:$0xff] %vm1288_vm1, %v2196_v51  ;;  %v2377_v2 = vadd.f32 %v2361_v56, %v2315_v7  ;;  %v2003_v7 = vld [vmem:[#allocation6 + $0x38] sm:$0xff]  ;;  %v2780_v51 = vld [vmem:[#allocation5 + $0x60] sm:$0xff] }
 0x27e   : > { %2393 = vst.msk [vmem:[#allocation6 + $0x8] sm:$0xff] %vm1288_vm1, %v2377_v2  ;;  %v2318_v57 = vpop.f32.mrf.mxu3  ;;  %3507 = vmatmul.msk.f32.gmra.mxu2 %vm1288_vm1, %v2776_v53  ;;  %v2542_v60 = vld [vmem:[#allocation6] sm:$0xff]  ;;  %v3007_v53 = vld [vmem:[%s5238_s5 + $0x8] sm:$0xff] }
 0x27f   : > { %v1960_v61 = vpop.f32.mrf.mxu1  ;;  %v2558_v32 = vadd.f32 %v2542_v60, %v2494_v52  ;;  %3076 = vmatpush.msra.mxu3 %v3007_v53 }
 0x280   : > { %v2016_v12 = vadd.f32 %v2000_v1, %v1960_v61  ;;  %v2004_v61 = vld [vmem:[#allocation6 + $0x40] sm:$0xff] }
 0x281   : > { %v2181_v28 = vld [vmem:[#allocation6 + $0x18] sm:$0xff]  ;;  %v2142_v19 = vpop.f32.mrf.mxu2  ;;  %2574 = vst.msk [vmem:[#allocation6] sm:$0xff] %vm1288_vm1, %v2558_v32 }
 0x282   : > { %v2197_v0 = vadd.f32 %v2181_v28, %v2139_v24  ;;  %2032 = vst.msk [vmem:[#allocation6 + $0x20] sm:$0xff] %vm1288_vm1, %v2016_v12  ;;  %3491 = vmatmul.msk.f32.gmra.mxu1 %vm1288_vm1, %v2594_v10  ;;  %v2512_v3 = vpop.f32.mrf.mxu0 }
 0x283   : > { %v2362_v4 = vld [vmem:[#allocation6 + $0x10] sm:$0xff] }
 0x284   : > { %2213 = vst.msk [vmem:[#allocation6 + $0x18] sm:$0xff] %vm1288_vm1, %v2197_v0  ;;  %v2378_v8 = vadd.f32 %v2362_v4, %v2318_v57  ;;  %v2781_v0 = vld [vmem:[#allocation5 + $0x68] sm:$0xff] }
 0x285   : > { %v2543_v18 = vld [vmem:[#allocation6 + $0x8] sm:$0xff] }
 0x286   : > { %2394 = vst.msk [vmem:[#allocation6 + $0x10] sm:$0xff] %vm1288_vm1, %v2378_v8  ;;  %v2321_v26 = vpop.f32.mrf.mxu3  ;;  %3508 = vmatmul.msk.f32.gmra.mxu2 %vm1288_vm1, %v2777_v9  ;;  %v2559_v31 = vadd.f32 %v2543_v18, %v2497_v21 }
 0x287   : > { %v1963_v36 = vpop.f32.mrf.mxu1 }
 0x288   : > { %v2017_v15 = vadd.f32 %v2001_v14, %v1963_v36  ;;  %2575 = vst.msk [vmem:[#allocation6 + $0x8] sm:$0xff] %vm1288_vm1, %v2559_v31 }
 0x289   : > { %v2182_v23 = vld [vmem:[#allocation6 + $0x20] sm:$0xff]  ;;  %v2145_v52 = vpop.f32.mrf.mxu2 }
 0x28a   : > { %v2198_v63 = vadd.f32 %v2182_v23, %v2142_v19  ;;  %2033 = vst.msk [vmem:[#allocation6 + $0x28] sm:$0xff] %vm1288_vm1, %v2017_v15  ;;  %3492 = vmatmul.msk.f32.gmra.mxu1 %vm1288_vm1, %v2595_v59  ;;  %v2515_v36 = vpop.f32.mrf.mxu0  ;;  %v2599_v23 = vld [vmem:[#allocation3 + $0x68] sm:$0xff] }
 0x28b   : > { %v2363_v27 = vld [vmem:[#allocation6 + $0x18] sm:$0xff] }
 0x28c   : > { %2214 = vst.msk [vmem:[#allocation6 + $0x20] sm:$0xff] %vm1288_vm1, %v2198_v63  ;;  %v2379_v29 = vadd.f32 %v2363_v27, %v2321_v26  ;;  %v2005_v26 = vld [vmem:[#allocation6 + $0x48] sm:$0xff] }
 0x28d   : > { %v2544_v44 = vld [vmem:[#allocation6 + $0x10] sm:$0xff] }
 0x28e   : > { %2395 = vst.msk [vmem:[#allocation6 + $0x18] sm:$0xff] %vm1288_vm1, %v2379_v29  ;;  %v2324_v6 = vpop.f32.mrf.mxu3  ;;  %3509 = vmatmul.msk.f32.gmra.mxu2 %vm1288_vm1, %v2778_v37  ;;  %v2560_v40 = vadd.f32 %v2544_v44, %v2500_v20 }
 0x28f   : > { %v1966_v11 = vpop.f32.mrf.mxu1 }
 0x290   : > { %v2018_v21 = vadd.f32 %v2002_v17, %v1966_v11  ;;  %2576 = vst.msk [vmem:[#allocation6 + $0x10] sm:$0xff] %vm1288_vm1, %v2560_v40 }
 0x291   : > { %v2183_v22 = vld [vmem:[#allocation6 + $0x28] sm:$0xff]  ;;  %v2148_v39 = vpop.f32.mrf.mxu2 }
 0x292   : > { %v2199_v50 = vadd.f32 %v2183_v22, %v2145_v52  ;;  %2034 = vst.msk [vmem:[#allocation6 + $0x30] sm:$0xff] %vm1288_vm1, %v2018_v21  ;;  %3493 = vmatmul.msk.f32.gmra.mxu1 %vm1288_vm1, %v2596_v48  ;;  %v2600_v21 = vld [vmem:[#allocation3 + $0x70] sm:$0xff] }
 0x293   : > { %v2364_v33 = vld [vmem:[#allocation6 + $0x20] sm:$0xff] }
 0x294   : > { %2215 = vst.msk [vmem:[#allocation6 + $0x28] sm:$0xff] %vm1288_vm1, %v2199_v50  ;;  %v2380_v42 = vadd.f32 %v2364_v33, %v2324_v6  ;;  %v2006_v6 = vld [vmem:[#allocation6 + $0x50] sm:$0xff] }
 0x295   : > { %v2545_v54 = vld [vmem:[#allocation6 + $0x18] sm:$0xff] }
 0x296   : > { %2396 = vst.msk [vmem:[#allocation6 + $0x20] sm:$0xff] %vm1288_vm1, %v2380_v42  ;;  %v2327_v34 = vpop.f32.mrf.mxu3  ;;  %3510 = vmatmul.msk.f32.gmra.mxu2 %vm1288_vm1, %v2779_v30  ;;  %v2561_v38 = vadd.f32 %v2545_v54, %v2503_v16  ;;  %v2598_v16 = vld [vmem:[#allocation3 + $0x60] sm:$0xff]  ;;  %v2007_v54 = vld [vmem:[#allocation6 + $0x58] sm:$0xff] }
 0x297   : > { %v1969_v55 = vpop.f32.mrf.mxu1 }
 0x298   : > { %v2019_v20 = vadd.f32 %v2003_v7, %v1969_v55  ;;  %2577 = vst.msk [vmem:[#allocation6 + $0x18] sm:$0xff] %vm1288_vm1, %v2561_v38  ;;  %v2601_v7 = vld [vmem:[#allocation3 + $0x78] sm:$0xff] }
 0x299   : > { %v2184_v58 = vld [vmem:[#allocation6 + $0x30] sm:$0xff]  ;;  %v2151_v43 = vpop.f32.mrf.mxu2 }
 0x29a   : > { %v2200_v62 = vadd.f32 %v2184_v58, %v2148_v39  ;;  %2035 = vst.msk [vmem:[#allocation6 + $0x38] sm:$0xff] %vm1288_vm1, %v2019_v20  ;;  %3494 = vmatmul.msk.f32.gmra.mxu1 %vm1288_vm1, %v2597_v46  ;;  %v2518_v39 = vpop.f32.mrf.mxu0 }
 0x29b   : > { %v2365_v24 = vld [vmem:[#allocation6 + $0x28] sm:$0xff] }
 0x29c   : > { %2216 = vst.msk [vmem:[#allocation6 + $0x30] sm:$0xff] %vm1288_vm1, %v2200_v62  ;;  %v2381_v47 = vadd.f32 %v2365_v24, %v2327_v34  ;;  %v3006_v24 = vld [vmem:[%s5238_s5] sm:$0xff] }
 0x29d   : > { %v2546_v56 = vld [vmem:[#allocation6 + $0x20] sm:$0xff]  ;;  %3077 = vmatpush.msra.mxu3 %v3006_v24 }
 0x29e   : > { %2397 = vst.msk [vmem:[#allocation6 + $0x28] sm:$0xff] %vm1288_vm1, %v2381_v47  ;;  %v2330_v2 = vpop.f32.mrf.mxu3  ;;  %3511 = vmatmul.msk.f32.gmra.mxu2 %vm1288_vm1, %v2780_v51  ;;  %v2562_v57 = vadd.f32 %v2546_v56, %v2506_v41  ;;  %v2782_v41 = vld [vmem:[#allocation5 + $0x70] sm:$0xff]  ;;  %v2008_v56 = vld [vmem:[#allocation6 + $0x60] sm:$0xff] }
 0x29f   : > { %v1972_v60 = vpop.f32.mrf.mxu1 }
 0x2a0   : > { %v2020_v1 = vadd.f32 %v2004_v61, %v1972_v60  ;;  %2578 = vst.msk [vmem:[#allocation6 + $0x20] sm:$0xff] %vm1288_vm1, %v2562_v57 }
 0x2a1   : > { %v2185_v32 = vld [vmem:[#allocation6 + $0x38] sm:$0xff]  ;;  %v2154_v12 = vpop.f32.mrf.mxu2 }
 0x2a2   : > { %v2201_v28 = vadd.f32 %v2185_v32, %v2151_v43  ;;  %2036 = vst.msk [vmem:[#allocation6 + $0x40] sm:$0xff] %vm1288_vm1, %v2020_v1  ;;  %3495 = vmatmul.msk.f32.gmra.mxu1 %vm1288_vm1, %v2598_v16  ;;  %v2521_v46 = vpop.f32.mrf.mxu0 }
 0x2a3   : > { %v2366_v19 = vld [vmem:[#allocation6 + $0x30] sm:$0xff] }
 0x2a4   : > { %2217 = vst.msk [vmem:[#allocation6 + $0x38] sm:$0xff] %vm1288_vm1, %v2201_v28  ;;  %v2382_v10 = vadd.f32 %v2366_v19, %v2330_v2  ;;  %v2009_v28 = vld [vmem:[#allocation6 + $0x68] sm:$0xff] }
 0x2a5   : > { %v2547_v4 = vld [vmem:[#allocation6 + $0x28] sm:$0xff] }
 0x2a6   : > { %2398 = vst.msk [vmem:[#allocation6 + $0x30] sm:$0xff] %vm1288_vm1, %v2382_v10  ;;  %v2333_v8 = vpop.f32.mrf.mxu3  ;;  %3512 = vmatmul.msk.f32.gmra.mxu2 %vm1288_vm1, %v2781_v0  ;;  %v2563_v9 = vadd.f32 %v2547_v4, %v2509_v45 }
 0x2a7   : > { %v1975_v18 = vpop.f32.mrf.mxu1 }
 0x2a8   : > { %v2021_v31 = vadd.f32 %v2005_v26, %v1975_v18  ;;  %2579 = vst.msk [vmem:[#allocation6 + $0x28] sm:$0xff] %vm1288_vm1, %v2563_v9 }
 0x2a9   : > { %v2186_v14 = vld [vmem:[#allocation6 + $0x40] sm:$0xff]  ;;  %v2157_v15 = vpop.f32.mrf.mxu2 }
 0x2aa   : > { %v2202_v52 = vadd.f32 %v2186_v14, %v2154_v12  ;;  %2037 = vst.msk [vmem:[#allocation6 + $0x48] sm:$0xff] %vm1288_vm1, %v2021_v31  ;;  %3496 = vmatmul.msk.f32.gmra.mxu1 %vm1288_vm1, %v2599_v23  ;;  %v2524_v12 = vpop.f32.mrf.mxu0 }
 0x2ab   : > { %v2367_v59 = vld [vmem:[#allocation6 + $0x38] sm:$0xff] }
 0x2ac   : > { %2218 = vst.msk [vmem:[#allocation6 + $0x40] sm:$0xff] %vm1288_vm1, %v2202_v52  ;;  %v2383_v63 = vadd.f32 %v2367_v59, %v2333_v8  ;;  %v2604_v52 = vld [vmem:[#allocation3 + $0x90] sm:$0xff] }
 0x2ad   : > { %v2548_v27 = vld [vmem:[#allocation6 + $0x30] sm:$0xff] }
 0x2ae   : > { %2399 = vst.msk [vmem:[#allocation6 + $0x38] sm:$0xff] %vm1288_vm1, %v2383_v63  ;;  %v2336_v29 = vpop.f32.mrf.mxu3  ;;  %3513 = vmatmul.msk.f32.gmra.mxu2 %vm1288_vm1, %v2782_v41  ;;  %v2564_v37 = vadd.f32 %v2548_v27, %v2512_v3  ;;  %v2787_v27 = vld [vmem:[#allocation5 + $0x98] sm:$0xff] }
 0x2af   : > { %v1978_v44 = vpop.f32.mrf.mxu1 }
 0x2b0   : > { %v2022_v40 = vadd.f32 %v2006_v6, %v1978_v44  ;;  %2580 = vst.msk [vmem:[#allocation6 + $0x30] sm:$0xff] %vm1288_vm1, %v2564_v37 }
 0x2b1   : > { %v2187_v11 = vld [vmem:[#allocation6 + $0x48] sm:$0xff]  ;;  %v2160_v17 = vpop.f32.mrf.mxu2 }
 0x2b2   : > { %v2203_v22 = vadd.f32 %v2187_v11, %v2157_v15  ;;  %2038 = vst.msk [vmem:[#allocation6 + $0x50] sm:$0xff] %vm1288_vm1, %v2022_v40  ;;  %3497 = vmatmul.msk.f32.gmra.mxu1 %vm1288_vm1, %v2600_v21  ;;  %v2527_v15 = vpop.f32.mrf.mxu0  ;;  %v2011_v40 = vld [vmem:[#allocation6 + $0x78] sm:$0xff] }
 0x2b3   : > { %v2368_v48 = vld [vmem:[#allocation6 + $0x40] sm:$0xff] }
 0x2b4   : > { %2219 = vst.msk [vmem:[#allocation6 + $0x48] sm:$0xff] %vm1288_vm1, %v2203_v22  ;;  %v2384_v50 = vadd.f32 %v2368_v48, %v2336_v29  ;;  %v2605_v22 = vld [vmem:[#allocation3 + $0x98] sm:$0xff] }
 0x2b5   : > { %v2549_v33 = vld [vmem:[#allocation6 + $0x38] sm:$0xff] }
 0x2b6   : > { %2400 = vst.msk [vmem:[#allocation6 + $0x40] sm:$0xff] %vm1288_vm1, %v2384_v50  ;;  %v2339_v42 = vpop.f32.mrf.mxu3  ;;  %3514 = vmatmul.msk.f32.gmra.mxu2 %vm1288_vm1, %v4740_v49  ;;  %v2565_v45 = vadd.f32 %v2549_v33, %v2515_v36  ;;  %v2010_v36 = vld [vmem:[#allocation6 + $0x70] sm:$0xff] }
 0x2b7   : > { %v1981_v30 = vpop.f32.mrf.mxu1 }
 0x2b8   : > { %v2023_v34 = vadd.f32 %v2007_v54, %v1981_v30  ;;  %2581 = vst.msk [vmem:[#allocation6 + $0x38] sm:$0xff] %vm1288_vm1, %v2565_v45  ;;  %v2724_v54 = vld [vmem:[#allocation6] sm:$0xff] }
 0x2b9   : > { %v2188_v38 = vld [vmem:[#allocation6 + $0x50] sm:$0xff]  ;;  %v2163_v55 = vpop.f32.mrf.mxu2 }
 0x2ba   : > { %v2204_v20 = vadd.f32 %v2188_v38, %v2160_v17  ;;  %2039 = vst.msk [vmem:[#allocation6 + $0x58] sm:$0xff] %vm1288_vm1, %v2023_v34  ;;  %3498 = vmatmul.msk.f32.gmra.mxu1 %vm1288_vm1, %v2601_v7  ;;  %v2530_v48 = vpop.f32.mrf.mxu0 }
 0x2bb   : > { %v2369_v58 = vld [vmem:[#allocation6 + $0x48] sm:$0xff] }
 0x2bc   : > { %2220 = vst.msk [vmem:[#allocation6 + $0x50] sm:$0xff] %vm1288_vm1, %v2204_v20  ;;  %v2385_v43 = vadd.f32 %v2369_v58, %v2339_v42 }
 0x2bd   : > { %v2550_v49 = vld [vmem:[#allocation6 + $0x40] sm:$0xff] }
 0x2be   : > { %2401 = vst.msk [vmem:[#allocation6 + $0x48] sm:$0xff] %vm1288_vm1, %v2385_v43  ;;  %v2342_v62 = vpop.f32.mrf.mxu3  ;;  %3515 = vmatmul.msk.f32.gmra.mxu2 %vm1288_vm1, %v4939_v5  ;;  %v2566_v47 = vadd.f32 %v2550_v49, %v2518_v39 }
 0x2bf   : > { %v1984_v51 = vpop.f32.mrf.mxu1 }
 0x2c0   : > { %v2024_v2 = vadd.f32 %v2008_v56, %v1984_v51  ;;  %2582 = vst.msk [vmem:[#allocation6 + $0x40] sm:$0xff] %vm1288_vm1, %v2566_v47  ;;  %v2725_v47 = vld [vmem:[#allocation6 + $0x8] sm:$0xff] }
 0x2c1   : > { %v2189_v53 = vld [vmem:[#allocation6 + $0x58] sm:$0xff]  ;;  %v2166_v57 = vpop.f32.mrf.mxu2 }
 0x2c2   : > { %v2205_v3 = vadd.f32 %v2189_v53, %v2163_v55  ;;  %2040 = vst.msk [vmem:[#allocation6 + $0x60] sm:$0xff] %vm1288_vm1, %v2024_v2  ;;  %3499 = vmatmul.msk.f32.gmra.mxu1 %vm1288_vm1, %v4920_v35  ;;  %v2533_v58 = vpop.f32.mrf.mxu0 }
 0x2c3   : > { %v2370_v5 = vld [vmem:[#allocation6 + $0x50] sm:$0xff] }
 0x2c4   : > { %2221 = vst.msk [vmem:[#allocation6 + $0x58] sm:$0xff] %vm1288_vm1, %v2205_v3  ;;  %v2386_v60 = vadd.f32 %v2370_v5, %v2342_v62 }
 0x2c5   : > { %v2551_v61 = vld [vmem:[#allocation6 + $0x48] sm:$0xff] }
 0x2c6   : > { %2402 = vst.msk [vmem:[#allocation6 + $0x50] sm:$0xff] %vm1288_vm1, %v2386_v60  ;;  %v2345_v1 = vpop.f32.mrf.mxu3  ;;  %3516 = vmatmul.msk.f32.gmra.mxu2 %vm1288_vm1, %v4950_v25  ;;  %v2567_v32 = vadd.f32 %v2551_v61, %v2521_v46  ;;  %v2786_v25 = vld [vmem:[#allocation5 + $0x90] sm:$0xff] }
 0x2c7   : > { %v1987_v16 = vpop.f32.mrf.mxu1 }
 0x2c8   : > { %v2025_v19 = vadd.f32 %v2009_v28, %v1987_v16  ;;  %2583 = vst.msk [vmem:[#allocation6 + $0x48] sm:$0xff] %vm1288_vm1, %v2567_v32  ;;  %v5069_v28 = vld [vmem:[%s5237_s4] ss:$0 sm:$0xff] }
 0x2c9   : > { %v2190_v10 = vld [vmem:[#allocation6 + $0x60] sm:$0xff]  ;;  %v2169_v35 = vpop.f32.mrf.mxu2 }
 0x2ca   : > { %v2206_v0 = vadd.f32 %v2190_v10, %v2166_v57  ;;  %2041 = vst.msk [vmem:[#allocation6 + $0x68] sm:$0xff] %vm1288_vm1, %v2025_v19  ;;  %3500 = vmatmul.msk.f32.gmra.mxu1 %vm1288_vm1, %v4930_v13  ;;  %v2536_v57 = vpop.f32.mrf.mxu0 }
 0x2cb   : > { %v2371_v4 = vld [vmem:[#allocation6 + $0x58] sm:$0xff] }
 0x2cc   : > { %2222 = vst.msk [vmem:[#allocation6 + $0x60] sm:$0xff] %vm1288_vm1, %v2206_v0  ;;  %v2387_v8 = vadd.f32 %v2371_v4, %v2345_v1 }
 0x2cd   : > { %v2552_v9 = vld [vmem:[#allocation6 + $0x50] sm:$0xff] }
 0x2ce   : > { %2403 = vst.msk [vmem:[#allocation6 + $0x58] sm:$0xff] %vm1288_vm1, %v2387_v8  ;;  %v2348_v18 = vpop.f32.mrf.mxu3  ;;  %3517 = vmatmul.msk.f32.gmra.mxu2 %vm1288_vm1, %v2786_v25  ;;  %v2568_v26 = vadd.f32 %v2552_v9, %v2524_v12  ;;  %v2726_v12 = vld [vmem:[#allocation6 + $0x10] sm:$0xff] }
 0x2cf   : > { %v1990_v31 = vpop.f32.mrf.mxu1 }
 0x2d0   : > { %v2026_v14 = vadd.f32 %v2010_v36, %v1990_v31  ;;  %2584 = vst.msk [vmem:[#allocation6 + $0x50] sm:$0xff] %vm1288_vm1, %v2568_v26  ;;  %v2727_v31 = vld [vmem:[#allocation6 + $0x18] sm:$0xff] }
 0x2d1   : > { %v2191_v23 = vld [vmem:[#allocation6 + $0x68] sm:$0xff]  ;;  %v2172_v13 = vpop.f32.mrf.mxu2 }
 0x2d2   : > { %v2207_v59 = vadd.f32 %v2191_v23, %v2169_v35  ;;  %2042 = vst.msk [vmem:[#allocation6 + $0x70] sm:$0xff] %vm1288_vm1, %v2026_v14  ;;  %3501 = vmatmul.msk.f32.gmra.mxu1 %vm1288_vm1, %v2604_v52  ;;  %v2539_v0 = vpop.f32.mrf.mxu0 }
 0x2d3   : > { %v2372_v63 = vld [vmem:[#allocation6 + $0x60] sm:$0xff] }
 0x2d4   : > { %2223 = vst.msk [vmem:[#allocation6 + $0x68] sm:$0xff] %vm1288_vm1, %v2207_v59  ;;  %v2388_v41 = vadd.f32 %v2372_v63, %v2348_v18 }
 0x2d5   : > { %v2553_v29 = vld [vmem:[#allocation6 + $0x58] sm:$0xff] }
 0x2d6   : > { %2404 = vst.msk [vmem:[#allocation6 + $0x60] sm:$0xff] %vm1288_vm1, %v2388_v41  ;;  %3518 = vmatmul.msk.f32.gmra.mxu2 %vm1288_vm1, %v2787_v27  ;;  %v2569_v37 = vadd.f32 %v2553_v29, %v2527_v15  ;;  %v2351_v44 = vpop.f32.mrf.mxu3  ;;  %v2728_v41 = vld [vmem:[#allocation6 + $0x20] sm:$0xff] }
 0x2d7   : > { %v1993_v6 = vpop.f32.mrf.mxu1 }
 0x2d8   : > { %v2027_v11 = vadd.f32 %v2011_v40, %v1993_v6  ;;  %2585 = vst.msk [vmem:[#allocation6 + $0x58] sm:$0xff] %vm1288_vm1, %v2569_v37 }
 0x2d9   : > { %v2192_v17 = vld [vmem:[#allocation6 + $0x70] sm:$0xff]  ;;  %v2175_v21 = vpop.f32.mrf.mxu2 }
 0x2da   : > { %v2208_v39 = vadd.f32 %v2192_v17, %v2172_v13  ;;  %2043 = vst.msk [vmem:[#allocation6 + $0x78] sm:$0xff] %vm1288_vm1, %v2027_v11  ;;  %3502 = vmatmul.msk.f32.gmra.mxu1 %vm1288_vm1, %v2605_v22 }
 0x2db   : > { %v2373_v50 = vld [vmem:[#allocation6 + $0x68] sm:$0xff] }
 0x2dc   : > { %2224 = vst.msk [vmem:[#allocation6 + $0x70] sm:$0xff] %vm1288_vm1, %v2208_v39  ;;  %v2389_v33 = vadd.f32 %v2373_v50, %v2351_v44 }
 0x2dd   : > { %v2554_v42 = vld [vmem:[#allocation6 + $0x60] sm:$0xff] }
 0x2de   : > { %2405 = vst.msk [vmem:[#allocation6 + $0x68] sm:$0xff] %vm1288_vm1, %v2389_v33  ;;  %v2570_v45 = vadd.f32 %v2554_v42, %v2530_v48  ;;  %v2354_v55 = vpop.f32.mrf.mxu3 }
 0x2df   : > { %v2676_v30 = vpop.f32.mrf.mxu1 }
 0x2e0   : > { %v2740_v34 = vadd.f32 %v2724_v54, %v2676_v30  ;;  %2586 = vst.msk [vmem:[#allocation6 + $0x60] sm:$0xff] %vm1288_vm1, %v2570_v45  ;;  %v2730_v54 = vld [vmem:[#allocation6 + $0x30] sm:$0xff] }
 0x2e1   : > { %v2193_v38 = vld [vmem:[#allocation6 + $0x78] sm:$0xff]  ;;  %v2858_v7 = vpop.f32.mrf.mxu2 }
 0x2e2   : > { %v2209_v20 = vadd.f32 %v2193_v38, %v2175_v21  ;;  %2756 = vst.msk [vmem:[#allocation6] sm:$0xff] %vm1288_vm1, %v2740_v34  ;;  %v2729_v21 = vld [vmem:[#allocation6 + $0x28] sm:$0xff] }
 0x2e3   : > { %v2374_v43 = vld [vmem:[#allocation6 + $0x70] sm:$0xff] }
 0x2e4   : > { %2225 = vst.msk [vmem:[#allocation6 + $0x78] sm:$0xff] %vm1288_vm1, %v2209_v20  ;;  %v2390_v46 = vadd.f32 %v2374_v43, %v2354_v55 }
 0x2e5   : > { %v2555_v49 = vld [vmem:[#allocation6 + $0x68] sm:$0xff] }
 0x2e6   : > { %2406 = vst.msk [vmem:[#allocation6 + $0x70] sm:$0xff] %vm1288_vm1, %v2390_v46  ;;  %v2571_v62 = vadd.f32 %v2555_v49, %v2533_v58  ;;  %v2357_v3 = vpop.f32.mrf.mxu3  ;;  %v2731_v49 = vld [vmem:[#allocation6 + $0x38] sm:$0xff] }
 0x2e7   : > { %v2679_v24 = vpop.f32.mrf.mxu1 }
 0x2e8   : > { %v2741_v51 = vadd.f32 %v2725_v47, %v2679_v24  ;;  %2587 = vst.msk [vmem:[#allocation6 + $0x68] sm:$0xff] %vm1288_vm1, %v2571_v62 }
 0x2e9   : > { %v2906_v56 = vld [vmem:[#allocation6] sm:$0xff]  ;;  %v2861_v2 = vpop.f32.mrf.mxu2 }
 0x2ea   : > { %v2922_v53 = vadd.f32 %v2906_v56, %v2858_v7  ;;  %2757 = vst.msk [vmem:[#allocation6 + $0x8] sm:$0xff] %vm1288_vm1, %v2741_v51 }
 0x2eb   : > { %v2375_v5 = vld [vmem:[#allocation6 + $0x78] sm:$0xff] }
 0x2ec   : > { %2938 = vst.msk [vmem:[#allocation6] sm:$0xff] %vm1288_vm1, %v2922_v53  ;;  %v2391_v60 = vadd.f32 %v2375_v5, %v2357_v3  ;;  %v2732_v3 = vld [vmem:[#allocation6 + $0x40] sm:$0xff] }
 0x2ed   : > { %v2556_v61 = vld [vmem:[#allocation6 + $0x70] sm:$0xff] }
 0x2ee   : > { %2407 = vst.msk [vmem:[#allocation6 + $0x78] sm:$0xff] %vm1288_vm1, %v2391_v60  ;;  %v2572_v1 = vadd.f32 %v2556_v61, %v2536_v57 }
 0x2ef   : > { %v2682_v32 = vpop.f32.mrf.mxu1 }
 0x2f0   : > { %v2742_v16 = vadd.f32 %v2726_v12, %v2682_v32  ;;  %2588 = vst.msk [vmem:[#allocation6 + $0x70] sm:$0xff] %vm1288_vm1, %v2572_v1 }
 0x2f1   : > { %v2907_v19 = vld [vmem:[#allocation6 + $0x8] sm:$0xff]  ;;  %v2864_v10 = vpop.f32.mrf.mxu2 }
 0x2f2   : > { %v2923_v35 = vadd.f32 %v2907_v19, %v2861_v2  ;;  %2758 = vst.msk [vmem:[#allocation6 + $0x10] sm:$0xff] %vm1288_vm1, %v2742_v16 }
 0x2f3   : > { %v2954_v4 = vld [vmem:[#allocation6] sm:$0xff] }
 0x2f4   : > { %2939 = vst.msk [vmem:[#allocation6 + $0x8] sm:$0xff] %vm1288_vm1, %v2923_v35  ;;  %v2974_v8 = vadd.f32 %v5069_v28, %v2954_v4 }
 0x2f5   : > { %v2557_v25 = vld [vmem:[#allocation6 + $0x78] sm:$0xff] }
 0x2f6   : > { %v2573_v9 = vadd.f32 %v2557_v25, %v2539_v0  ;;  %v2990_v18 = vmax.f32 %v2974_v8, 0.0 }
 0x2f7   : > { %v2685_v26 = vpop.f32.mrf.mxu1 }
 0x2f8   : > { %2589 = vst.msk [vmem:[#allocation6 + $0x78] sm:$0xff] %vm1288_vm1, %v2573_v9  ;;  %v2743_v36 = vadd.f32 %v2727_v31, %v2685_v26  ;;  %3519 = vmatmul.msk.f32.vlgmr.msra.gmra.mxu3 %vm1288_vm1, %v2990_v18  ;;  %v2734_v31 = vld [vmem:[#allocation6 + $0x50] sm:$0xff] }
 0x2f9   : > { %v2908_v14 = vld [vmem:[#allocation6 + $0x10] sm:$0xff]  ;;  %v2867_v15 = vpop.f32.mrf.mxu2 }
 0x2fa   : > { %v2924_v23 = vadd.f32 %v2908_v14, %v2864_v10  ;;  %2759 = vst.msk [vmem:[#allocation6 + $0x18] sm:$0xff] %vm1288_vm1, %v2743_v36  ;;  %v2733_v10 = vld [vmem:[#allocation6 + $0x48] sm:$0xff] }
 0x2fb   : > { %v2955_v13 = vld [vmem:[#allocation6 + $0x8] sm:$0xff] }
 0x2fc   : > { %2940 = vst.msk [vmem:[#allocation6 + $0x10] sm:$0xff] %vm1288_vm1, %v2924_v23  ;;  %v2975_v52 = vadd.f32 %v5069_v28, %v2955_v13 }
 0x2fe   : > { %v2991_v59 = vmax.f32 %v2975_v52, 0.0 }
 0x2ff   : > { %v2688_v63 = vpop.f32.mrf.mxu1 }
 0x300   : > { %v2744_v27 = vadd.f32 %v2728_v41, %v2688_v63  ;;  %3520 = vmatmul.msk.f32.gmra.mxu3 %vm1288_vm1, %v2991_v59  ;;  %v2735_v41 = vld [vmem:[#allocation6 + $0x58] sm:$0xff] }
 0x301   : > { %v2909_v29 = vld [vmem:[#allocation6 + $0x18] sm:$0xff]  ;;  %v2870_v37 = vpop.f32.mrf.mxu2 }
 0x302   : > { %v2925_v44 = vadd.f32 %v2909_v29, %v2867_v15  ;;  %2760 = vst.msk [vmem:[#allocation6 + $0x20] sm:$0xff] %vm1288_vm1, %v2744_v27 }
 0x303   : > { %v2956_v6 = vld [vmem:[#allocation6 + $0x10] sm:$0xff] }
 0x304   : > { %2941 = vst.msk [vmem:[#allocation6 + $0x18] sm:$0xff] %vm1288_vm1, %v2925_v44  ;;  %v2976_v40 = vadd.f32 %v5069_v28, %v2956_v6 }
 0x306   : > { %v2992_v11 = vmax.f32 %v2976_v40, 0.0 }
 0x307   : > { %v2691_v17 = vpop.f32.mrf.mxu1 }
 0x308   : > { %v2745_v22 = vadd.f32 %v2729_v21, %v2691_v17  ;;  %3521 = vmatmul.msk.f32.gmra.mxu3 %vm1288_vm1, %v2992_v11  ;;  %v2736_v21 = vld [vmem:[#allocation6 + $0x60] sm:$0xff] }
 0x309   : > { %v2910_v39 = vld [vmem:[#allocation6 + $0x20] sm:$0xff]  ;;  %v2873_v48 = vpop.f32.mrf.mxu2 }
 0x30a   : > { %v2926_v50 = vadd.f32 %v2910_v39, %v2870_v37  ;;  %2761 = vst.msk [vmem:[#allocation6 + $0x28] sm:$0xff] %vm1288_vm1, %v2745_v22 }
 0x30b   : > { %v2957_v33 = vld [vmem:[#allocation6 + $0x18] sm:$0xff] }
 0x30c   : > { %2942 = vst.msk [vmem:[#allocation6 + $0x20] sm:$0xff] %vm1288_vm1, %v2926_v50  ;;  %v2977_v42 = vadd.f32 %v5069_v28, %v2957_v33 }
 0x30e   : > { %v2993_v45 = vmax.f32 %v2977_v42, 0.0 }
 0x30f   : > { %v2694_v30 = vpop.f32.mrf.mxu1 }
 0x310   : > { %v2746_v34 = vadd.f32 %v2730_v54, %v2694_v30  ;;  %3522 = vmatmul.msk.f32.gmra.mxu3 %vm1288_vm1, %v2993_v45  ;;  %v2737_v54 = vld [vmem:[#allocation6 + $0x68] sm:$0xff] }
 0x311   : > { %v2911_v38 = vld [vmem:[#allocation6 + $0x28] sm:$0xff]  ;;  %v2876_v55 = vpop.f32.mrf.mxu2 }
 0x312   : > { %v2927_v7 = vadd.f32 %v2911_v38, %v2873_v48  ;;  %2762 = vst.msk [vmem:[#allocation6 + $0x30] sm:$0xff] %vm1288_vm1, %v2746_v34 }
 0x313   : > { %v2958_v20 = vld [vmem:[#allocation6 + $0x20] sm:$0xff] }
 0x314   : > { %2943 = vst.msk [vmem:[#allocation6 + $0x28] sm:$0xff] %vm1288_vm1, %v2927_v7  ;;  %v2978_v58 = vadd.f32 %v5069_v28, %v2958_v20 }
 0x316   : > { %v2994_v43 = vmax.f32 %v2978_v58, 0.0 }
 0x317   : > { %v2697_v46 = vpop.f32.mrf.mxu1 }
 0x318   : > { %v2747_v62 = vadd.f32 %v2731_v49, %v2697_v46  ;;  %3523 = vmatmul.msk.f32.gmra.mxu3 %vm1288_vm1, %v2994_v43  ;;  %v2738_v49 = vld [vmem:[#allocation6 + $0x70] sm:$0xff] }
 0x319   : > { %v2912_v24 = vld [vmem:[#allocation6 + $0x30] sm:$0xff]  ;;  %v2879_v47 = vpop.f32.mrf.mxu2 }
 0x31a   : > { %v2928_v51 = vadd.f32 %v2912_v24, %v2876_v55  ;;  %2763 = vst.msk [vmem:[#allocation6 + $0x38] sm:$0xff] %vm1288_vm1, %v2747_v62 }
 0x31b   : > { %v2959_v56 = vld [vmem:[#allocation6 + $0x28] sm:$0xff] }
 0x31c   : > { %2944 = vst.msk [vmem:[#allocation6 + $0x30] sm:$0xff] %vm1288_vm1, %v2928_v51  ;;  %v2979_v2 = vadd.f32 %v5069_v28, %v2959_v56 }
 0x31e   : > { %v2995_v53 = vmax.f32 %v2979_v2, 0.0 }
 0x31f   : > { %v2700_v57 = vpop.f32.mrf.mxu1 }
 0x320   : > { %v2748_v5 = vadd.f32 %v2732_v3, %v2700_v57  ;;  %3524 = vmatmul.msk.f32.gmra.mxu3 %vm1288_vm1, %v2995_v53  ;;  %v2739_v3 = vld [vmem:[#allocation6 + $0x78] sm:$0xff] }
 0x321   : > { %v2913_v60 = vld [vmem:[#allocation6 + $0x38] sm:$0xff]  ;;  %v2882_v61 = vpop.f32.mrf.mxu2 }
 0x322   : > { %v2929_v1 = vadd.f32 %v2913_v60, %v2879_v47  ;;  %2764 = vst.msk [vmem:[#allocation6 + $0x40] sm:$0xff] %vm1288_vm1, %v2748_v5 }
 0x323   : > { %v2960_v32 = vld [vmem:[#allocation6 + $0x30] sm:$0xff] }
 0x324   : > { %2945 = vst.msk [vmem:[#allocation6 + $0x38] sm:$0xff] %vm1288_vm1, %v2929_v1  ;;  %v2980_v12 = vadd.f32 %v5069_v28, %v2960_v32 }
 0x326   : > { %v2996_v16 = vmax.f32 %v2980_v12, 0.0 }
 0x327   : > { %v2703_v19 = vpop.f32.mrf.mxu1 }
 0x328   : > { %v2749_v35 = vadd.f32 %v2733_v10, %v2703_v19  ;;  %3525 = vmatmul.msk.f32.gmra.mxu3 %vm1288_vm1, %v2996_v16 }
 0x329   : > { %v2914_v0 = vld [vmem:[#allocation6 + $0x40] sm:$0xff]  ;;  %v2885_v4 = vpop.f32.mrf.mxu2 }
 0x32a   : > { %v2930_v8 = vadd.f32 %v2914_v0, %v2882_v61  ;;  %2765 = vst.msk [vmem:[#allocation6 + $0x48] sm:$0xff] %vm1288_vm1, %v2749_v35 }
 0x32b   : > { %v2961_v25 = vld [vmem:[#allocation6 + $0x38] sm:$0xff] }
 0x32c   : > { %2946 = vst.msk [vmem:[#allocation6 + $0x40] sm:$0xff] %vm1288_vm1, %v2930_v8  ;;  %v2981_v9 = vadd.f32 %v5069_v28, %v2961_v25 }
 0x32e   : > { %v2997_v18 = vmax.f32 %v2981_v9, 0.0 }
 0x32f   : > { %v2706_v26 = vpop.f32.mrf.mxu1 }
 0x330   : > { %v2750_v36 = vadd.f32 %v2734_v31, %v2706_v26  ;;  %3526 = vmatmul.msk.f32.gmra.mxu3 %vm1288_vm1, %v2997_v18  ;;  %v5137_v18 = vld [vmem:[%s5239_s6] ss:$0 sm:$0xff] }
 0x331   : > { %v2915_v14 = vld [vmem:[#allocation6 + $0x48] sm:$0xff]  ;;  %v2888_v15 = vpop.f32.mrf.mxu2 }
 0x332   : > { %v2931_v23 = vadd.f32 %v2915_v14, %v2885_v4  ;;  %2766 = vst.msk [vmem:[#allocation6 + $0x50] sm:$0xff] %vm1288_vm1, %v2750_v36  ;;  %v3664_v36 = vld [vmem:[%s4328_s23 + $0x10] sm:$0xff] }
 0x333   : > { %v2962_v13 = vld [vmem:[#allocation6 + $0x40] sm:$0xff] }
 0x334   : > { %2947 = vst.msk [vmem:[#allocation6 + $0x48] sm:$0xff] %vm1288_vm1, %v2931_v23  ;;  %v2982_v52 = vadd.f32 %v5069_v28, %v2962_v13  ;;  %v3665_v13 = vld [vmem:[%s4328_s23 + $0x18] sm:$0xff] }
 0x336   : > { %v2998_v59 = vmax.f32 %v2982_v52, 0.0 }
 0x337   : > { %v2709_v63 = vpop.f32.mrf.mxu1 }
 0x338   : > { %v2751_v27 = vadd.f32 %v2735_v41, %v2709_v63  ;;  %3527 = vmatmul.msk.f32.gmra.mxu3 %vm1288_vm1, %v2998_v59 }
 0x339   : > { %v2916_v29 = vld [vmem:[#allocation6 + $0x50] sm:$0xff]  ;;  %v2891_v37 = vpop.f32.mrf.mxu2 }
 0x33a   : > { %v2932_v44 = vadd.f32 %v2916_v29, %v2888_v15  ;;  %2767 = vst.msk [vmem:[#allocation6 + $0x58] sm:$0xff] %vm1288_vm1, %v2751_v27  ;;  %v3666_v27 = vld [vmem:[%s4328_s23 + $0x20] sm:$0xff] }
 0x33b   : > { %v2963_v6 = vld [vmem:[#allocation6 + $0x48] sm:$0xff] }
 0x33c   : > { %2948 = vst.msk [vmem:[#allocation6 + $0x50] sm:$0xff] %vm1288_vm1, %v2932_v44  ;;  %v2983_v40 = vadd.f32 %v5069_v28, %v2963_v6 }
 0x33e   : > { %v2999_v11 = vmax.f32 %v2983_v40, 0.0  ;;  %v3667_v40 = vld [vmem:[%s4328_s23 + $0x28] sm:$0xff] }
 0x33f   : > { %v2712_v17 = vpop.f32.mrf.mxu1 }
 0x340   : > { %v2752_v22 = vadd.f32 %v2736_v21, %v2712_v17  ;;  %3528 = vmatmul.msk.f32.gmra.mxu3 %vm1288_vm1, %v2999_v11 }
 0x341   : > { %v2917_v39 = vld [vmem:[#allocation6 + $0x58] sm:$0xff]  ;;  %v2894_v50 = vpop.f32.mrf.mxu2 }
 0x342   : > { %v2933_v48 = vadd.f32 %v2917_v39, %v2891_v37  ;;  %2768 = vst.msk [vmem:[#allocation6 + $0x60] sm:$0xff] %vm1288_vm1, %v2752_v22  ;;  %v3668_v39 = vld [vmem:[%s4328_s23 + $0x30] sm:$0xff] }
 0x343   : > { %v2964_v33 = vld [vmem:[#allocation6 + $0x50] sm:$0xff] }
 0x344   : > { %2949 = vst.msk [vmem:[#allocation6 + $0x58] sm:$0xff] %vm1288_vm1, %v2933_v48  ;;  %v2984_v42 = vadd.f32 %v5069_v28, %v2964_v33 }
 0x346   : > { %v3000_v45 = vmax.f32 %v2984_v42, 0.0 }
 0x347   : > { %v2715_v30 = vpop.f32.mrf.mxu1 }
 0x348   : > { %v2753_v34 = vadd.f32 %v2737_v54, %v2715_v30  ;;  %3529 = vmatmul.msk.f32.gmra.mxu3 %vm1288_vm1, %v3000_v45  ;;  %v3669_v45 = vld [vmem:[%s4328_s23 + $0x38] sm:$0xff] }
 0x349   : > { %v2918_v38 = vld [vmem:[#allocation6 + $0x60] sm:$0xff]  ;;  %v2897_v58 = vpop.f32.mrf.mxu2 }
 0x34a   : > { %v2934_v55 = vadd.f32 %v2918_v38, %v2894_v50  ;;  %2769 = vst.msk [vmem:[#allocation6 + $0x68] sm:$0xff] %vm1288_vm1, %v2753_v34 }
 0x34b   : > { %v2965_v7 = vld [vmem:[#allocation6 + $0x58] sm:$0xff] }
 0x34c   : > { %2950 = vst.msk [vmem:[#allocation6 + $0x60] sm:$0xff] %vm1288_vm1, %v2934_v55  ;;  %v2985_v20 = vadd.f32 %v5069_v28, %v2965_v7  ;;  %v3670_v55 = vld [vmem:[%s4328_s23 + $0x40] sm:$0xff] }
 0x34e   : > { %v3001_v43 = vmax.f32 %v2985_v20, 0.0 }
 0x34f   : > { %v2718_v46 = vpop.f32.mrf.mxu1 }
 0x350   : > { %v2754_v62 = vadd.f32 %v2738_v49, %v2718_v46  ;;  %3530 = vmatmul.msk.f32.gmra.mxu3 %vm1288_vm1, %v3001_v43  ;;  %v3671_v46 = vld [vmem:[%s4328_s23 + $0x48] sm:$0xff] }
 0x351   : > { %v2919_v24 = vld [vmem:[#allocation6 + $0x68] sm:$0xff]  ;;  %v2900_v53 = vpop.f32.mrf.mxu2 }
 0x352   : > { %v2935_v47 = vadd.f32 %v2919_v24, %v2897_v58  ;;  %2770 = vst.msk [vmem:[#allocation6 + $0x70] sm:$0xff] %vm1288_vm1, %v2754_v62 }
 0x353   : > { %v2966_v51 = vld [vmem:[#allocation6 + $0x60] sm:$0xff] }
 0x354   : > { %2951 = vst.msk [vmem:[#allocation6 + $0x68] sm:$0xff] %vm1288_vm1, %v2935_v47  ;;  %v2986_v56 = vadd.f32 %v5069_v28, %v2966_v51  ;;  %v3672_v51 = vld [vmem:[%s4328_s23 + $0x50] sm:$0xff] }
 0x356   : > { %v3002_v2 = vmax.f32 %v2986_v56, 0.0 }
 0x357   : > { %v2721_v57 = vpop.f32.mrf.mxu1 }
 0x358   : > { %v2755_v5 = vadd.f32 %v2739_v3, %v2721_v57  ;;  %3531 = vmatmul.msk.f32.gmra.mxu3 %vm1288_vm1, %v3002_v2  ;;  %v3673_v3 = vld [vmem:[%s4328_s23 + $0x58] sm:$0xff] }
 0x359   : > { %v2920_v60 = vld [vmem:[#allocation6 + $0x70] sm:$0xff]  ;;  %v2903_v16 = vpop.f32.mrf.mxu2 }
 0x35a   : > { %v2936_v61 = vadd.f32 %v2920_v60, %v2900_v53  ;;  %2771 = vst.msk [vmem:[#allocation6 + $0x78] sm:$0xff] %vm1288_vm1, %v2755_v5 }
 0x35b   : > { %v2967_v1 = vld [vmem:[#allocation6 + $0x68] sm:$0xff] }
 0x35c   : > { %2952 = vst.msk [vmem:[#allocation6 + $0x70] sm:$0xff] %vm1288_vm1, %v2936_v61  ;;  %v2987_v32 = vadd.f32 %v5069_v28, %v2967_v1 }
 0x35e   : > { %v3003_v12 = vmax.f32 %v2987_v32, 0.0  ;;  %v3674_v32 = vld [vmem:[%s4328_s23 + $0x60] sm:$0xff] }
 0x360   : > { %3532 = vmatmul.msk.f32.gmra.mxu3 %vm1288_vm1, %v3003_v12 }
 0x361   : > { %v2921_v19 = vld [vmem:[#allocation6 + $0x78] sm:$0xff] }
 0x362   : > { %v2937_v10 = vadd.f32 %v2921_v19, %v2903_v16 }
 0x363   : > { %v2968_v35 = vld [vmem:[#allocation6 + $0x70] sm:$0xff] }
 0x364   : > { %2953 = vst.msk [vmem:[#allocation6 + $0x78] sm:$0xff] %vm1288_vm1, %v2937_v10  ;;  %v2988_v0 = vadd.f32 %v5069_v28, %v2968_v35  ;;  %v3675_v35 = vld [vmem:[%s4328_s23 + $0x68] sm:$0xff] }
 0x366   : > { %v3004_v4 = vmax.f32 %v2988_v0, 0.0 }
 0x368   : > { %3533 = vmatmul.msk.f32.gmra.mxu3 %vm1288_vm1, %v3004_v4 }
 0x36b   : > { %v2969_v8 = vld [vmem:[#allocation6 + $0x78] sm:$0xff] }
 0x36c   : > { %v2989_v25 = vadd.f32 %v5069_v28, %v2969_v8 }
 0x36e   : > { %v3005_v9 = vmax.f32 %v2989_v25, 0.0 }
 0x370   : > { %3534 = vmatmul.msk.f32.gmra.mxu3 %vm1288_vm1, %v3005_v9  ;;  %v3676_v9 = vld [vmem:[%s4328_s23 + $0x70] sm:$0xff] }
 0x37b   : > { %v3079_v26 = vpop.f32.mrf.mxu3 }
 0x37c   : > { %v3080_v31 = vadd.f32 %v5137_v18, %v3079_v26 }
 0x37e   : > { %v3127_v14 = vadd.f32 %v3664_v36, %v3080_v31 }
 0x380   : > { %v3143_v15 = vmax.f32 %v3127_v14, 0.0 }
 0x382   : > { %3159 = vst [vmem:[%s4275_s25] sm:$0xff] %v3143_v15  ;;  %v3677_v15 = vld [vmem:[%s4328_s23 + $0x78] sm:$0xff] }
 0x383   : > { %v3082_v23 = vpop.f32.mrf.mxu3 }
 0x384   : > { %v3083_v28 = vadd.f32 %v5137_v18, %v3082_v23 }
 0x386   : > { %v3128_v52 = vadd.f32 %v3665_v13, %v3083_v28 }
 0x388   : > { %v3144_v59 = vmax.f32 %v3128_v52, 0.0 }
 0x38a   : > { %3160 = vst [vmem:[%s4275_s25 + $0x8] sm:$0xff] %v3144_v59  ;;  %v3678_v59 = vld [vmem:[%s4328_s23 + $0x80] sm:$0xff] }
 0x38b   : > { %v3085_v63 = vpop.f32.mrf.mxu3 }
 0x38c   : > { %v3086_v41 = vadd.f32 %v5137_v18, %v3085_v63 }
 0x38e   : > { %v3129_v29 = vadd.f32 %v3666_v27, %v3086_v41 }
 0x390   : > { %v3145_v37 = vmax.f32 %v3129_v29, 0.0 }
 0x392   : > { %3161 = vst [vmem:[%s4275_s25 + $0x10] sm:$0xff] %v3145_v37  ;;  %v3679_v37 = vld [vmem:[%s4328_s23 + $0x88] sm:$0xff] }
 0x393   : > { %v3088_v44 = vpop.f32.mrf.mxu3 }
 0x394   : > { %v3089_v6 = vadd.f32 %v5137_v18, %v3088_v44 }
 0x396   : > { %v3130_v11 = vadd.f32 %v3667_v40, %v3089_v6 }
 0x398   : > { %v3146_v17 = vmax.f32 %v3130_v11, 0.0 }
 0x39a   : > { %3162 = vst [vmem:[%s4275_s25 + $0x18] sm:$0xff] %v3146_v17 }
 0x39b   : > { %v3091_v21 = vpop.f32.mrf.mxu3 }
 0x39c   : > { %v3092_v22 = vadd.f32 %v5137_v18, %v3091_v21 }
 0x39e   : > { %v3131_v48 = vadd.f32 %v3668_v39, %v3092_v22 }
 0x3a0   : > { %v3147_v50 = vmax.f32 %v3131_v48, 0.0 }
 0x3a2   : > { %3163 = vst [vmem:[%s4275_s25 + $0x20] sm:$0xff] %v3147_v50 }
 0x3a3   : > { %v3094_v33 = vpop.f32.mrf.mxu3 }
 0x3a4   : > { %v3095_v42 = vadd.f32 %v5137_v18, %v3094_v33 }
 0x3a6   : > { %v3132_v30 = vadd.f32 %v3669_v45, %v3095_v42 }
 0x3a8   : > { %v3148_v54 = vmax.f32 %v3132_v30, 0.0 }
 0x3aa   : > { %3164 = vst [vmem:[%s4275_s25 + $0x28] sm:$0xff] %v3148_v54 }
 0x3ab   : > { %v3097_v34 = vpop.f32.mrf.mxu3 }
 0x3ac   : > { %v3098_v38 = vadd.f32 %v5137_v18, %v3097_v34 }
 0x3ae   : > { %v3133_v7 = vadd.f32 %v3670_v55, %v3098_v38 }
 0x3b0   : > { %v3149_v20 = vmax.f32 %v3133_v7, 0.0 }
 0x3b2   : > { %3165 = vst [vmem:[%s4275_s25 + $0x30] sm:$0xff] %v3149_v20 }
 0x3b3   : > { %v3100_v58 = vpop.f32.mrf.mxu3 }
 0x3b4   : > { %v3101_v43 = vadd.f32 %v5137_v18, %v3100_v58 }
 0x3b6   : > { %v3134_v49 = vadd.f32 %v3671_v46, %v3101_v43 }
 0x3b8   : > { %v3150_v62 = vmax.f32 %v3134_v49, 0.0 }
 0x3ba   : > { %3166 = vst [vmem:[%s4275_s25 + $0x38] sm:$0xff] %v3150_v62 }
 0x3bb   : > { %v3103_v24 = vpop.f32.mrf.mxu3 }
 0x3bc   : > { %v3104_v47 = vadd.f32 %v5137_v18, %v3103_v24 }
 0x3be   : > { %v3135_v56 = vadd.f32 %v3672_v51, %v3104_v47 }
 0x3c0   : > { %v3151_v2 = vmax.f32 %v3135_v56, 0.0 }
 0x3c2   : > { %3167 = vst [vmem:[%s4275_s25 + $0x40] sm:$0xff] %v3151_v2 }
 0x3c3   : > { %v3106_v53 = vpop.f32.mrf.mxu3 }
 0x3c4   : > { %v3107_v57 = vadd.f32 %v5137_v18, %v3106_v53 }
 0x3c6   : > { %v3136_v5 = vadd.f32 %v3673_v3, %v3107_v57 }
 0x3c8   : > { %v3152_v60 = vmax.f32 %v3136_v5, 0.0 }
 0x3ca   : > { %3168 = vst [vmem:[%s4275_s25 + $0x48] sm:$0xff] %v3152_v60 }
 0x3cb   : > { %v3109_v61 = vpop.f32.mrf.mxu3 }
 0x3cc   : > { %v3110_v1 = vadd.f32 %v5137_v18, %v3109_v61 }
 0x3ce   : > { %v3137_v12 = vadd.f32 %v3674_v32, %v3110_v1 }
 0x3d0   : > { %v3153_v16 = vmax.f32 %v3137_v12, 0.0 }
 0x3d2   : > { %3169 = vst [vmem:[%s4275_s25 + $0x50] sm:$0xff] %v3153_v16 }
 0x3d3   : > { %v3112_v19 = vpop.f32.mrf.mxu3 }
 0x3d4   : > { %v3113_v10 = vadd.f32 %v5137_v18, %v3112_v19 }
 0x3d6   : > { %v3138_v0 = vadd.f32 %v3675_v35, %v3113_v10 }
 0x3d8   : > { %v3154_v4 = vmax.f32 %v3138_v0, 0.0 }
 0x3da   : > { %3170 = vst [vmem:[%s4275_s25 + $0x58] sm:$0xff] %v3154_v4 }
 0x3db   : > { %v3115_v8 = vpop.f32.mrf.mxu3 }
 0x3dc   : > { %v3116_v25 = vadd.f32 %v5137_v18, %v3115_v8 }
 0x3de   : > { %v3139_v26 = vadd.f32 %v3676_v9, %v3116_v25 }
 0x3e0   : > { %v3155_v31 = vmax.f32 %v3139_v26, 0.0 }
 0x3e2   : > { %3171 = vst [vmem:[%s4275_s25 + $0x60] sm:$0xff] %v3155_v31 }
 0x3e3   : > { %v3118_v36 = vpop.f32.mrf.mxu3 }
 0x3e4   : > { %v3119_v14 = vadd.f32 %v5137_v18, %v3118_v36 }
 0x3e6   : > { %v3140_v23 = vadd.f32 %v3677_v15, %v3119_v14 }
 0x3e8   : > { %v3156_v28 = vmax.f32 %v3140_v23, 0.0 }
 0x3ea   : > { %3172 = vst [vmem:[%s4275_s25 + $0x68] sm:$0xff] %v3156_v28 }
 0x3eb   : > { %v3121_v13 = vpop.f32.mrf.mxu3 }
 0x3ec   : > { %v3122_v52 = vadd.f32 %v5137_v18, %v3121_v13 }
 0x3ee   : > { %v3141_v63 = vadd.f32 %v3678_v59, %v3122_v52 }
 0x3f0   : > { %v3157_v41 = vmax.f32 %v3141_v63, 0.0 }
 0x3f2   : > { %3173 = vst [vmem:[%s4275_s25 + $0x70] sm:$0xff] %v3157_v41 }
 0x3f3   : > { %v3124_v27 = vpop.f32.mrf.mxu3 }
 0x3f4   : > { %v3125_v29 = vadd.f32 %v5137_v18, %v3124_v27 }
 0x3f6   : > { %v3142_v44 = vadd.f32 %v3679_v37, %v3125_v29 }
 0x3f8   : > { %v3158_v6 = vmax.f32 %v3142_v44, 0.0 }
 0x3fa   : > { %3174 = vst [vmem:[%s4275_s25 + $0x78] sm:$0xff] %v3158_v6 }
 0x3fb   : > { %3905 = shalt.err (!%p3902_p8)
}
 0x3fc   : > { %s3990_s25 = smov 128   ;;  %s3991_s21 = smov 8  }
 0x3fd   : > { %3574 = dma.vmem_to_hbm [thread:$0]  (%p5306_p5), %s3191_s28, 2048, %s3193_s22, %s3176_s10, %s3990_s25, %s3990_s25, %s3991_s21  }
 0x3fe PF: > { %s5307_s20 = sld [smem:[#allocation36_spill]] }
 0x3ff   : > { %s5308_s7 = sld [smem:[#allocation31_spill]] }
 0x400   : > { %s5309_s14 = sld [smem:[#allocation40_spill]] }
 0x404   : > { %p3588_p10 = scmp.ge.s32.totalorder %s5307_s20, 2 }
 0x405   : > { %s3207_s18 = sand.u32 1, %s5308_s7  }
 0x406   : > { %p5310_p11 = scmp.ne.s32.totalorder %s5309_s14, 0  ;;  %s3208_s26 = scalar_lea.sflag [#allocation10], %s3207_s18 }
 0x408   : > { %p3581_p12 = pnand %p3588_p10, %p5310_p11 }
 0x40a   : > { %p3582_p13 = pneg %p3581_p12 }
 0x40c   : > { %3949 = dma.done.wait (%p3582_p13), %s3208_s26, 2048  }
 0x40d   : > { %3951 = vsyncadd (%p3582_p13), %s3208_s26, 4294965248  ;;  %s21_s8 = sadd.s32 1, %s5307_s20   ;;  %s5311_s24 = sld [smem:[#allocation32_spill]] }
 0x40e   : > { %p18_p0 = scmp.ge.s32.totalorder %s21_s8, 6   ;;  %s5312_s25 = sld [smem:[#allocation33_spill]] }
 0x40f   : > { %s5313_s26 = sld [smem:[#allocation41_spill]] }
 0x410   : > { %s5314_s27 = sld [smem:[#allocation34_spill]]  ;;  %20 = sbr.rel (!%p18_p0) target bundleno = 9 (0x9), region = 145 }
 0x411   : > { %s5315_s28 = sld [smem:[#allocation35_spill]] }
 0x412   : > { %s5316_s29 = sld [smem:[#allocation37_spill]] }
 0x413   : > { %s5317_s30 = sld [smem:[#allocation39_spill]] }
 0x415   :  { %3214 = vsyncpa [#allocation9], 1 }
 0x416   :  { %3216 = vsyncpa [#allocation9 + $0x1], 1 }
 0x417   :  { %3217 = vsyncpa [#allocation10], 1 }
 0x418   :  { %3219 = vsyncpa [#allocation10 + $0x1], 1 }
 0x419   :  { %3220 = vsyncmov [#allocation7] }
 0x41c   :  { %s3221_s11 = vpop.sfrf %3220 }
 0x41d   :  { %p3541_p1 = scmp.ne.s32.totalorder %s3221_s11, 0 }
 0x41f   :  { %3225 = shalt.err (%p3541_p1)  }
 0x420   :  { %3227 = vsyncmov [#allocation7 + $0x1] }
 0x423   :  { %s3228_s12 = vpop.sfrf %3227 }
 0x424   :  { %p3542_p7 = scmp.ne.s32.totalorder %s3228_s12, 0 }
 0x426   :  { %3232 = shalt.err (%p3542_p7)  }
 0x427   :  { %3234 = vsyncmov [#allocation7 + $0x2] }
 0x42a   :  { %s3235_s13 = vpop.sfrf %3234 }
 0x42b   :  { %p3543_p5 = scmp.ne.s32.totalorder %s3235_s13, 0 }
 0x42d   :  { %3239 = shalt.err (%p3543_p5)  }
 0x42e   :  { %3241 = vsyncmov [#allocation7 + $0x3] }
 0x431   :  { %s3242_s16 = vpop.sfrf %3241 }
 0x432   :  { %p3544_p2 = scmp.ne.s32.totalorder %s3242_s16, 0 }
 0x434   :  { %3246 = shalt.err (%p3544_p2)  }
 0x435   :  { %3248 = vsyncmov [#allocation7 + $0x4] }
 0x438   :  { %s3249_s0 = vpop.sfrf %3248 }
 0x439   :  { %p3545_p3 = scmp.ne.s32.totalorder %s3249_s0, 0 }
 0x43b   :  { %3253 = shalt.err (%p3545_p3)  }
 0x43c   :  { %3255 = vsyncmov [#allocation7 + $0x5] }
 0x43f   :  { %s3256_s1 = vpop.sfrf %3255 }
 0x440   :  { %p3546_p4 = scmp.ne.s32.totalorder %s3256_s1, 0 }
 0x442   :  { %3260 = shalt.err (%p3546_p4)  }

</bundles_post_ra>
